<compile_context>
chip_gen: v5e
topology: v5e:2x2
jax: 0.10.0
libtpu: 0.0.40
codegen_flags: <defaults>
</compile_context>

<pallas_src>
import math

import jax
import jax.numpy as jnp
from jax import lax
from jax.experimental import pallas as pl
from jax.experimental.pallas import tpu as pltpu


def _round_up(n, m):
    return ((n + m - 1) // m) * m


def _cdiv(a, b):
    return (a + b - 1) // b


# ---------------------------------------------------------------------------
# Weight padding helpers (keep PyTorch i,f,g,o gate blocks at lane-aligned k*Hp)
# ---------------------------------------------------------------------------
def _pad_gate_weight(w, H, Hp, in_dim, in_dim_p):
    """(4H, in_dim) -> (4Hp, in_dim_p); gate block k moved to rows [k*Hp, k*Hp+H)."""
    out = jnp.zeros((4 * Hp, in_dim_p), jnp.float32)
    for k in range(4):
        out = out.at[k * Hp:k * Hp + H, :in_dim].set(w[k * H:(k + 1) * H, :])
    return out


def _pad_gate_bias(b, H, Hp):
    out = jnp.zeros((4 * Hp,), jnp.float32)
    for k in range(4):
        out = out.at[k * Hp:k * Hp + H].set(b[k * H:(k + 1) * H])
    return out


def _vmem_limit_bytes():
    """~100 MiB on 128-MiB-VMEM chips (v5e/v6e), 48 MiB on 64-MiB-VMEM v7x."""
    cap = 64 * 1024 * 1024
    try:
        cap = getattr(pltpu.get_tpu_info(), "vmem_capacity_bytes", cap)
    except Exception:
        pass
    if cap >= 128 * 1024 * 1024:
        return 100 * 1024 * 1024
    return 48 * 1024 * 1024


def _const_spec(shape):
    """BlockSpec for a grid-invariant operand; single-buffered if supported."""
    n = len(shape)
    index_map = lambda b, t: (0,) * n
    try:
        return pl.BlockSpec(shape, index_map, pipeline_mode=pl.Buffered(1))
    except Exception:
        return pl.BlockSpec(shape, index_map)


# ---------------------------------------------------------------------------
# Fused multi-layer LSTM + classifier kernel
# ---------------------------------------------------------------------------
def _make_fused_lstm_kernel(num_layers, Hp, tt, t_real, needs_mask, unroll):
    """Build the kernel for one (batch-shard, time-block) grid.

    Refs:
      x_ref     : (tt, Bb, Dp)   bf16  streamed input block (time-major)
      wih0_ref  : (Dp, 4Hp)      bf16  layer-0 input->gate weights (transposed)
      wihs_ref  : (max(L-1,1), Hp, 4Hp) bf16  layers 1..L-1 input->gate weights
      whh_ref   : (L, Hp, 4Hp)   bf16  hidden->gate weights
      b_ref     : (L, 1, 4Hp)    f32   b_ih + b_hh
      wcls_ref  : (Hp, Cp)       bf16  classifier weights (transposed)
      bcls_ref  : (1, Cp)        f32   classifier bias
      logits_ref: (Bb, Cp)       f32   output (written at the last time block)
      seq_scr   : (tt, Bb, Hp)   bf16  current layer's block output (next layer's input)
      xp_scr    : (tt, Bb, 4Hp)  f32   hoisted gate pre-activations for the block
      h_scr/c_scr : (L, Bb, Hp)  f32   per-layer carries, persistent across time blocks
    Gate order follows PyTorch: i, f, g, o (each Hp wide, lane-aligned).
    """

    def kernel(x_ref, wih0_ref, wihs_ref, whh_ref, b_ref, wcls_ref, bcls_ref,
               logits_ref, seq_scr, xp_scr, h_scr, c_scr):
        _, Bb, Dp = x_ref.shape
        tb = pl.program_id(1)                       # time-block index

        @pl.when(tb == 0)
        def _():
            h_scr[...] = jnp.zeros_like(h_scr)
            c_scr[...] = jnp.zeros_like(c_scr)

        def run_layer(layer, xp, write_seq):
            # xp: (tt, Bb, 4Hp) f32 pre-activations with bias already folded in.
            xp_scr[...] = xp
            whh_l = whh_ref[layer]                  # (Hp, 4Hp) bf16, block-resident

            def step(t, carry):
                h_prev = h_scr[layer]
                c_prev = c_scr[layer]
                gates = xp_scr[t] + jnp.dot(
                    h_prev.astype(jnp.bfloat16), whh_l,
                    preferred_element_type=jnp.float32)
                i_g = jax.nn.sigmoid(gates[:, 0 * Hp:1 * Hp])
                f_g = jax.nn.sigmoid(gates[:, 1 * Hp:2 * Hp])
                g_g = jnp.tanh(gates[:, 2 * Hp:3 * Hp])
                o_g = jax.nn.sigmoid(gates[:, 3 * Hp:4 * Hp])
                c_new = f_g * c_prev + i_g * g_g
                h_new = o_g * jnp.tanh(c_new)
                if needs_mask:
                    # Padded tail steps (global t >= real T) must not move the carries.
                    valid = (tb * tt + t) < t_real
                    c_new = jnp.where(valid, c_new, c_prev)
                    h_new = jnp.where(valid, h_new, h_prev)
                c_scr[layer] = c_new
                h_scr[layer] = h_new
                if write_seq:
                    seq_scr[t] = h_new.astype(jnp.bfloat16)
                return carry

            lax.fori_loop(0, tt, step, 0, unroll=unroll)

        # Layer 0: hoisted projection of the whole streamed x block (one MXU matmul).
        xp0 = jnp.dot(x_ref[...].reshape(tt * Bb, Dp), wih0_ref[...],
                      preferred_element_type=jnp.float32) + b_ref[0]
        run_layer(0, xp0.reshape(tt, Bb, 4 * Hp), write_seq=num_layers > 1)

        # Layers 1..L-1: input is the previous layer's block, held in VMEM (bf16).
        for layer in range(1, num_layers):
            xp = jnp.dot(seq_scr[...].reshape(tt * Bb, Hp), wihs_ref[layer - 1],
                         preferred_element_type=jnp.float32) + b_ref[layer]
            run_layer(layer, xp.reshape(tt, Bb, 4 * Hp),
                      write_seq=layer < num_layers - 1)

        # Final time block: h_scr[last] holds h at the true last timestep.
        # Fused classifier (dropout = identity in eval mode).
        @pl.when(tb == pl.num_programs(1) - 1)
        def _():
            logits_ref[...] = (
                jnp.dot(h_scr[num_layers - 1].astype(jnp.bfloat16), wcls_ref[...],
                        preferred_element_type=jnp.float32)
                + bcls_ref[...]
            )

    return kernel


# ---------------------------------------------------------------------------
# Forward pass (eval mode: dropout = identity)
# ---------------------------------------------------------------------------
def lstm_model_forward(x, params, *, max_time_block=32, batch_block=None):
    """x: (B, T, input_size) float32 -> (B, num_classes) float32."""
    B, T, D = x.shape
    lstm_params = params["lstm"]
    L = len(lstm_params)
    H = lstm_params[0][1].shape[1]                 # w_hh is (4H, H)
    w_cls, b_cls = params["classifier"]            # (C, H), (C,)
    C = w_cls.shape[0]

    Bp = _round_up(B, 8)
    Dp = _round_up(D, 128)
    Hp = _round_up(H, 128)
    Cp = _round_up(C, 128)

    # Batch sharding: nb shards of Bb rows each.  nb > 1 ("parallel" grid axis)
    # lets a v7x megacore split the batch across its two TensorCores
    # (use batch_block = Bp // 2 for B >= 16).
    Bb = Bp if batch_block is None else _round_up(min(batch_block, Bp), 8)
    nb = _cdiv(Bp, Bb)
    Bp = nb * Bb

    # Time blocking: near-equal blocks so padding waste is < one block even for
    # awkward (e.g. prime) T; the padded tail is masked inside the kernel.
    tt = max(1, min(max_time_block, T))
    nt = _cdiv(T, tt)
    tt = _cdiv(T, nt)
    T_pad = nt * tt
    needs_mask = T_pad != T
    unroll = True if tt <= 8 else 4                # bound vreg live ranges for big blocks

    # Time-major, (8,128)-padded, bf16 input: (T_pad, Bp, Dp).
    x_tm = jnp.transpose(x, (1, 0, 2))
    x_tm = jnp.pad(x_tm, ((0, T_pad - T), (0, Bp - B), (0, Dp - D))).astype(jnp.bfloat16)

    # Weights: bf16 for the MXU; PyTorch (i,f,g,o) gate blocks moved to k*Hp.
    # NOTE: layer fusion keeps every layer's weights VMEM-resident
    # (~L*(Dp+Hp)*4Hp*2 bytes bf16) — size H / max_time_block against 64 MiB on v7x.
    wih0_t = _pad_gate_weight(lstm_params[0][0], H, Hp, D, Dp).T.astype(jnp.bfloat16)
    wihs, whhs, biases = [], [], []
    for layer, (w_ih, w_hh, b_ih, b_hh) in enumerate(lstm_params):
        if layer > 0:
            wihs.append(_pad_gate_weight(w_ih, H, Hp, H, Hp).T)
        whhs.append(_pad_gate_weight(w_hh, H, Hp, H, Hp).T)
        biases.append(_pad_gate_bias(b_ih + b_hh, H, Hp))
    wihs_t = (jnp.stack(wihs) if wihs else jnp.zeros((1, Hp, 4 * Hp), jnp.float32)
              ).astype(jnp.bfloat16)                               # (max(L-1,1), Hp, 4Hp)
    whh_t = jnp.stack(whhs).astype(jnp.bfloat16)                   # (L, Hp, 4Hp)
    bias_all = jnp.stack(biases)[:, None, :]                       # (L, 1, 4Hp) f32
    wcls_t = jnp.zeros((Hp, Cp), jnp.float32).at[:H, :C].set(w_cls.T).astype(jnp.bfloat16)
    bcls_p = jnp.zeros((1, Cp), jnp.float32).at[0, :C].set(b_cls)

    cparams = pltpu.CompilerParams(
        dimension_semantics=("parallel", "arbitrary"),   # batch shards parallel;
        vmem_limit_bytes=_vmem_limit_bytes(),            # h/c carried across time blocks
    )

    kernel = _make_fused_lstm_kernel(L, Hp, tt, T, needs_mask, unroll)
    logits_p = pl.pallas_call(
        kernel,
        grid=(nb, nt),
        in_specs=[
            pl.BlockSpec((tt, Bb, Dp), lambda b, t: (t, b, 0)),    # streamed x
            _const_spec((Dp, 4 * Hp)),                             # W_ih layer 0
            _const_spec((max(L - 1, 1), Hp, 4 * Hp)),              # W_ih layers 1..L-1
            _const_spec((L, Hp, 4 * Hp)),                          # W_hh all layers
            _const_spec((L, 1, 4 * Hp)),                           # b_ih + b_hh
            _const_spec((Hp, Cp)),                                 # classifier weight
            _const_spec((1, Cp)),                                  # classifier bias
        ],
        out_specs=pl.BlockSpec((Bb, Cp), lambda b, t: (b, 0)),
        out_shape=jax.ShapeDtypeStruct((Bp, Cp), jnp.float32),
        scratch_shapes=[
            pltpu.VMEM((tt, Bb, Hp), jnp.bfloat16),      # inter-layer block activations
            pltpu.VMEM((tt, Bb, 4 * Hp), jnp.float32),   # hoisted gate pre-activations
            pltpu.VMEM((L, Bb, Hp), jnp.float32),        # h carries (per layer)
            pltpu.VMEM((L, Bb, Hp), jnp.float32),        # c carries (per layer)
        ],
        compiler_params=cparams,
    )(x_tm, wih0_t, wihs_t, whh_t, bias_all, wcls_t, bcls_p)

    return logits_p[:B, :C]


# ---------------------------------------------------------------------------
# Deterministic parameter init (PyTorch-style uniform(-1/sqrt(H), 1/sqrt(H)))
# ---------------------------------------------------------------------------
def init_params(key, input_size, hidden_size, num_layers, num_classes):
    bound = 1.0 / math.sqrt(hidden_size)
    params = {"lstm": [], "classifier": None}
    for layer in range(num_layers):
        in_dim = input_size if layer == 0 else hidden_size
        key, k1, k2, k3, k4 = jax.random.split(key, 5)
        w_ih = jax.random.uniform(k1, (4 * hidden_size, in_dim), jnp.float32, -bound, bound)
        w_hh = jax.random.uniform(k2, (4 * hidden_size, hidden_size), jnp.float32, -bound, bound)
        b_ih = jax.random.uniform(k3, (4 * hidden_size,), jnp.float32, -bound, bound)
        b_hh = jax.random.uniform(k4, (4 * hidden_size,), jnp.float32, -bound, bound)
        params["lstm"].append((w_ih, w_hh, b_ih, b_hh))

    key, k1, k2 = jax.random.split(key, 3)
    w_cls = jax.random.uniform(k1, (num_classes, hidden_size), jnp.float32, -bound, bound)
    b_cls = jax.random.uniform(k2, (num_classes,), jnp.float32, -bound, bound)
    params["classifier"] = (w_cls, b_cls)
    return params


# ---------------------------------------------------------------------------
# Pure-JAX f32 reference (for correctness check)
# ---------------------------------------------------------------------------
def ref_forward(x, params):
    B, T, _ = x.shape
    seq = x
    for (w_ih, w_hh, b_ih, b_hh) in params["lstm"]:
        H = w_hh.shape[1]
        h = jnp.zeros((B, H), jnp.float32)
        c = jnp.zeros((B, H), jnp.float32)
        outs = []
        for t in range(T):
            gates = seq[:, t, :] @ w_ih.T + h @ w_hh.T + b_ih + b_hh
            i_g = jax.nn.sigmoid(gates[:, 0:H])
            f_g = jax.nn.sigmoid(gates[:, H:2 * H])
            g_g = jnp.tanh(gates[:, 2 * H:3 * H])
            o_g = jax.nn.sigmoid(gates[:, 3 * H:4 * H])
            c = f_g * c + i_g * g_g
            h = o_g * jnp.tanh(c)
            outs.append(h)
        seq = jnp.stack(outs, axis=1)
    last = seq[:, -1, :]
    w_cls, b_cls = params["classifier"]
    return last @ w_cls.T + b_cls


# ---------------------------------------------------------------------------
if __name__ == "__main__":
    input_size, hidden_size, num_layers, num_classes = 16, 32, 2, 4

    key = jax.random.PRNGKey(0)
    key, kx, kx2 = jax.random.split(key, 3)
    params = init_params(key, input_size, hidden_size, num_layers, num_classes)

    # bf16 MXU operands -> compare to the f32 reference with a loosened tolerance.
    TOL = 3e-2

    # Case 1: B=2, T=8, two time blocks -> exercises the h/c carry across grid steps.
    x = jax.random.normal(kx, (2, 8, input_size), jnp.float32)
    ref = ref_forward(x, params)
    out = jax.block_until_ready(lstm_model_forward(x, params, max_time_block=4))
    assert out.shape == (2, num_classes)
    assert jnp.allclose(out, ref, atol=TOL, rtol=TOL), (out, ref)

    # Case 2: padded-tail path (T=8 split into 3 blocks of 3 -> 1 masked step).
    out2 = jax.block_until_ready(lstm_model_forward(x, params, max_time_block=3))
    assert jnp.allclose(out2, ref, atol=TOL, rtol=TOL), (out2, ref)

    # Case 3: batch-sharded grid (the "parallel" axis a v7x megacore would split).
    xb = jax.random.normal(kx2, (18, 8, input_size), jnp.float32)
    refb = ref_forward(xb, params)
    outb = jax.block_until_ready(
        lstm_model_forward(xb, params, max_time_block=4, batch_block=8))
    assert outb.shape == (18, num_classes)
    assert jnp.allclose(outb, refb, atol=TOL, rtol=TOL), (outb, refb)

    print("KERNEL_OK")
</pallas_src>

<mosaic_0001>
module attributes {stable_mosaic.version = 11 : i64} {
  func.func @kernel(%arg0: i32, %arg1: i32, %arg2: memref<4x8x128xbf16, #tpu.memory_space<vmem>>, %arg3: memref<128x512xbf16, #tpu.memory_space<vmem>>, %arg4: memref<1x128x512xbf16, #tpu.memory_space<vmem>>, %arg5: memref<2x128x512xbf16, #tpu.memory_space<vmem>>, %arg6: memref<2x1x512xf32, #tpu.memory_space<vmem>>, %arg7: memref<128x128xbf16, #tpu.memory_space<vmem>>, %arg8: memref<1x128xf32, #tpu.memory_space<vmem>>, %arg9: memref<8x128xf32, #tpu.memory_space<vmem>>, %arg10: memref<4x8x128xbf16, #tpu.memory_space<vmem>>, %arg11: memref<4x8x512xf32, #tpu.memory_space<vmem>>, %arg12: memref<2x8x128xf32, #tpu.memory_space<vmem>>, %arg13: memref<2x8x128xf32, #tpu.memory_space<vmem>>) attributes {dimension_semantics = [#tpu.dimension_semantics<parallel>, #tpu.dimension_semantics<arbitrary>], iteration_bounds = array<i64: 1, 2>, scalar_prefetch = 0 : i64, scratch_operands = 4 : i64, tpu.core_type = #tpu.core_type<tc>, window_params = [{transform_indices = @transform_0, window_bounds = array<i64: 4, 8, 128>}, {pipeline_mode = #tpu.pipeline_mode<synchronous>, transform_indices = @transform_1, window_bounds = array<i64: 128, 512>}, {pipeline_mode = #tpu.pipeline_mode<synchronous>, transform_indices = @transform_2, window_bounds = array<i64: 1, 128, 512>}, {pipeline_mode = #tpu.pipeline_mode<synchronous>, transform_indices = @transform_3, window_bounds = array<i64: 2, 128, 512>}, {pipeline_mode = #tpu.pipeline_mode<synchronous>, transform_indices = @transform_4, window_bounds = array<i64: 2, 1, 512>}, {pipeline_mode = #tpu.pipeline_mode<synchronous>, transform_indices = @transform_5, window_bounds = array<i64: 128, 128>}, {pipeline_mode = #tpu.pipeline_mode<synchronous>, transform_indices = @transform_6, window_bounds = array<i64: 1, 128>}, {transform_indices = @transform_7, window_bounds = array<i64: 8, 128>}]} {
    %c0_i32 = arith.constant 0 : i32
    %0 = arith.cmpi eq, %arg1, %c0_i32 : i32
    %1 = arith.extui %0 : i1 to i32
    %c0_i32_0 = arith.constant 0 : i32
    %2 = arith.cmpi ne, %1, %c0_i32_0 : i32
    scf.if %2 {
      %cst_189 = arith.constant 0.000000e+00 : f32
      %379 = vector.broadcast %cst_189 : f32 to vector<2x8x128xf32>
      %c0_190 = arith.constant 0 : index
      %c0_191 = arith.constant 0 : index
      %c0_192 = arith.constant 0 : index
      %380 = vector.load %arg12[%c0_190, %c0_191, %c0_192] : memref<2x8x128xf32, #tpu.memory_space<vmem>>, vector<2x8x128xf32>
      tpu.vector_store %arg12[%c0_190, %c0_191, %c0_192], %379 {strides = array<i32>} : memref<2x8x128xf32, #tpu.memory_space<vmem>>, vector<2x8x128xf32>,
      %cst_193 = arith.constant 0.000000e+00 : f32
      %381 = vector.broadcast %cst_193 : f32 to vector<2x8x128xf32>
      %c0_194 = arith.constant 0 : index
      %c0_195 = arith.constant 0 : index
      %c0_196 = arith.constant 0 : index
      %382 = vector.load %arg13[%c0_194, %c0_195, %c0_196] : memref<2x8x128xf32, #tpu.memory_space<vmem>>, vector<2x8x128xf32>
      tpu.vector_store %arg13[%c0_194, %c0_195, %c0_196], %381 {strides = array<i32>} : memref<2x8x128xf32, #tpu.memory_space<vmem>>, vector<2x8x128xf32>,
    } else {
    }
    %c0 = arith.constant 0 : index
    %c0_1 = arith.constant 0 : index
    %c0_2 = arith.constant 0 : index
    %3 = vector.load %arg2[%c0, %c0_1, %c0_2] : memref<4x8x128xbf16, #tpu.memory_space<vmem>>, vector<4x8x128xbf16>
    %4 = vector.shape_cast %3 : vector<4x8x128xbf16> to vector<32x128xbf16>
    %c0_3 = arith.constant 0 : index
    %c0_4 = arith.constant 0 : index
    %5 = vector.load %arg3[%c0_3, %c0_4] : memref<128x512xbf16, #tpu.memory_space<vmem>>, vector<128x512xbf16>
    %cst = arith.constant dense<0.000000e+00> : vector<32x512xf32>
    %6 = tpu.matmul %4, %5, %cst {dimension_numbers = #tpu.dot_dimension_numbers<[1], [0], [0], [1], [0, 0, 1, 1], [], []>} : vector<32x128xbf16>, vector<128x512xbf16>, vector<32x512xf32> -> vector<32x512xf32>
    %c0_5 = arith.constant 0 : index
    %c0_6 = arith.constant 0 : index
    %c0_7 = arith.constant 0 : index
    %7 = vector.load %arg6[%c0_5, %c0_6, %c0_7] : memref<2x1x512xf32, #tpu.memory_space<vmem>>, vector<1x1x512xf32>
    %8 = vector.shape_cast %7 : vector<1x1x512xf32> to vector<1x512xf32>
    %9 = vector.broadcast %8 : vector<1x512xf32> to vector<32x512xf32>
    %10 = arith.addf %6, %9 : vector<32x512xf32>
    %11 = vector.shape_cast %10 : vector<32x512xf32> to vector<4x8x512xf32>
    %c0_8 = arith.constant 0 : index
    %c0_9 = arith.constant 0 : index
    %c0_10 = arith.constant 0 : index
    %12 = vector.load %arg11[%c0_8, %c0_9, %c0_10] : memref<4x8x512xf32, #tpu.memory_space<vmem>>, vector<4x8x512xf32>
    tpu.vector_store %arg11[%c0_8, %c0_9, %c0_10], %11 {strides = array<i32>} : memref<4x8x512xf32, #tpu.memory_space<vmem>>, vector<4x8x512xf32>,
    %c0_11 = arith.constant 0 : index
    %c0_12 = arith.constant 0 : index
    %c0_13 = arith.constant 0 : index
    %13 = vector.load %arg5[%c0_11, %c0_12, %c0_13] : memref<2x128x512xbf16, #tpu.memory_space<vmem>>, vector<1x128x512xbf16>
    %14 = vector.shape_cast %13 : vector<1x128x512xbf16> to vector<128x512xbf16>
    %c0_i32_14 = arith.constant 0 : i32
    %c0_15 = arith.constant 0 : index
    %c0_16 = arith.constant 0 : index
    %c0_17 = arith.constant 0 : index
    %15 = vector.load %arg12[%c0_15, %c0_16, %c0_17] : memref<2x8x128xf32, #tpu.memory_space<vmem>>, vector<1x8x128xf32>
    %16 = vector.shape_cast %15 : vector<1x8x128xf32> to vector<8x128xf32>
    %c0_18 = arith.constant 0 : index
    %c0_19 = arith.constant 0 : index
    %c0_20 = arith.constant 0 : index
    %17 = vector.load %arg13[%c0_18, %c0_19, %c0_20] : memref<2x8x128xf32, #tpu.memory_space<vmem>>, vector<1x8x128xf32>
    %18 = vector.shape_cast %17 : vector<1x8x128xf32> to vector<8x128xf32>
    %19 = arith.index_cast %c0_i32_14 : i32 to index
    %c0_21 = arith.constant 0 : index
    %c0_22 = arith.constant 0 : index
    %20 = vector.load %arg11[%19, %c0_21, %c0_22] : memref<4x8x512xf32, #tpu.memory_space<vmem>>, vector<1x8x512xf32>
    %21 = vector.shape_cast %20 : vector<1x8x512xf32> to vector<8x512xf32>
    %22 = arith.truncf %16 : vector<8x128xf32> to vector<8x128xbf16>
    %cst_23 = arith.constant dense<0.000000e+00> : vector<8x512xf32>
    %23 = tpu.matmul %22, %14, %cst_23 {dimension_numbers = #tpu.dot_dimension_numbers<[1], [0], [0], [1], [0, 0, 1, 1], [], []>} : vector<8x128xbf16>, vector<128x512xbf16>, vector<8x512xf32> -> vector<8x512xf32>
    %24 = arith.addf %21, %23 : vector<8x512xf32>
    %25 = vector.extract_strided_slice %24 {offsets = [0, 0], sizes = [8, 128], strides = [1, 1]} : vector<8x512xf32> to vector<8x128xf32>
    %26 = arith.negf %25 : vector<8x128xf32>
    %27 = math.exp %26 : vector<8x128xf32>
    %cst_24 = arith.constant 1.000000e+00 : f32
    %28 = vector.broadcast %cst_24 : f32 to vector<8x128xf32>
    %29 = arith.addf %28, %27 : vector<8x128xf32>
    %30 = arith.divf %28, %29 : vector<8x128xf32>
    %31 = vector.extract_strided_slice %24 {offsets = [0, 128], sizes = [8, 128], strides = [1, 1]} : vector<8x512xf32> to vector<8x128xf32>
    %32 = arith.negf %31 : vector<8x128xf32>
    %33 = math.exp %32 : vector<8x128xf32>
    %cst_25 = arith.constant 1.000000e+00 : f32
    %34 = vector.broadcast %cst_25 : f32 to vector<8x128xf32>
    %35 = arith.addf %34, %33 : vector<8x128xf32>
    %36 = arith.divf %34, %35 : vector<8x128xf32>
    %37 = vector.extract_strided_slice %24 {offsets = [0, 256], sizes = [8, 128], strides = [1, 1]} : vector<8x512xf32> to vector<8x128xf32>
    %38 = math.tanh %37 : vector<8x128xf32>
    %39 = vector.extract_strided_slice %24 {offsets = [0, 384], sizes = [8, 128], strides = [1, 1]} : vector<8x512xf32> to vector<8x128xf32>
    %40 = arith.negf %39 : vector<8x128xf32>
    %41 = math.exp %40 : vector<8x128xf32>
    %cst_26 = arith.constant 1.000000e+00 : f32
    %42 = vector.broadcast %cst_26 : f32 to vector<8x128xf32>
    %43 = arith.addf %42, %41 : vector<8x128xf32>
    %44 = arith.divf %42, %43 : vector<8x128xf32>
    %45 = arith.mulf %36, %18 : vector<8x128xf32>
    %46 = arith.mulf %30, %38 : vector<8x128xf32>
    %47 = arith.addf %45, %46 : vector<8x128xf32>
    %48 = math.tanh %47 : vector<8x128xf32>
    %49 = arith.mulf %44, %48 : vector<8x128xf32>
    %c0_27 = arith.constant 0 : index
    %c0_28 = arith.constant 0 : index
    %c0_29 = arith.constant 0 : index
    %50 = vector.load %arg13[%c0_27, %c0_28, %c0_29] : memref<2x8x128xf32, #tpu.memory_space<vmem>>, vector<1x8x128xf32>
    %51 = vector.shape_cast %50 : vector<1x8x128xf32> to vector<8x128xf32>
    %52 = vector.shape_cast %47 : vector<8x128xf32> to vector<1x8x128xf32>
    tpu.vector_store %arg13[%c0_27, %c0_28, %c0_29], %52 {strides = array<i32>} : memref<2x8x128xf32, #tpu.memory_space<vmem>>, vector<1x8x128xf32>,
    %c0_30 = arith.constant 0 : index
    %c0_31 = arith.constant 0 : index
    %c0_32 = arith.constant 0 : index
    %53 = vector.load %arg12[%c0_30, %c0_31, %c0_32] : memref<2x8x128xf32, #tpu.memory_space<vmem>>, vector<1x8x128xf32>
    %54 = vector.shape_cast %53 : vector<1x8x128xf32> to vector<8x128xf32>
    %55 = vector.shape_cast %49 : vector<8x128xf32> to vector<1x8x128xf32>
    tpu.vector_store %arg12[%c0_30, %c0_31, %c0_32], %55 {strides = array<i32>} : memref<2x8x128xf32, #tpu.memory_space<vmem>>, vector<1x8x128xf32>,
    %56 = arith.truncf %49 : vector<8x128xf32> to vector<8x128xbf16>
    %57 = arith.index_cast %c0_i32_14 : i32 to index
    %c0_33 = arith.constant 0 : index
    %c0_34 = arith.constant 0 : index
    %58 = vector.load %arg10[%57, %c0_33, %c0_34] : memref<4x8x128xbf16, #tpu.memory_space<vmem>>, vector<1x8x128xbf16>
    %59 = vector.shape_cast %58 : vector<1x8x128xbf16> to vector<8x128xbf16>
    %60 = vector.shape_cast %56 : vector<8x128xbf16> to vector<1x8x128xbf16>
    tpu.vector_store %arg10[%57, %c0_33, %c0_34], %60 {strides = array<i32>} : memref<4x8x128xbf16, #tpu.memory_space<vmem>>, vector<1x8x128xbf16>,
    %c1_i32 = arith.constant 1 : i32
    %c0_35 = arith.constant 0 : index
    %c0_36 = arith.constant 0 : index
    %c0_37 = arith.constant 0 : index
    %61 = vector.load %arg12[%c0_35, %c0_36, %c0_37] : memref<2x8x128xf32, #tpu.memory_space<vmem>>, vector<1x8x128xf32>
    %62 = vector.shape_cast %61 : vector<1x8x128xf32> to vector<8x128xf32>
    %c0_38 = arith.constant 0 : index
    %c0_39 = arith.constant 0 : index
    %c0_40 = arith.constant 0 : index
    %63 = vector.load %arg13[%c0_38, %c0_39, %c0_40] : memref<2x8x128xf32, #tpu.memory_space<vmem>>, vector<1x8x128xf32>
    %64 = vector.shape_cast %63 : vector<1x8x128xf32> to vector<8x128xf32>
    %65 = arith.index_cast %c1_i32 : i32 to index
    %c0_41 = arith.constant 0 : index
    %c0_42 = arith.constant 0 : index
    %66 = vector.load %arg11[%65, %c0_41, %c0_42] : memref<4x8x512xf32, #tpu.memory_space<vmem>>, vector<1x8x512xf32>
    %67 = vector.shape_cast %66 : vector<1x8x512xf32> to vector<8x512xf32>
    %68 = arith.truncf %62 : vector<8x128xf32> to vector<8x128xbf16>
    %cst_43 = arith.constant dense<0.000000e+00> : vector<8x512xf32>
    %69 = tpu.matmul %68, %14, %cst_43 {dimension_numbers = #tpu.dot_dimension_numbers<[1], [0], [0], [1], [0, 0, 1, 1], [], []>} : vector<8x128xbf16>, vector<128x512xbf16>, vector<8x512xf32> -> vector<8x512xf32>
    %70 = arith.addf %67, %69 : vector<8x512xf32>
    %71 = vector.extract_strided_slice %70 {offsets = [0, 0], sizes = [8, 128], strides = [1, 1]} : vector<8x512xf32> to vector<8x128xf32>
    %72 = arith.negf %71 : vector<8x128xf32>
    %73 = math.exp %72 : vector<8x128xf32>
    %cst_44 = arith.constant 1.000000e+00 : f32
    %74 = vector.broadcast %cst_44 : f32 to vector<8x128xf32>
    %75 = arith.addf %74, %73 : vector<8x128xf32>
    %76 = arith.divf %74, %75 : vector<8x128xf32>
    %77 = vector.extract_strided_slice %70 {offsets = [0, 128], sizes = [8, 128], strides = [1, 1]} : vector<8x512xf32> to vector<8x128xf32>
    %78 = arith.negf %77 : vector<8x128xf32>
    %79 = math.exp %78 : vector<8x128xf32>
    %cst_45 = arith.constant 1.000000e+00 : f32
    %80 = vector.broadcast %cst_45 : f32 to vector<8x128xf32>
    %81 = arith.addf %80, %79 : vector<8x128xf32>
    %82 = arith.divf %80, %81 : vector<8x128xf32>
    %83 = vector.extract_strided_slice %70 {offsets = [0, 256], sizes = [8, 128], strides = [1, 1]} : vector<8x512xf32> to vector<8x128xf32>
    %84 = math.tanh %83 : vector<8x128xf32>
    %85 = vector.extract_strided_slice %70 {offsets = [0, 384], sizes = [8, 128], strides = [1, 1]} : vector<8x512xf32> to vector<8x128xf32>
    %86 = arith.negf %85 : vector<8x128xf32>
    %87 = math.exp %86 : vector<8x128xf32>
    %cst_46 = arith.constant 1.000000e+00 : f32
    %88 = vector.broadcast %cst_46 : f32 to vector<8x128xf32>
    %89 = arith.addf %88, %87 : vector<8x128xf32>
    %90 = arith.divf %88, %89 : vector<8x128xf32>
    %91 = arith.mulf %82, %64 : vector<8x128xf32>
    %92 = arith.mulf %76, %84 : vector<8x128xf32>
    %93 = arith.addf %91, %92 : vector<8x128xf32>
    %94 = math.tanh %93 : vector<8x128xf32>
    %95 = arith.mulf %90, %94 : vector<8x128xf32>
    %c0_47 = arith.constant 0 : index
    %c0_48 = arith.constant 0 : index
    %c0_49 = arith.constant 0 : index
    %96 = vector.load %arg13[%c0_47, %c0_48, %c0_49] : memref<2x8x128xf32, #tpu.memory_space<vmem>>, vector<1x8x128xf32>
    %97 = vector.shape_cast %96 : vector<1x8x128xf32> to vector<8x128xf32>
    %98 = vector.shape_cast %93 : vector<8x128xf32> to vector<1x8x128xf32>
    tpu.vector_store %arg13[%c0_47, %c0_48, %c0_49], %98 {strides = array<i32>} : memref<2x8x128xf32, #tpu.memory_space<vmem>>, vector<1x8x128xf32>,
    %c0_50 = arith.constant 0 : index
    %c0_51 = arith.constant 0 : index
    %c0_52 = arith.constant 0 : index
    %99 = vector.load %arg12[%c0_50, %c0_51, %c0_52] : memref<2x8x128xf32, #tpu.memory_space<vmem>>, vector<1x8x128xf32>
    %100 = vector.shape_cast %99 : vector<1x8x128xf32> to vector<8x128xf32>
    %101 = vector.shape_cast %95 : vector<8x128xf32> to vector<1x8x128xf32>
    tpu.vector_store %arg12[%c0_50, %c0_51, %c0_52], %101 {strides = array<i32>} : memref<2x8x128xf32, #tpu.memory_space<vmem>>, vector<1x8x128xf32>,
    %102 = arith.truncf %95 : vector<8x128xf32> to vector<8x128xbf16>
    %103 = arith.index_cast %c1_i32 : i32 to index
    %c0_53 = arith.constant 0 : index
    %c0_54 = arith.constant 0 : index
    %104 = vector.load %arg10[%103, %c0_53, %c0_54] : memref<4x8x128xbf16, #tpu.memory_space<vmem>>, vector<1x8x128xbf16>
    %105 = vector.shape_cast %104 : vector<1x8x128xbf16> to vector<8x128xbf16>
    %106 = vector.shape_cast %102 : vector<8x128xbf16> to vector<1x8x128xbf16>
    tpu.vector_store %arg10[%103, %c0_53, %c0_54], %106 {strides = array<i32>} : memref<4x8x128xbf16, #tpu.memory_space<vmem>>, vector<1x8x128xbf16>,
    %c2_i32 = arith.constant 2 : i32
    %c0_55 = arith.constant 0 : index
    %c0_56 = arith.constant 0 : index
    %c0_57 = arith.constant 0 : index
    %107 = vector.load %arg12[%c0_55, %c0_56, %c0_57] : memref<2x8x128xf32, #tpu.memory_space<vmem>>, vector<1x8x128xf32>
    %108 = vector.shape_cast %107 : vector<1x8x128xf32> to vector<8x128xf32>
    %c0_58 = arith.constant 0 : index
    %c0_59 = arith.constant 0 : index
    %c0_60 = arith.constant 0 : index
    %109 = vector.load %arg13[%c0_58, %c0_59, %c0_60] : memref<2x8x128xf32, #tpu.memory_space<vmem>>, vector<1x8x128xf32>
    %110 = vector.shape_cast %109 : vector<1x8x128xf32> to vector<8x128xf32>
    %111 = arith.index_cast %c2_i32 : i32 to index
    %c0_61 = arith.constant 0 : index
    %c0_62 = arith.constant 0 : index
    %112 = vector.load %arg11[%111, %c0_61, %c0_62] : memref<4x8x512xf32, #tpu.memory_space<vmem>>, vector<1x8x512xf32>
    %113 = vector.shape_cast %112 : vector<1x8x512xf32> to vector<8x512xf32>
    %114 = arith.truncf %108 : vector<8x128xf32> to vector<8x128xbf16>
    %cst_63 = arith.constant dense<0.000000e+00> : vector<8x512xf32>
    %115 = tpu.matmul %114, %14, %cst_63 {dimension_numbers = #tpu.dot_dimension_numbers<[1], [0], [0], [1], [0, 0, 1, 1], [], []>} : vector<8x128xbf16>, vector<128x512xbf16>, vector<8x512xf32> -> vector<8x512xf32>
    %116 = arith.addf %113, %115 : vector<8x512xf32>
    %117 = vector.extract_strided_slice %116 {offsets = [0, 0], sizes = [8, 128], strides = [1, 1]} : vector<8x512xf32> to vector<8x128xf32>
    %118 = arith.negf %117 : vector<8x128xf32>
    %119 = math.exp %118 : vector<8x128xf32>
    %cst_64 = arith.constant 1.000000e+00 : f32
    %120 = vector.broadcast %cst_64 : f32 to vector<8x128xf32>
    %121 = arith.addf %120, %119 : vector<8x128xf32>
    %122 = arith.divf %120, %121 : vector<8x128xf32>
    %123 = vector.extract_strided_slice %116 {offsets = [0, 128], sizes = [8, 128], strides = [1, 1]} : vector<8x512xf32> to vector<8x128xf32>
    %124 = arith.negf %123 : vector<8x128xf32>
    %125 = math.exp %124 : vector<8x128xf32>
    %cst_65 = arith.constant 1.000000e+00 : f32
    %126 = vector.broadcast %cst_65 : f32 to vector<8x128xf32>
    %127 = arith.addf %126, %125 : vector<8x128xf32>
    %128 = arith.divf %126, %127 : vector<8x128xf32>
    %129 = vector.extract_strided_slice %116 {offsets = [0, 256], sizes = [8, 128], strides = [1, 1]} : vector<8x512xf32> to vector<8x128xf32>
    %130 = math.tanh %129 : vector<8x128xf32>
    %131 = vector.extract_strided_slice %116 {offsets = [0, 384], sizes = [8, 128], strides = [1, 1]} : vector<8x512xf32> to vector<8x128xf32>
    %132 = arith.negf %131 : vector<8x128xf32>
    %133 = math.exp %132 : vector<8x128xf32>
    %cst_66 = arith.constant 1.000000e+00 : f32
    %134 = vector.broadcast %cst_66 : f32 to vector<8x128xf32>
    %135 = arith.addf %134, %133 : vector<8x128xf32>
    %136 = arith.divf %134, %135 : vector<8x128xf32>
    %137 = arith.mulf %128, %110 : vector<8x128xf32>
    %138 = arith.mulf %122, %130 : vector<8x128xf32>
    %139 = arith.addf %137, %138 : vector<8x128xf32>
    %140 = math.tanh %139 : vector<8x128xf32>
    %141 = arith.mulf %136, %140 : vector<8x128xf32>
    %c0_67 = arith.constant 0 : index
    %c0_68 = arith.constant 0 : index
    %c0_69 = arith.constant 0 : index
    %142 = vector.load %arg13[%c0_67, %c0_68, %c0_69] : memref<2x8x128xf32, #tpu.memory_space<vmem>>, vector<1x8x128xf32>
    %143 = vector.shape_cast %142 : vector<1x8x128xf32> to vector<8x128xf32>
    %144 = vector.shape_cast %139 : vector<8x128xf32> to vector<1x8x128xf32>
    tpu.vector_store %arg13[%c0_67, %c0_68, %c0_69], %144 {strides = array<i32>} : memref<2x8x128xf32, #tpu.memory_space<vmem>>, vector<1x8x128xf32>,
    %c0_70 = arith.constant 0 : index
    %c0_71 = arith.constant 0 : index
    %c0_72 = arith.constant 0 : index
    %145 = vector.load %arg12[%c0_70, %c0_71, %c0_72] : memref<2x8x128xf32, #tpu.memory_space<vmem>>, vector<1x8x128xf32>
    %146 = vector.shape_cast %145 : vector<1x8x128xf32> to vector<8x128xf32>
    %147 = vector.shape_cast %141 : vector<8x128xf32> to vector<1x8x128xf32>
    tpu.vector_store %arg12[%c0_70, %c0_71, %c0_72], %147 {strides = array<i32>} : memref<2x8x128xf32, #tpu.memory_space<vmem>>, vector<1x8x128xf32>,
    %148 = arith.truncf %141 : vector<8x128xf32> to vector<8x128xbf16>
    %149 = arith.index_cast %c2_i32 : i32 to index
    %c0_73 = arith.constant 0 : index
    %c0_74 = arith.constant 0 : index
    %150 = vector.load %arg10[%149, %c0_73, %c0_74] : memref<4x8x128xbf16, #tpu.memory_space<vmem>>, vector<1x8x128xbf16>
    %151 = vector.shape_cast %150 : vector<1x8x128xbf16> to vector<8x128xbf16>
    %152 = vector.shape_cast %148 : vector<8x128xbf16> to vector<1x8x128xbf16>
    tpu.vector_store %arg10[%149, %c0_73, %c0_74], %152 {strides = array<i32>} : memref<4x8x128xbf16, #tpu.memory_space<vmem>>, vector<1x8x128xbf16>,
    %c3_i32 = arith.constant 3 : i32
    %c0_75 = arith.constant 0 : index
    %c0_76 = arith.constant 0 : index
    %c0_77 = arith.constant 0 : index
    %153 = vector.load %arg12[%c0_75, %c0_76, %c0_77] : memref<2x8x128xf32, #tpu.memory_space<vmem>>, vector<1x8x128xf32>
    %154 = vector.shape_cast %153 : vector<1x8x128xf32> to vector<8x128xf32>
    %c0_78 = arith.constant 0 : index
    %c0_79 = arith.constant 0 : index
    %c0_80 = arith.constant 0 : index
    %155 = vector.load %arg13[%c0_78, %c0_79, %c0_80] : memref<2x8x128xf32, #tpu.memory_space<vmem>>, vector<1x8x128xf32>
    %156 = vector.shape_cast %155 : vector<1x8x128xf32> to vector<8x128xf32>
    %157 = arith.index_cast %c3_i32 : i32 to index
    %c0_81 = arith.constant 0 : index
    %c0_82 = arith.constant 0 : index
    %158 = vector.load %arg11[%157, %c0_81, %c0_82] : memref<4x8x512xf32, #tpu.memory_space<vmem>>, vector<1x8x512xf32>
    %159 = vector.shape_cast %158 : vector<1x8x512xf32> to vector<8x512xf32>
    %160 = arith.truncf %154 : vector<8x128xf32> to vector<8x128xbf16>
    %cst_83 = arith.constant dense<0.000000e+00> : vector<8x512xf32>
    %161 = tpu.matmul %160, %14, %cst_83 {dimension_numbers = #tpu.dot_dimension_numbers<[1], [0], [0], [1], [0, 0, 1, 1], [], []>} : vector<8x128xbf16>, vector<128x512xbf16>, vector<8x512xf32> -> vector<8x512xf32>
    %162 = arith.addf %159, %161 : vector<8x512xf32>
    %163 = vector.extract_strided_slice %162 {offsets = [0, 0], sizes = [8, 128], strides = [1, 1]} : vector<8x512xf32> to vector<8x128xf32>
    %164 = arith.negf %163 : vector<8x128xf32>
    %165 = math.exp %164 : vector<8x128xf32>
    %cst_84 = arith.constant 1.000000e+00 : f32
    %166 = vector.broadcast %cst_84 : f32 to vector<8x128xf32>
    %167 = arith.addf %166, %165 : vector<8x128xf32>
    %168 = arith.divf %166, %167 : vector<8x128xf32>
    %169 = vector.extract_strided_slice %162 {offsets = [0, 128], sizes = [8, 128], strides = [1, 1]} : vector<8x512xf32> to vector<8x128xf32>
    %170 = arith.negf %169 : vector<8x128xf32>
    %171 = math.exp %170 : vector<8x128xf32>
    %cst_85 = arith.constant 1.000000e+00 : f32
    %172 = vector.broadcast %cst_85 : f32 to vector<8x128xf32>
    %173 = arith.addf %172, %171 : vector<8x128xf32>
    %174 = arith.divf %172, %173 : vector<8x128xf32>
    %175 = vector.extract_strided_slice %162 {offsets = [0, 256], sizes = [8, 128], strides = [1, 1]} : vector<8x512xf32> to vector<8x128xf32>
    %176 = math.tanh %175 : vector<8x128xf32>
    %177 = vector.extract_strided_slice %162 {offsets = [0, 384], sizes = [8, 128], strides = [1, 1]} : vector<8x512xf32> to vector<8x128xf32>
    %178 = arith.negf %177 : vector<8x128xf32>
    %179 = math.exp %178 : vector<8x128xf32>
    %cst_86 = arith.constant 1.000000e+00 : f32
    %180 = vector.broadcast %cst_86 : f32 to vector<8x128xf32>
    %181 = arith.addf %180, %179 : vector<8x128xf32>
    %182 = arith.divf %180, %181 : vector<8x128xf32>
    %183 = arith.mulf %174, %156 : vector<8x128xf32>
    %184 = arith.mulf %168, %176 : vector<8x128xf32>
    %185 = arith.addf %183, %184 : vector<8x128xf32>
    %186 = math.tanh %185 : vector<8x128xf32>
    %187 = arith.mulf %182, %186 : vector<8x128xf32>
    %c0_87 = arith.constant 0 : index
    %c0_88 = arith.constant 0 : index
    %c0_89 = arith.constant 0 : index
    %188 = vector.load %arg13[%c0_87, %c0_88, %c0_89] : memref<2x8x128xf32, #tpu.memory_space<vmem>>, vector<1x8x128xf32>
    %189 = vector.shape_cast %188 : vector<1x8x128xf32> to vector<8x128xf32>
    %190 = vector.shape_cast %185 : vector<8x128xf32> to vector<1x8x128xf32>
    tpu.vector_store %arg13[%c0_87, %c0_88, %c0_89], %190 {strides = array<i32>} : memref<2x8x128xf32, #tpu.memory_space<vmem>>, vector<1x8x128xf32>,
    %c0_90 = arith.constant 0 : index
    %c0_91 = arith.constant 0 : index
    %c0_92 = arith.constant 0 : index
    %191 = vector.load %arg12[%c0_90, %c0_91, %c0_92] : memref<2x8x128xf32, #tpu.memory_space<vmem>>, vector<1x8x128xf32>
    %192 = vector.shape_cast %191 : vector<1x8x128xf32> to vector<8x128xf32>
    %193 = vector.shape_cast %187 : vector<8x128xf32> to vector<1x8x128xf32>
    tpu.vector_store %arg12[%c0_90, %c0_91, %c0_92], %193 {strides = array<i32>} : memref<2x8x128xf32, #tpu.memory_space<vmem>>, vector<1x8x128xf32>,
    %194 = arith.truncf %187 : vector<8x128xf32> to vector<8x128xbf16>
    %195 = arith.index_cast %c3_i32 : i32 to index
    %c0_93 = arith.constant 0 : index
    %c0_94 = arith.constant 0 : index
    %196 = vector.load %arg10[%195, %c0_93, %c0_94] : memref<4x8x128xbf16, #tpu.memory_space<vmem>>, vector<1x8x128xbf16>
    %197 = vector.shape_cast %196 : vector<1x8x128xbf16> to vector<8x128xbf16>
    %198 = vector.shape_cast %194 : vector<8x128xbf16> to vector<1x8x128xbf16>
    tpu.vector_store %arg10[%195, %c0_93, %c0_94], %198 {strides = array<i32>} : memref<4x8x128xbf16, #tpu.memory_space<vmem>>, vector<1x8x128xbf16>,
    %c4_i32 = arith.constant 4 : i32
    %c0_95 = arith.constant 0 : index
    %c0_96 = arith.constant 0 : index
    %c0_97 = arith.constant 0 : index
    %199 = vector.load %arg10[%c0_95, %c0_96, %c0_97] : memref<4x8x128xbf16, #tpu.memory_space<vmem>>, vector<4x8x128xbf16>
    %200 = vector.shape_cast %199 : vector<4x8x128xbf16> to vector<32x128xbf16>
    %c0_98 = arith.constant 0 : index
    %c0_99 = arith.constant 0 : index
    %c0_100 = arith.constant 0 : index
    %201 = vector.load %arg4[%c0_98, %c0_99, %c0_100] : memref<1x128x512xbf16, #tpu.memory_space<vmem>>, vector<1x128x512xbf16>
    %202 = vector.shape_cast %201 : vector<1x128x512xbf16> to vector<128x512xbf16>
    %cst_101 = arith.constant dense<0.000000e+00> : vector<32x512xf32>
    %203 = tpu.matmul %200, %202, %cst_101 {dimension_numbers = #tpu.dot_dimension_numbers<[1], [0], [0], [1], [0, 0, 1, 1], [], []>} : vector<32x128xbf16>, vector<128x512xbf16>, vector<32x512xf32> -> vector<32x512xf32>
    %c1 = arith.constant 1 : index
    %c0_102 = arith.constant 0 : index
    %c0_103 = arith.constant 0 : index
    %204 = vector.load %arg6[%c1, %c0_102, %c0_103] : memref<2x1x512xf32, #tpu.memory_space<vmem>>, vector<1x1x512xf32>
    %205 = vector.shape_cast %204 : vector<1x1x512xf32> to vector<1x512xf32>
    %206 = vector.broadcast %205 : vector<1x512xf32> to vector<32x512xf32>
    %207 = arith.addf %203, %206 : vector<32x512xf32>
    %208 = vector.shape_cast %207 : vector<32x512xf32> to vector<4x8x512xf32>
    %c0_104 = arith.constant 0 : index
    %c0_105 = arith.constant 0 : index
    %c0_106 = arith.constant 0 : index
    %209 = vector.load %arg11[%c0_104, %c0_105, %c0_106] : memref<4x8x512xf32, #tpu.memory_space<vmem>>, vector<4x8x512xf32>
    tpu.vector_store %arg11[%c0_104, %c0_105, %c0_106], %208 {strides = array<i32>} : memref<4x8x512xf32, #tpu.memory_space<vmem>>, vector<4x8x512xf32>,
    %c1_107 = arith.constant 1 : index
    %c0_108 = arith.constant 0 : index
    %c0_109 = arith.constant 0 : index
    %210 = vector.load %arg5[%c1_107, %c0_108, %c0_109] : memref<2x128x512xbf16, #tpu.memory_space<vmem>>, vector<1x128x512xbf16>
    %211 = vector.shape_cast %210 : vector<1x128x512xbf16> to vector<128x512xbf16>
    %c0_i32_110 = arith.constant 0 : i32
    %c1_111 = arith.constant 1 : index
    %c0_112 = arith.constant 0 : index
    %c0_113 = arith.constant 0 : index
    %212 = vector.load %arg12[%c1_111, %c0_112, %c0_113] : memref<2x8x128xf32, #tpu.memory_space<vmem>>, vector<1x8x128xf32>
    %213 = vector.shape_cast %212 : vector<1x8x128xf32> to vector<8x128xf32>
    %c1_114 = arith.constant 1 : index
    %c0_115 = arith.constant 0 : index
    %c0_116 = arith.constant 0 : index
    %214 = vector.load %arg13[%c1_114, %c0_115, %c0_116] : memref<2x8x128xf32, #tpu.memory_space<vmem>>, vector<1x8x128xf32>
    %215 = vector.shape_cast %214 : vector<1x8x128xf32> to vector<8x128xf32>
    %216 = arith.index_cast %c0_i32_110 : i32 to index
    %c0_117 = arith.constant 0 : index
    %c0_118 = arith.constant 0 : index
    %217 = vector.load %arg11[%216, %c0_117, %c0_118] : memref<4x8x512xf32, #tpu.memory_space<vmem>>, vector<1x8x512xf32>
    %218 = vector.shape_cast %217 : vector<1x8x512xf32> to vector<8x512xf32>
    %219 = arith.truncf %213 : vector<8x128xf32> to vector<8x128xbf16>
    %cst_119 = arith.constant dense<0.000000e+00> : vector<8x512xf32>
    %220 = tpu.matmul %219, %211, %cst_119 {dimension_numbers = #tpu.dot_dimension_numbers<[1], [0], [0], [1], [0, 0, 1, 1], [], []>} : vector<8x128xbf16>, vector<128x512xbf16>, vector<8x512xf32> -> vector<8x512xf32>
    %221 = arith.addf %218, %220 : vector<8x512xf32>
    %222 = vector.extract_strided_slice %221 {offsets = [0, 0], sizes = [8, 128], strides = [1, 1]} : vector<8x512xf32> to vector<8x128xf32>
    %223 = arith.negf %222 : vector<8x128xf32>
    %224 = math.exp %223 : vector<8x128xf32>
    %cst_120 = arith.constant 1.000000e+00 : f32
    %225 = vector.broadcast %cst_120 : f32 to vector<8x128xf32>
    %226 = arith.addf %225, %224 : vector<8x128xf32>
    %227 = arith.divf %225, %226 : vector<8x128xf32>
    %228 = vector.extract_strided_slice %221 {offsets = [0, 128], sizes = [8, 128], strides = [1, 1]} : vector<8x512xf32> to vector<8x128xf32>
    %229 = arith.negf %228 : vector<8x128xf32>
    %230 = math.exp %229 : vector<8x128xf32>
    %cst_121 = arith.constant 1.000000e+00 : f32
    %231 = vector.broadcast %cst_121 : f32 to vector<8x128xf32>
    %232 = arith.addf %231, %230 : vector<8x128xf32>
    %233 = arith.divf %231, %232 : vector<8x128xf32>
    %234 = vector.extract_strided_slice %221 {offsets = [0, 256], sizes = [8, 128], strides = [1, 1]} : vector<8x512xf32> to vector<8x128xf32>
    %235 = math.tanh %234 : vector<8x128xf32>
    %236 = vector.extract_strided_slice %221 {offsets = [0, 384], sizes = [8, 128], strides = [1, 1]} : vector<8x512xf32> to vector<8x128xf32>
    %237 = arith.negf %236 : vector<8x128xf32>
    %238 = math.exp %237 : vector<8x128xf32>
    %cst_122 = arith.constant 1.000000e+00 : f32
    %239 = vector.broadcast %cst_122 : f32 to vector<8x128xf32>
    %240 = arith.addf %239, %238 : vector<8x128xf32>
    %241 = arith.divf %239, %240 : vector<8x128xf32>
    %242 = arith.mulf %233, %215 : vector<8x128xf32>
    %243 = arith.mulf %227, %235 : vector<8x128xf32>
    %244 = arith.addf %242, %243 : vector<8x128xf32>
    %245 = math.tanh %244 : vector<8x128xf32>
    %246 = arith.mulf %241, %245 : vector<8x128xf32>
    %c1_123 = arith.constant 1 : index
    %c0_124 = arith.constant 0 : index
    %c0_125 = arith.constant 0 : index
    %247 = vector.load %arg13[%c1_123, %c0_124, %c0_125] : memref<2x8x128xf32, #tpu.memory_space<vmem>>, vector<1x8x128xf32>
    %248 = vector.shape_cast %247 : vector<1x8x128xf32> to vector<8x128xf32>
    %249 = vector.shape_cast %244 : vector<8x128xf32> to vector<1x8x128xf32>
    tpu.vector_store %arg13[%c1_123, %c0_124, %c0_125], %249 {strides = array<i32>} : memref<2x8x128xf32, #tpu.memory_space<vmem>>, vector<1x8x128xf32>,
    %c1_126 = arith.constant 1 : index
    %c0_127 = arith.constant 0 : index
    %c0_128 = arith.constant 0 : index
    %250 = vector.load %arg12[%c1_126, %c0_127, %c0_128] : memref<2x8x128xf32, #tpu.memory_space<vmem>>, vector<1x8x128xf32>
    %251 = vector.shape_cast %250 : vector<1x8x128xf32> to vector<8x128xf32>
    %252 = vector.shape_cast %246 : vector<8x128xf32> to vector<1x8x128xf32>
    tpu.vector_store %arg12[%c1_126, %c0_127, %c0_128], %252 {strides = array<i32>} : memref<2x8x128xf32, #tpu.memory_space<vmem>>, vector<1x8x128xf32>,
    %c1_i32_129 = arith.constant 1 : i32
    %c1_130 = arith.constant 1 : index
    %c0_131 = arith.constant 0 : index
    %c0_132 = arith.constant 0 : index
    %253 = vector.load %arg12[%c1_130, %c0_131, %c0_132] : memref<2x8x128xf32, #tpu.memory_space<vmem>>, vector<1x8x128xf32>
    %254 = vector.shape_cast %253 : vector<1x8x128xf32> to vector<8x128xf32>
    %c1_133 = arith.constant 1 : index
    %c0_134 = arith.constant 0 : index
    %c0_135 = arith.constant 0 : index
    %255 = vector.load %arg13[%c1_133, %c0_134, %c0_135] : memref<2x8x128xf32, #tpu.memory_space<vmem>>, vector<1x8x128xf32>
    %256 = vector.shape_cast %255 : vector<1x8x128xf32> to vector<8x128xf32>
    %257 = arith.index_cast %c1_i32_129 : i32 to index
    %c0_136 = arith.constant 0 : index
    %c0_137 = arith.constant 0 : index
    %258 = vector.load %arg11[%257, %c0_136, %c0_137] : memref<4x8x512xf32, #tpu.memory_space<vmem>>, vector<1x8x512xf32>
    %259 = vector.shape_cast %258 : vector<1x8x512xf32> to vector<8x512xf32>
    %260 = arith.truncf %254 : vector<8x128xf32> to vector<8x128xbf16>
    %cst_138 = arith.constant dense<0.000000e+00> : vector<8x512xf32>
    %261 = tpu.matmul %260, %211, %cst_138 {dimension_numbers = #tpu.dot_dimension_numbers<[1], [0], [0], [1], [0, 0, 1, 1], [], []>} : vector<8x128xbf16>, vector<128x512xbf16>, vector<8x512xf32> -> vector<8x512xf32>
    %262 = arith.addf %259, %261 : vector<8x512xf32>
    %263 = vector.extract_strided_slice %262 {offsets = [0, 0], sizes = [8, 128], strides = [1, 1]} : vector<8x512xf32> to vector<8x128xf32>
    %264 = arith.negf %263 : vector<8x128xf32>
    %265 = math.exp %264 : vector<8x128xf32>
    %cst_139 = arith.constant 1.000000e+00 : f32
    %266 = vector.broadcast %cst_139 : f32 to vector<8x128xf32>
    %267 = arith.addf %266, %265 : vector<8x128xf32>
    %268 = arith.divf %266, %267 : vector<8x128xf32>
    %269 = vector.extract_strided_slice %262 {offsets = [0, 128], sizes = [8, 128], strides = [1, 1]} : vector<8x512xf32> to vector<8x128xf32>
    %270 = arith.negf %269 : vector<8x128xf32>
    %271 = math.exp %270 : vector<8x128xf32>
    %cst_140 = arith.constant 1.000000e+00 : f32
    %272 = vector.broadcast %cst_140 : f32 to vector<8x128xf32>
    %273 = arith.addf %272, %271 : vector<8x128xf32>
    %274 = arith.divf %272, %273 : vector<8x128xf32>
    %275 = vector.extract_strided_slice %262 {offsets = [0, 256], sizes = [8, 128], strides = [1, 1]} : vector<8x512xf32> to vector<8x128xf32>
    %276 = math.tanh %275 : vector<8x128xf32>
    %277 = vector.extract_strided_slice %262 {offsets = [0, 384], sizes = [8, 128], strides = [1, 1]} : vector<8x512xf32> to vector<8x128xf32>
    %278 = arith.negf %277 : vector<8x128xf32>
    %279 = math.exp %278 : vector<8x128xf32>
    %cst_141 = arith.constant 1.000000e+00 : f32
    %280 = vector.broadcast %cst_141 : f32 to vector<8x128xf32>
    %281 = arith.addf %280, %279 : vector<8x128xf32>
    %282 = arith.divf %280, %281 : vector<8x128xf32>
    %283 = arith.mulf %274, %256 : vector<8x128xf32>
    %284 = arith.mulf %268, %276 : vector<8x128xf32>
    %285 = arith.addf %283, %284 : vector<8x128xf32>
    %286 = math.tanh %285 : vector<8x128xf32>
    %287 = arith.mulf %282, %286 : vector<8x128xf32>
    %c1_142 = arith.constant 1 : index
    %c0_143 = arith.constant 0 : index
    %c0_144 = arith.constant 0 : index
    %288 = vector.load %arg13[%c1_142, %c0_143, %c0_144] : memref<2x8x128xf32, #tpu.memory_space<vmem>>, vector<1x8x128xf32>
    %289 = vector.shape_cast %288 : vector<1x8x128xf32> to vector<8x128xf32>
    %290 = vector.shape_cast %285 : vector<8x128xf32> to vector<1x8x128xf32>
    tpu.vector_store %arg13[%c1_142, %c0_143, %c0_144], %290 {strides = array<i32>} : memref<2x8x128xf32, #tpu.memory_space<vmem>>, vector<1x8x128xf32>,
    %c1_145 = arith.constant 1 : index
    %c0_146 = arith.constant 0 : index
    %c0_147 = arith.constant 0 : index
    %291 = vector.load %arg12[%c1_145, %c0_146, %c0_147] : memref<2x8x128xf32, #tpu.memory_space<vmem>>, vector<1x8x128xf32>
    %292 = vector.shape_cast %291 : vector<1x8x128xf32> to vector<8x128xf32>
    %293 = vector.shape_cast %287 : vector<8x128xf32> to vector<1x8x128xf32>
    tpu.vector_store %arg12[%c1_145, %c0_146, %c0_147], %293 {strides = array<i32>} : memref<2x8x128xf32, #tpu.memory_space<vmem>>, vector<1x8x128xf32>,
    %c2_i32_148 = arith.constant 2 : i32
    %c1_149 = arith.constant 1 : index
    %c0_150 = arith.constant 0 : index
    %c0_151 = arith.constant 0 : index
    %294 = vector.load %arg12[%c1_149, %c0_150, %c0_151] : memref<2x8x128xf32, #tpu.memory_space<vmem>>, vector<1x8x128xf32>
    %295 = vector.shape_cast %294 : vector<1x8x128xf32> to vector<8x128xf32>
    %c1_152 = arith.constant 1 : index
    %c0_153 = arith.constant 0 : index
    %c0_154 = arith.constant 0 : index
    %296 = vector.load %arg13[%c1_152, %c0_153, %c0_154] : memref<2x8x128xf32, #tpu.memory_space<vmem>>, vector<1x8x128xf32>
    %297 = vector.shape_cast %296 : vector<1x8x128xf32> to vector<8x128xf32>
    %298 = arith.index_cast %c2_i32_148 : i32 to index
    %c0_155 = arith.constant 0 : index
    %c0_156 = arith.constant 0 : index
    %299 = vector.load %arg11[%298, %c0_155, %c0_156] : memref<4x8x512xf32, #tpu.memory_space<vmem>>, vector<1x8x512xf32>
    %300 = vector.shape_cast %299 : vector<1x8x512xf32> to vector<8x512xf32>
    %301 = arith.truncf %295 : vector<8x128xf32> to vector<8x128xbf16>
    %cst_157 = arith.constant dense<0.000000e+00> : vector<8x512xf32>
    %302 = tpu.matmul %301, %211, %cst_157 {dimension_numbers = #tpu.dot_dimension_numbers<[1], [0], [0], [1], [0, 0, 1, 1], [], []>} : vector<8x128xbf16>, vector<128x512xbf16>, vector<8x512xf32> -> vector<8x512xf32>
    %303 = arith.addf %300, %302 : vector<8x512xf32>
    %304 = vector.extract_strided_slice %303 {offsets = [0, 0], sizes = [8, 128], strides = [1, 1]} : vector<8x512xf32> to vector<8x128xf32>
    %305 = arith.negf %304 : vector<8x128xf32>
    %306 = math.exp %305 : vector<8x128xf32>
    %cst_158 = arith.constant 1.000000e+00 : f32
    %307 = vector.broadcast %cst_158 : f32 to vector<8x128xf32>
    %308 = arith.addf %307, %306 : vector<8x128xf32>
    %309 = arith.divf %307, %308 : vector<8x128xf32>
    %310 = vector.extract_strided_slice %303 {offsets = [0, 128], sizes = [8, 128], strides = [1, 1]} : vector<8x512xf32> to vector<8x128xf32>
    %311 = arith.negf %310 : vector<8x128xf32>
    %312 = math.exp %311 : vector<8x128xf32>
    %cst_159 = arith.constant 1.000000e+00 : f32
    %313 = vector.broadcast %cst_159 : f32 to vector<8x128xf32>
    %314 = arith.addf %313, %312 : vector<8x128xf32>
    %315 = arith.divf %313, %314 : vector<8x128xf32>
    %316 = vector.extract_strided_slice %303 {offsets = [0, 256], sizes = [8, 128], strides = [1, 1]} : vector<8x512xf32> to vector<8x128xf32>
    %317 = math.tanh %316 : vector<8x128xf32>
    %318 = vector.extract_strided_slice %303 {offsets = [0, 384], sizes = [8, 128], strides = [1, 1]} : vector<8x512xf32> to vector<8x128xf32>
    %319 = arith.negf %318 : vector<8x128xf32>
    %320 = math.exp %319 : vector<8x128xf32>
    %cst_160 = arith.constant 1.000000e+00 : f32
    %321 = vector.broadcast %cst_160 : f32 to vector<8x128xf32>
    %322 = arith.addf %321, %320 : vector<8x128xf32>
    %323 = arith.divf %321, %322 : vector<8x128xf32>
    %324 = arith.mulf %315, %297 : vector<8x128xf32>
    %325 = arith.mulf %309, %317 : vector<8x128xf32>
    %326 = arith.addf %324, %325 : vector<8x128xf32>
    %327 = math.tanh %326 : vector<8x128xf32>
    %328 = arith.mulf %323, %327 : vector<8x128xf32>
    %c1_161 = arith.constant 1 : index
    %c0_162 = arith.constant 0 : index
    %c0_163 = arith.constant 0 : index
    %329 = vector.load %arg13[%c1_161, %c0_162, %c0_163] : memref<2x8x128xf32, #tpu.memory_space<vmem>>, vector<1x8x128xf32>
    %330 = vector.shape_cast %329 : vector<1x8x128xf32> to vector<8x128xf32>
    %331 = vector.shape_cast %326 : vector<8x128xf32> to vector<1x8x128xf32>
    tpu.vector_store %arg13[%c1_161, %c0_162, %c0_163], %331 {strides = array<i32>} : memref<2x8x128xf32, #tpu.memory_space<vmem>>, vector<1x8x128xf32>,
    %c1_164 = arith.constant 1 : index
    %c0_165 = arith.constant 0 : index
    %c0_166 = arith.constant 0 : index
    %332 = vector.load %arg12[%c1_164, %c0_165, %c0_166] : memref<2x8x128xf32, #tpu.memory_space<vmem>>, vector<1x8x128xf32>
    %333 = vector.shape_cast %332 : vector<1x8x128xf32> to vector<8x128xf32>
    %334 = vector.shape_cast %328 : vector<8x128xf32> to vector<1x8x128xf32>
    tpu.vector_store %arg12[%c1_164, %c0_165, %c0_166], %334 {strides = array<i32>} : memref<2x8x128xf32, #tpu.memory_space<vmem>>, vector<1x8x128xf32>,
    %c3_i32_167 = arith.constant 3 : i32
    %c1_168 = arith.constant 1 : index
    %c0_169 = arith.constant 0 : index
    %c0_170 = arith.constant 0 : index
    %335 = vector.load %arg12[%c1_168, %c0_169, %c0_170] : memref<2x8x128xf32, #tpu.memory_space<vmem>>, vector<1x8x128xf32>
    %336 = vector.shape_cast %335 : vector<1x8x128xf32> to vector<8x128xf32>
    %c1_171 = arith.constant 1 : index
    %c0_172 = arith.constant 0 : index
    %c0_173 = arith.constant 0 : index
    %337 = vector.load %arg13[%c1_171, %c0_172, %c0_173] : memref<2x8x128xf32, #tpu.memory_space<vmem>>, vector<1x8x128xf32>
    %338 = vector.shape_cast %337 : vector<1x8x128xf32> to vector<8x128xf32>
    %339 = arith.index_cast %c3_i32_167 : i32 to index
    %c0_174 = arith.constant 0 : index
    %c0_175 = arith.constant 0 : index
    %340 = vector.load %arg11[%339, %c0_174, %c0_175] : memref<4x8x512xf32, #tpu.memory_space<vmem>>, vector<1x8x512xf32>
    %341 = vector.shape_cast %340 : vector<1x8x512xf32> to vector<8x512xf32>
    %342 = arith.truncf %336 : vector<8x128xf32> to vector<8x128xbf16>
    %cst_176 = arith.constant dense<0.000000e+00> : vector<8x512xf32>
    %343 = tpu.matmul %342, %211, %cst_176 {dimension_numbers = #tpu.dot_dimension_numbers<[1], [0], [0], [1], [0, 0, 1, 1], [], []>} : vector<8x128xbf16>, vector<128x512xbf16>, vector<8x512xf32> -> vector<8x512xf32>
    %344 = arith.addf %341, %343 : vector<8x512xf32>
    %345 = vector.extract_strided_slice %344 {offsets = [0, 0], sizes = [8, 128], strides = [1, 1]} : vector<8x512xf32> to vector<8x128xf32>
    %346 = arith.negf %345 : vector<8x128xf32>
    %347 = math.exp %346 : vector<8x128xf32>
    %cst_177 = arith.constant 1.000000e+00 : f32
    %348 = vector.broadcast %cst_177 : f32 to vector<8x128xf32>
    %349 = arith.addf %348, %347 : vector<8x128xf32>
    %350 = arith.divf %348, %349 : vector<8x128xf32>
    %351 = vector.extract_strided_slice %344 {offsets = [0, 128], sizes = [8, 128], strides = [1, 1]} : vector<8x512xf32> to vector<8x128xf32>
    %352 = arith.negf %351 : vector<8x128xf32>
    %353 = math.exp %352 : vector<8x128xf32>
    %cst_178 = arith.constant 1.000000e+00 : f32
    %354 = vector.broadcast %cst_178 : f32 to vector<8x128xf32>
    %355 = arith.addf %354, %353 : vector<8x128xf32>
    %356 = arith.divf %354, %355 : vector<8x128xf32>
    %357 = vector.extract_strided_slice %344 {offsets = [0, 256], sizes = [8, 128], strides = [1, 1]} : vector<8x512xf32> to vector<8x128xf32>
    %358 = math.tanh %357 : vector<8x128xf32>
    %359 = vector.extract_strided_slice %344 {offsets = [0, 384], sizes = [8, 128], strides = [1, 1]} : vector<8x512xf32> to vector<8x128xf32>
    %360 = arith.negf %359 : vector<8x128xf32>
    %361 = math.exp %360 : vector<8x128xf32>
    %cst_179 = arith.constant 1.000000e+00 : f32
    %362 = vector.broadcast %cst_179 : f32 to vector<8x128xf32>
    %363 = arith.addf %362, %361 : vector<8x128xf32>
    %364 = arith.divf %362, %363 : vector<8x128xf32>
    %365 = arith.mulf %356, %338 : vector<8x128xf32>
    %366 = arith.mulf %350, %358 : vector<8x128xf32>
    %367 = arith.addf %365, %366 : vector<8x128xf32>
    %368 = math.tanh %367 : vector<8x128xf32>
    %369 = arith.mulf %364, %368 : vector<8x128xf32>
    %c1_180 = arith.constant 1 : index
    %c0_181 = arith.constant 0 : index
    %c0_182 = arith.constant 0 : index
    %370 = vector.load %arg13[%c1_180, %c0_181, %c0_182] : memref<2x8x128xf32, #tpu.memory_space<vmem>>, vector<1x8x128xf32>
    %371 = vector.shape_cast %370 : vector<1x8x128xf32> to vector<8x128xf32>
    %372 = vector.shape_cast %367 : vector<8x128xf32> to vector<1x8x128xf32>
    tpu.vector_store %arg13[%c1_180, %c0_181, %c0_182], %372 {strides = array<i32>} : memref<2x8x128xf32, #tpu.memory_space<vmem>>, vector<1x8x128xf32>,
    %c1_183 = arith.constant 1 : index
    %c0_184 = arith.constant 0 : index
    %c0_185 = arith.constant 0 : index
    %373 = vector.load %arg12[%c1_183, %c0_184, %c0_185] : memref<2x8x128xf32, #tpu.memory_space<vmem>>, vector<1x8x128xf32>
    %374 = vector.shape_cast %373 : vector<1x8x128xf32> to vector<8x128xf32>
    %375 = vector.shape_cast %369 : vector<8x128xf32> to vector<1x8x128xf32>
    tpu.vector_store %arg12[%c1_183, %c0_184, %c0_185], %375 {strides = array<i32>} : memref<2x8x128xf32, #tpu.memory_space<vmem>>, vector<1x8x128xf32>,
    %c4_i32_186 = arith.constant 4 : i32
    %c1_i32_187 = arith.constant 1 : i32
    %376 = arith.cmpi eq, %arg1, %c1_i32_187 : i32
    %377 = arith.extui %376 : i1 to i32
    %c0_i32_188 = arith.constant 0 : i32
    %378 = arith.cmpi ne, %377, %c0_i32_188 : i32
    scf.if %378 {
      %c1_189 = arith.constant 1 : index
      %c0_190 = arith.constant 0 : index
      %c0_191 = arith.constant 0 : index
      %379 = vector.load %arg12[%c1_189, %c0_190, %c0_191] : memref<2x8x128xf32, #tpu.memory_space<vmem>>, vector<1x8x128xf32>
      %380 = vector.shape_cast %379 : vector<1x8x128xf32> to vector<8x128xf32>
      %381 = arith.truncf %380 : vector<8x128xf32> to vector<8x128xbf16>
      %c0_192 = arith.constant 0 : index
      %c0_193 = arith.constant 0 : index
      %382 = vector.load %arg7[%c0_192, %c0_193] : memref<128x128xbf16, #tpu.memory_space<vmem>>, vector<128x128xbf16>
      %cst_194 = arith.constant dense<0.000000e+00> : vector<8x128xf32>
      %383 = tpu.matmul %381, %382, %cst_194 {dimension_numbers = #tpu.dot_dimension_numbers<[1], [0], [0], [1], [0, 0, 1, 1], [], []>} : vector<8x128xbf16>, vector<128x128xbf16>, vector<8x128xf32> -> vector<8x128xf32>
      %c0_195 = arith.constant 0 : index
      %c0_196 = arith.constant 0 : index
      %384 = vector.load %arg8[%c0_195, %c0_196] : memref<1x128xf32, #tpu.memory_space<vmem>>, vector<1x128xf32>
      %385 = vector.broadcast %384 : vector<1x128xf32> to vector<8x128xf32>
      %386 = arith.addf %383, %385 : vector<8x128xf32>
      %c0_197 = arith.constant 0 : index
      %c0_198 = arith.constant 0 : index
      %387 = vector.load %arg9[%c0_197, %c0_198] : memref<8x128xf32, #tpu.memory_space<vmem>>, vector<8x128xf32>
      tpu.vector_store %arg9[%c0_197, %c0_198], %386 {strides = array<i32>} : memref<8x128xf32, #tpu.memory_space<vmem>>, vector<8x128xf32>,
    } else {
    }
    return
  }
  func.func @transform_0(%arg0: i32, %arg1: i32) -> (i32, i32, i32) {
    %c0_i32 = arith.constant 0 : i32
    %c0_i32_0 = arith.constant 0 : i32
    return %arg1, %arg0, %c0_i32 : i32, i32, i32
  }
  func.func @transform_1(%arg0: i32, %arg1: i32) -> (i32, i32) {
    %c0_i32 = arith.constant 0 : i32
    %c0_i32_0 = arith.constant 0 : i32
    %c0_i32_1 = arith.constant 0 : i32
    return %c0_i32, %c0_i32_0 : i32, i32
  }
  func.func @transform_2(%arg0: i32, %arg1: i32) -> (i32, i32, i32) {
    %c0_i32 = arith.constant 0 : i32
    %c0_i32_0 = arith.constant 0 : i32
    %c0_i32_1 = arith.constant 0 : i32
    %c0_i32_2 = arith.constant 0 : i32
    return %c0_i32, %c0_i32_0, %c0_i32_1 : i32, i32, i32
  }
  func.func @transform_3(%arg0: i32, %arg1: i32) -> (i32, i32, i32) {
    %c0_i32 = arith.constant 0 : i32
    %c0_i32_0 = arith.constant 0 : i32
    %c0_i32_1 = arith.constant 0 : i32
    %c0_i32_2 = arith.constant 0 : i32
    return %c0_i32, %c0_i32_0, %c0_i32_1 : i32, i32, i32
  }
  func.func @transform_4(%arg0: i32, %arg1: i32) -> (i32, i32, i32) {
    %c0_i32 = arith.constant 0 : i32
    %c0_i32_0 = arith.constant 0 : i32
    %c0_i32_1 = arith.constant 0 : i32
    %c0_i32_2 = arith.constant 0 : i32
    return %c0_i32, %c0_i32_0, %c0_i32_1 : i32, i32, i32
  }
  func.func @transform_5(%arg0: i32, %arg1: i32) -> (i32, i32) {
    %c0_i32 = arith.constant 0 : i32
    %c0_i32_0 = arith.constant 0 : i32
    %c0_i32_1 = arith.constant 0 : i32
    return %c0_i32, %c0_i32_0 : i32, i32
  }
  func.func @transform_6(%arg0: i32, %arg1: i32) -> (i32, i32) {
    %c0_i32 = arith.constant 0 : i32
    %c0_i32_0 = arith.constant 0 : i32
    %c0_i32_1 = arith.constant 0 : i32
    return %c0_i32, %c0_i32_0 : i32, i32
  }
  func.func @transform_7(%arg0: i32, %arg1: i32) -> (i32, i32) {
    %c0_i32 = arith.constant 0 : i32
    %c0_i32_0 = arith.constant 0 : i32
    return %arg0, %c0_i32 : i32, i32
  }
}

</mosaic_0001>

<bundles_post_ra>
// kernel: tpu_custom_call.1
= control target key start
LH: loop header
LB: loop body
LE: loop exit
PB: predicated region body
PF: predicated region fallthrough
CT: control target
= control target key end

     0   :  { %s4764_s0 = inlined_call_operand.hbm [shape: bf16[8,8,128], index: 0, kind: input, shape index: {}]   ;;  %s4765_s1 = inlined_call_operand.hbm [shape: bf16[128,512], index: 1, kind: input, shape index: {}]   ;;  %s4766_s2 = inlined_call_operand.hbm [shape: bf16[1,128,512], index: 2, kind: input, shape index: {}]   ;;  %s4767_s3 = inlined_call_operand.hbm [shape: bf16[2,128,512], index: 3, kind: input, shape index: {}]   ;;  %s4768_s4 = inlined_call_operand.hbm [shape: f32[2,1,512], index: 4, kind: input, shape index: {}]   ;;  %s4769_s5 = inlined_call_operand.hbm [shape: bf16[128,128], index: 5, kind: input, shape index: {}]   ;;  %s4770_s6 = inlined_call_operand.vmem [shape: f32[1,128], index: 6, kind: input, shape index: {}]   ;;  %s4771_s7 = inlined_call_operand.hbm [shape: f32[8,128], index: 7, kind: output, shape index: {}]  }
   0x1   :  { %4775 = sst [smem:[#allocation33_spill]] %s4765_s1 }
   0x2   :  { %12 = vsyncpa [#allocation7], 0 }
   0x3   :  { %14 = vsyncpa [#allocation7 + $0x1], 0 }
   0x4   :  { %15 = vsyncpa [#allocation10], 0 }
   0x5   :  { %16 = vsyncpa [#allocation13], 0 }
   0x6   :  { %17 = vsyncpa [#allocation16], 0 }
   0x7   :  { %18 = vsyncpa [#allocation8], 0  ;;  %s3978_s24 = smov 0   ;;  %s3980_s25 = smov 0  }
   0x8   :  { %s3982_s26 = smov 0   ;;  %s3984_s27 = smov 0  }
   0x9   :  { %s3986_s28 = smov 0   ;;  %s3988_s29 = smov 0  }
   0xa LB: > { %s4772_s30 = sadd.s32 4294967295, %s3925_s29   ;;  %p2656_p0 = scmp.ge.s32.totalorder %s3925_s29, 1  ;;  %s3925_s29 = sphi %s3988_s29, %s24_s29   ;;  %s3921_s28 = sphi %s3986_s28, %s4827_s28   ;;  %s3917_s27 = sphi %s3984_s27, %s4826_s27   ;;  %s3913_s26 = sphi %s3982_s26, %s4825_s26   ;;  %s3909_s25 = sphi %s3980_s25, %s4824_s25   ;;  %s3905_s24 = sphi %s3978_s24, %s4823_s24  }
   0xb   : > { %p4012_p1 = scmp.eq.s32.totalorder %s4772_s30, 0  ;;  %p221_p2 = scmp.lt.s32.totalorder %s3925_s29, 3 }
   0xc   : > { %s4777_s1 = sld [smem:[#allocation33_spill]]  ;;  %s3927_s13 = smov [#allocation9]  }
   0xd   : > { %p4020_p3 = pnand %p2656_p0, %p221_p2  ;;  %s234_s14 = sshll.u32 %s3927_s13, 4  ;;  %s235_s14 = int_to_ptr.vmem [resolvable:$true] %s234_s14 }
   0xe   : > { %s260_s18 = sshll.u32 %s4767_s3, 4  ;;  %s3928_s19 = smov 256   ;;  %s261_s18 = int_to_ptr.hbm [resolvable:$true] %s260_s18 }
   0xf   : > { %p3430_p4 = pneg %p4020_p3  ;;  %s3929_s20 = smov 16  }
  0x10   : > { %s3930_s21 = smov [#allocation12]   ;;  %s246_s10 = sshll.u32 %s4766_s2, 4  ;;  %s247_s10 = int_to_ptr.hbm [resolvable:$true] %s246_s10 }
  0x11   : > { %p4028_p5 = pnand %p3430_p4, %p4012_p1  ;;  %s262_s22 = sshll.u32 %s3930_s21, 4  ;;  %s263_s22 = int_to_ptr.vmem [resolvable:$true] %s262_s22 }
  0x12   : > { %s232_s11 = sshll.u32 %s4777_s1, 4  ;;  %s274_s17 = sshll.u32 %s4768_s4, 4  ;;  %s233_s11 = int_to_ptr.hbm [resolvable:$true] %s232_s11  ;;  %s275_s17 = int_to_ptr.hbm [resolvable:$true] %s274_s17 }
  0x13   : > { %3433 = dma.hbm_to_vmem [thread:$0]  (!%p4028_p5), %s233_s11, 4096, %s235_s14, [#allocation10], %s3928_s19, %s3928_s19, %s3929_s20  }
  0x14   : > { %3439 = dma.hbm_to_vmem [thread:$0]  (!%p4028_p5), %s261_s18, 8192, %s263_s22, [#allocation13], %s3928_s19, %s3928_s19, %s3929_s20  }
  0x15   : > { %s3931_s30 = smov [#allocation11]   ;;  %s3932_s11 = smov [#allocation14]  }
  0x16   : > { %s248_s1 = sshll.u32 %s3931_s30, 4  ;;  %s276_s14 = sshll.u32 %s3932_s11, 4  ;;  %s249_s1 = int_to_ptr.vmem [resolvable:$true] %s248_s1  ;;  %s277_s14 = int_to_ptr.vmem [resolvable:$true] %s276_s14 }
  0x17   : > { %3436 = dma.hbm_to_vmem [thread:$0]  (!%p4028_p5), %s247_s10, 4096, %s249_s1, [#allocation10], %s3928_s19, %s3928_s19, %s3929_s20  }
  0x18   : > { %s3933_s18 = smov 64   ;;  %s3934_s21 = smov 4  }
  0x19   : > { %3442 = dma.hbm_to_vmem [thread:$0]  (!%p4028_p5), %s275_s17, 128, %s277_s14, [#allocation13], %s3933_s18, %s3933_s18, %s3934_s21  }
  0x1a   : > { %s288_s23 = sshll.u32 %s4769_s5, 4  ;;  %s3935_s1 = smov [#allocation15]   ;;  %s289_s23 = int_to_ptr.hbm [resolvable:$true] %s288_s23 }
  0x1b   : > { %s290_s19 = sshll.u32 %s3935_s1, 4  ;;  %s33_s20 = sadd.s32 1, %s3921_s28  ;;  %s291_s19 = int_to_ptr.vmem [resolvable:$true] %s290_s19 }
  0x1c   : > { %3445 = dma.hbm_to_vmem [thread:$0]  (!%p4028_p5), %s289_s23, 1024, %s291_s19, [#allocation16], %s3933_s18, %s3933_s18, %s3934_s21  }
  0x1d   : > { %p34_p6 = scmp.ge.s32.totalorder %s33_s20, 2  ;;  %p52_p7 = scmp.ne.s32.totalorder %s3913_s26, %s3909_s25 }
  0x1e   : > { %p53_p8 = scmp.eq.s32.totalorder %s3925_s29, 0  ;;  %s45_s9 = sadd.s32 1, %s3913_s26 }
  0x1f   : > { %s4829_s20 = smov (%p34_p6, %s33_s20), 0  ;;  %p58_p9 = scmp.ne.s32.totalorder %s3909_s25, %s3905_s24 }
  0x20   : > { %s40_s10 = ssub.s32 %s3921_s28, %s4829_s20  ;;  %p4071_p10 = por %p53_p8, %p52_p7 }
  0x21   : > { %p43_p11 = scmp.eq.s32.totalorder %s40_s10, 0  ;;  %p4077_p12 = por %p4012_p1, %p58_p9 }
  0x22   : > { %s307_s16 = sand.u32 1, %s3913_s26   ;;  %s3263_s17 = sshll.u32 %s3921_s28, 4 }
  0x23   : > { %s4084_s11 = scalar_select %p43_p11, %s3913_s26, %s45_s9  }
  0x24   : > { %p3455_p13 = scmp.lt.s32.totalorder %s3925_s29, 2  ;;  %s2663_s14 = sshll.u32 %s307_s16, 4 }
  0x25   : > { %s317_s22 = scalar_lea.hbm %s4764_s0, %s3263_s17  ;;  %s311_s1 = scalar_lea.vmem [#allocation6], %s2663_s14 }
  0x26   : > { %s318_s23 = sshll.u32 %s317_s22, 4  ;;  %s320_s19 = sshll.u32 %s311_s1, 4  ;;  %s319_s23 = int_to_ptr.hbm [resolvable:$true] %s318_s23  ;;  %s321_s19 = int_to_ptr.vmem [resolvable:$true] %s320_s19 }
  0x27   : > { %p3447_p0 = pnand %p3455_p13, %p4071_p10  ;;  %s308_s10 = scalar_lea.sflag [#allocation7], %s307_s16 }
  0x28   : > { %332 = sbr.rel (%p4020_p3) target bundleno = 1705 (0x6a9), region = 48 }
  0x29   : > { %3449 = dma.hbm_to_vmem [thread:$0]  (!%p3447_p0), %s319_s23, 256, %s321_s19, %s308_s10, %s3933_s18, %s3933_s18, %s3934_s21  }
  0x2d   : > { %s334_s9 = sand.u32 1, %s3909_s25  }
  0x2e   : > { %s4098_s30 = sshll.u32 %s334_s9, 4  ;;  %s335_s17 = scalar_lea.sflag [#allocation7], %s334_s9 }
  0x2f   : > { %s338_s14 = scalar_lea.vmem [#allocation6], %s4098_s30 }
  0x30   : > { %3884 = dma.done.wait (%p4077_p12), %s335_s17, 256  }
  0x31   : > { %3886 = vsyncadd (%p4077_p12), %s335_s17, 4294967040 }
  0x32   : > { %3888 = dma.done.wait (%p4012_p1), [#allocation10], 8192  }
  0x33   : > { %3890 = vsyncadd (%p4012_p1), [#allocation10], 4294959104 }
  0x34   : > { %3892 = dma.done.wait (%p4012_p1), [#allocation13], 8320  }
  0x35   : > { %3894 = vsyncadd (%p4012_p1), [#allocation13], 4294958976 }
  0x36   : > { %3896 = dma.done.wait (%p4012_p1), [#allocation16], 1024  }
  0x37   : > { %3898 = vsyncadd (%p4012_p1), [#allocation16], 4294966272  ;;  %p2673_p2 = scmp.ne.s32.totalorder %s3917_s27, 0 }
  0x39   : > { %394 = sbr.rel (%p2673_p2) target bundleno = 67 (0x43), region = 76 }
  0x3e   : > { %v3936_v0 = vmov 0.0  }
  0x3f   : > { %395 = vst [vmem:[#allocation4] sm:$0xff] %v3936_v0 }
  0x40   : > { %396 = vst [vmem:[#allocation4 + $0x8] sm:$0xff] %v3936_v0 }
  0x41   : > { %397 = vst [vmem:[#allocation5 + $0x8] sm:$0xff] %v3936_v0 }
  0x42   : > { %398 = vst [vmem:[#allocation5] sm:$0xff] %v3936_v0 }
  0x43 PF: > { %v2796_v1 = vld [vmem:[#allocation9 + $0xe0] sm:$0xf]  ;;  %v3296_v2 = vld [vmem:[#allocation9 + $0xec] sm:$0xf0]  ;;  %v3294_v3 = vld [vmem:[#allocation9 + $0xe4] sm:$0xf] }
  0x44   : > { %v2797_v4 = vor.u32 %v3296_v2, %v2796_v1  ;;  %v2798_v5 = vld [vmem:[#allocation9 + $0xf0] sm:$0xf0]  ;;  %v2804_v6 = vld [vmem:[#allocation9 + $0xe8] sm:$0xf]  ;;  %v3297_v7 = vld [vmem:[#allocation9 + $0xf4] sm:$0xf0] }
  0x45   : > { %v2801_v8 = vor.u32 %v3294_v3, %v2798_v5  ;;  %v2805_v9 = vor.u32 %v3297_v7, %v2804_v6  ;;  %v3295_v10 = vld [vmem:[#allocation9 + $0xec] sm:$0xf]  ;;  %v2806_v11 = vld [vmem:[#allocation9 + $0xf8] sm:$0xf0]  ;;  %v2780_v12 = vld [vmem:[#allocation9 + $0xc0] sm:$0xf] }
  0x46   : > { %617 = vmatpush.bf16.msra.mxu0 %v2797_v4  ;;  %v2809_v13 = vor.u32 %v3295_v10, %v2806_v11  ;;  %v3292_v14 = vld [vmem:[#allocation9 + $0xcc] sm:$0xf0]  ;;  %v3290_v15 = vld [vmem:[#allocation9 + $0xc4] sm:$0xf]  ;;  %v2782_v16 = vld [vmem:[#allocation9 + $0xd0] sm:$0xf0] }
  0x47   : > { %636 = vmatpush.bf16.msra.mxu1 %v2801_v8  ;;  %655 = vmatpush.bf16.msra.mxu2 %v2805_v9  ;;  %v2781_v17 = vor.u32 %v3292_v14, %v2780_v12  ;;  %v2785_v18 = vor.u32 %v3290_v15, %v2782_v16  ;;  %v2788_v19 = vld [vmem:[#allocation9 + $0xc8] sm:$0xf]  ;;  %v3293_v20 = vld [vmem:[#allocation9 + $0xd4] sm:$0xf0]  ;;  %v3291_v21 = vld [vmem:[#allocation9 + $0xcc] sm:$0xf] }
  0x48   : > { %674 = vmatpush.bf16.msra.mxu3 %v2809_v13  ;;  %v2789_v22 = vor.u32 %v3293_v20, %v2788_v19  ;;  %v2790_v23 = vld [vmem:[#allocation9 + $0xd8] sm:$0xf0]  ;;  %v2764_v24 = vld [vmem:[#allocation9 + $0xa0] sm:$0xf]  ;;  %v3288_v25 = vld [vmem:[#allocation9 + $0xac] sm:$0xf0] }
  0x49   : > { %v2793_v26 = vor.u32 %v3291_v21, %v2790_v23  ;;  %v3286_v27 = vld [vmem:[#allocation9 + $0xa4] sm:$0xf]  ;;  %v2766_v28 = vld [vmem:[#allocation9 + $0xb0] sm:$0xf0]  ;;  %v2772_v29 = vld [vmem:[#allocation9 + $0xa8] sm:$0xf]  ;;  %v2765_v30 = vor.u32 %v3288_v25, %v2764_v24 }
  0x4a   : > { %618 = vmatpush.bf16.msra.mxu0 %v2781_v17  ;;  %v3289_v31 = vld [vmem:[#allocation9 + $0xb4] sm:$0xf0]  ;;  %v3287_v32 = vld [vmem:[#allocation9 + $0xac] sm:$0xf]  ;;  %v2774_v33 = vld [vmem:[#allocation9 + $0xb8] sm:$0xf0]  ;;  %v2769_v34 = vor.u32 %v3286_v27, %v2766_v28 }
  0x4b   : > { %637 = vmatpush.bf16.msra.mxu1 %v2785_v18  ;;  %656 = vmatpush.bf16.msra.mxu2 %v2789_v22  ;;  %v2773_v35 = vor.u32 %v3289_v31, %v2772_v29  ;;  %v2748_v36 = vld [vmem:[#allocation9 + $0x80] sm:$0xf]  ;;  %v3284_v37 = vld [vmem:[#allocation9 + $0x8c] sm:$0xf0]  ;;  %v3282_v38 = vld [vmem:[#allocation9 + $0x84] sm:$0xf]  ;;  %v2777_v39 = vor.u32 %v3287_v32, %v2774_v33 }
  0x4c   : > { %675 = vmatpush.bf16.msra.mxu3 %v2793_v26  ;;  %v2750_v40 = vld [vmem:[#allocation9 + $0x90] sm:$0xf0]  ;;  %v2756_v41 = vld [vmem:[#allocation9 + $0x88] sm:$0xf]  ;;  %v3285_v42 = vld [vmem:[#allocation9 + $0x94] sm:$0xf0]  ;;  %v2749_v45 = vor.u32 %v3284_v37, %v2748_v36 }
  0x4d   : > { %v3283_v43 = vld [vmem:[#allocation9 + $0x8c] sm:$0xf]  ;;  %v2758_v44 = vld [vmem:[#allocation9 + $0x98] sm:$0xf0]  ;;  %v2753_v46 = vor.u32 %v3282_v38, %v2750_v40  ;;  %v2757_v47 = vor.u32 %v3285_v42, %v2756_v41  ;;  %v2732_v48 = vld [vmem:[#allocation9 + $0x60] sm:$0xf] }
  0x4e   : > { %619 = vmatpush.bf16.msra.mxu0 %v2765_v30  ;;  %v3280_v49 = vld [vmem:[#allocation9 + $0x6c] sm:$0xf0]  ;;  %v3278_v50 = vld [vmem:[#allocation9 + $0x64] sm:$0xf]  ;;  %v2761_v51 = vor.u32 %v3283_v43, %v2758_v44  ;;  %v2734_v52 = vld [vmem:[#allocation9 + $0x70] sm:$0xf0] }
  0x4f   : > { %638 = vmatpush.bf16.msra.mxu1 %v2769_v34  ;;  %657 = vmatpush.bf16.msra.mxu2 %v2773_v35  ;;  %v2740_v53 = vld [vmem:[#allocation9 + $0x68] sm:$0xf]  ;;  %v3281_v54 = vld [vmem:[#allocation9 + $0x74] sm:$0xf0]  ;;  %v3279_v55 = vld [vmem:[#allocation9 + $0x6c] sm:$0xf]  ;;  %v2733_v57 = vor.u32 %v3280_v49, %v2732_v48  ;;  %v2737_v58 = vor.u32 %v3278_v50, %v2734_v52 }
  0x50   : > { %676 = vmatpush.bf16.msra.mxu3 %v2777_v39  ;;  %v2742_v56 = vld [vmem:[#allocation9 + $0x78] sm:$0xf0]  ;;  %v2741_v59 = vor.u32 %v3281_v54, %v2740_v53  ;;  %v2716_v60 = vld [vmem:[#allocation9 + $0x40] sm:$0xf]  ;;  %v3276_v61 = vld [vmem:[#allocation9 + $0x4c] sm:$0xf0] }
  0x51   : > { %v3274_v62 = vld [vmem:[#allocation9 + $0x44] sm:$0xf]  ;;  %v2745_v63 = vor.u32 %v3279_v55, %v2742_v56  ;;  %v2718_v0 = vld [vmem:[#allocation9 + $0x50] sm:$0xf0]  ;;  %v2724_v1 = vld [vmem:[#allocation9 + $0x48] sm:$0xf]  ;;  %v2717_v5 = vor.u32 %v3276_v61, %v2716_v60 }
  0x52   : > { %620 = vmatpush.bf16.msra.mxu0 %v2749_v45  ;;  %v3277_v2 = vld [vmem:[#allocation9 + $0x54] sm:$0xf0]  ;;  %v3275_v3 = vld [vmem:[#allocation9 + $0x4c] sm:$0xf]  ;;  %v2726_v4 = vld [vmem:[#allocation9 + $0x58] sm:$0xf0]  ;;  %v2721_v6 = vor.u32 %v3274_v62, %v2718_v0 }
  0x53   : > { %639 = vmatpush.bf16.msra.mxu1 %v2753_v46  ;;  %658 = vmatpush.bf16.msra.mxu2 %v2757_v47  ;;  %v2725_v7 = vor.u32 %v3277_v2, %v2724_v1  ;;  %v2700_v8 = vld [vmem:[#allocation9 + $0x20] sm:$0xf]  ;;  %v3272_v9 = vld [vmem:[#allocation9 + $0x2c] sm:$0xf0]  ;;  %v3270_v10 = vld [vmem:[#allocation9 + $0x24] sm:$0xf]  ;;  %v2729_v11 = vor.u32 %v3275_v3, %v2726_v4 }
  0x54   : > { %677 = vmatpush.bf16.msra.mxu3 %v2761_v51  ;;  %v2702_v12 = vld [vmem:[#allocation9 + $0x30] sm:$0xf0]  ;;  %v2708_v13 = vld [vmem:[#allocation9 + $0x28] sm:$0xf]  ;;  %v3273_v14 = vld [vmem:[#allocation9 + $0x34] sm:$0xf0]  ;;  %v2701_v17 = vor.u32 %v3272_v9, %v2700_v8 }
  0x55   : > { %v3271_v15 = vld [vmem:[#allocation9 + $0x2c] sm:$0xf]  ;;  %v2710_v16 = vld [vmem:[#allocation9 + $0x38] sm:$0xf0]  ;;  %v2684_v18 = vld [vmem:[#allocation9] sm:$0xf]  ;;  %v2705_v19 = vor.u32 %v3270_v10, %v2702_v12  ;;  %v2709_v20 = vor.u32 %v3273_v14, %v2708_v13 }
  0x56   : > { %621 = vmatpush.bf16.msra.mxu0 %v2733_v57  ;;  %v3268_v21 = vld [vmem:[#allocation9 + $0xc] sm:$0xf0]  ;;  %v3266_v22 = vld [vmem:[#allocation9 + $0x4] sm:$0xf]  ;;  %v2686_v23 = vld [vmem:[#allocation9 + $0x10] sm:$0xf0]  ;;  %v2713_v24 = vor.u32 %v3271_v15, %v2710_v16 }
  0x57   : > { %640 = vmatpush.bf16.msra.mxu1 %v2737_v58  ;;  %659 = vmatpush.bf16.msra.mxu2 %v2741_v59  ;;  %v2692_v25 = vld [vmem:[#allocation9 + $0x8] sm:$0xf]  ;;  %v3269_v26 = vld [vmem:[#allocation9 + $0x14] sm:$0xf0]  ;;  %v3267_v27 = vld [vmem:[#allocation9 + $0xc] sm:$0xf]  ;;  %v2685_v31 = vor.u32 %v3268_v21, %v2684_v18  ;;  %v2689_v34 = vor.u32 %v3266_v22, %v2686_v23 }
  0x58   : > { %678 = vmatpush.bf16.msra.mxu3 %v2745_v63  ;;  %v2694_v28 = vld [vmem:[#allocation9 + $0x18] sm:$0xf0]  ;;  %v2924_v29 = vld [vmem:[#allocation12 + $0xe0] sm:$0xf]  ;;  %v3328_v30 = vld [vmem:[#allocation12 + $0xec] sm:$0xf0]  ;;  %v2693_v35 = vor.u32 %v3269_v26, %v2692_v25 }
  0x59   : > { %v3326_v32 = vld [vmem:[#allocation12 + $0xe4] sm:$0xf]  ;;  %v2926_v33 = vld [vmem:[#allocation12 + $0xf0] sm:$0xf0]  ;;  %v2697_v37 = vor.u32 %v3267_v27, %v2694_v28  ;;  %v4120_v38 = vor.u32 %v3328_v30, %v2924_v29  ;;  %v2932_v39 = vld [vmem:[#allocation12 + $0xe8] sm:$0xf] }
  0x5a   : > { %622 = vmatpush.bf16.msra.mxu0 %v2717_v5  ;;  %v3264_v36 = vld [vmem:[%s338_s14] sm:$0xff]  ;;  %v3329_v40 = vld [vmem:[#allocation12 + $0xf4] sm:$0xf0]  ;;  %v3327_v41 = vld [vmem:[#allocation12 + $0xec] sm:$0xf]  ;;  %v4122_v42 = vor.u32 %v3326_v32, %v2926_v33  ;;  %p3226_p1 = scmp.ne.s32.totalorder %s3917_s27, 1 }
  0x5b   : > { %641 = vmatpush.bf16.msra.mxu1 %v2721_v6  ;;  %660 = vmatpush.bf16.msra.mxu2 %v2725_v7  ;;  %v2934_v43 = vld [vmem:[#allocation12 + $0xf8] sm:$0xf0]  ;;  %v2908_v44 = vld [vmem:[#allocation12 + $0xc0] sm:$0xf]  ;;  %v3324_v45 = vld [vmem:[#allocation12 + $0xcc] sm:$0xf0]  ;;  %v4124_v48 = vor.u32 %v3329_v40, %v2932_v39 }
  0x5c   : > { %679 = vmatpush.bf16.msra.mxu3 %v2729_v11  ;;  %v3322_v46 = vld [vmem:[#allocation12 + $0xc4] sm:$0xf]  ;;  %v2910_v47 = vld [vmem:[#allocation12 + $0xd0] sm:$0xf0]  ;;  %v4127_v49 = vor.u32 %v3327_v41, %v2934_v43  ;;  %v4129_v50 = vor.u32 %v3324_v45, %v2908_v44  ;;  %v2916_v51 = vld [vmem:[#allocation12 + $0xc8] sm:$0xf] }
  0x5d   : > { %v3325_v52 = vld [vmem:[#allocation12 + $0xd4] sm:$0xf0]  ;;  %v3323_v53 = vld [vmem:[#allocation12 + $0xcc] sm:$0xf]  ;;  %v4132_v54 = vor.u32 %v3322_v46, %v2910_v47  ;;  %v2918_v55 = vld [vmem:[#allocation12 + $0xd8] sm:$0xf0] }
  0x5e   : > { %623 = vmatpush.bf16.msra.mxu0 %v2701_v17  ;;  %v2892_v56 = vld [vmem:[#allocation12 + $0xa0] sm:$0xf]  ;;  %v3320_v57 = vld [vmem:[#allocation12 + $0xac] sm:$0xf0]  ;;  %v3318_v58 = vld [vmem:[#allocation12 + $0xa4] sm:$0xf]  ;;  %v4135_v60 = vor.u32 %v3325_v52, %v2916_v51  ;;  %v4139_v61 = vor.u32 %v3323_v53, %v2918_v55 }
  0x5f   : > { %642 = vmatpush.bf16.msra.mxu1 %v2705_v19  ;;  %661 = vmatpush.bf16.msra.mxu2 %v2709_v20  ;;  %v2894_v59 = vld [vmem:[#allocation12 + $0xb0] sm:$0xf0]  ;;  %v4141_v62 = vor.u32 %v3320_v57, %v2892_v56  ;;  %v2900_v63 = vld [vmem:[#allocation12 + $0xa8] sm:$0xf]  ;;  %v3321_v0 = vld [vmem:[#allocation12 + $0xb4] sm:$0xf0] }
  0x60   : > { %680 = vmatpush.bf16.msra.mxu3 %v2713_v24  ;;  %v3319_v1 = vld [vmem:[#allocation12 + $0xac] sm:$0xf]  ;;  %v4144_v2 = vor.u32 %v3318_v58, %v2894_v59  ;;  %v2902_v3 = vld [vmem:[#allocation12 + $0xb8] sm:$0xf0]  ;;  %v2876_v4 = vld [vmem:[#allocation12 + $0x80] sm:$0xf]  ;;  %v4147_v8 = vor.u32 %v3321_v0, %v2900_v63 }
  0x61   : > { %v3316_v5 = vld [vmem:[#allocation12 + $0x8c] sm:$0xf0]  ;;  %v3314_v6 = vld [vmem:[#allocation12 + $0x84] sm:$0xf]  ;;  %v2878_v7 = vld [vmem:[#allocation12 + $0x90] sm:$0xf0]  ;;  %v4151_v9 = vor.u32 %v3319_v1, %v2902_v3 }
  0x62   : > { %624 = vmatpush.bf16.msra.mxu0 %v2685_v31  ;;  %v4153_v10 = vor.u32 %v3316_v5, %v2876_v4  ;;  %v2884_v11 = vld [vmem:[#allocation12 + $0x88] sm:$0xf]  ;;  %v3317_v12 = vld [vmem:[#allocation12 + $0x94] sm:$0xf0]  ;;  %v3315_v13 = vld [vmem:[#allocation12 + $0x8c] sm:$0xf]  ;;  %v4156_v14 = vor.u32 %v3314_v6, %v2878_v7 }
  0x63   : > { %643 = vmatpush.bf16.msra.mxu1 %v2689_v34  ;;  %662 = vmatpush.bf16.msra.mxu2 %v2693_v35  ;;  %v2886_v15 = vld [vmem:[#allocation12 + $0x98] sm:$0xf0]  ;;  %v2860_v16 = vld [vmem:[#allocation12 + $0x60] sm:$0xf]  ;;  %v3312_v17 = vld [vmem:[#allocation12 + $0x6c] sm:$0xf0]  ;;  %v4159_v20 = vor.u32 %v3317_v12, %v2884_v11 }
  0x64   : > { %681 = vmatpush.bf16.msra.mxu3 %v2697_v37  ;;  %v3310_v18 = vld [vmem:[#allocation12 + $0x64] sm:$0xf]  ;;  %v2862_v19 = vld [vmem:[#allocation12 + $0x70] sm:$0xf0]  ;;  %v3265_v21 = vld [vmem:[%s338_s14 + $0x8] sm:$0xff]  ;;  %v4165_v22 = vor.u32 %v3315_v13, %v2886_v15  ;;  %v4167_v23 = vor.u32 %v3312_v17, %v2860_v16 }
  0x65   : > { %625 = vmatmul.bf16.vlgmr.msra.gmra.mxu0 %v3264_v36  ;;  %v2868_v24 = vld [vmem:[#allocation12 + $0x68] sm:$0xf]  ;;  %v3313_v25 = vld [vmem:[#allocation12 + $0x74] sm:$0xf0]  ;;  %v3311_v26 = vld [vmem:[#allocation12 + $0x6c] sm:$0xf]  ;;  %v4170_v27 = vor.u32 %v3310_v18, %v2862_v19 }
  0x66   : > { %908 = vmatpush.bf16.msrb.mxu0 %v4120_v38  ;;  %644 = vmatmul.bf16.vlgmr.msra.gmra.mxu1 %v3264_v36  ;;  %v2870_v28 = vld [vmem:[#allocation12 + $0x78] sm:$0xf0]  ;;  %v2844_v29 = vld [vmem:[#allocation12 + $0x40] sm:$0xf]  ;;  %v3308_v30 = vld [vmem:[#allocation12 + $0x4c] sm:$0xf0]  ;;  %v4173_v33 = vor.u32 %v3313_v25, %v2868_v24 }
  0x67   : > { %921 = vmatpush.bf16.msrb.mxu1 %v4122_v42  ;;  %663 = vmatmul.bf16.vlgmr.msra.gmra.mxu2 %v3264_v36  ;;  %v3306_v31 = vld [vmem:[#allocation12 + $0x44] sm:$0xf]  ;;  %v2846_v32 = vld [vmem:[#allocation12 + $0x50] sm:$0xf0]  ;;  %v4177_v34 = vor.u32 %v3311_v26, %v2870_v28  ;;  %v4179_v35 = vor.u32 %v3308_v30, %v2844_v29  ;;  %v3309_v37 = vld [vmem:[#allocation12 + $0x54] sm:$0xf0] }
  0x68   : > { %682 = vmatmul.bf16.vlgmr.msra.gmra.mxu3 %v3264_v36  ;;  %934 = vmatpush.bf16.msrb.mxu2 %v4124_v48  ;;  %v2852_v36 = vld [vmem:[#allocation12 + $0x48] sm:$0xf]  ;;  %v3307_v39 = vld [vmem:[#allocation12 + $0x4c] sm:$0xf]  ;;  %v4182_v40 = vor.u32 %v3306_v31, %v2846_v32  ;;  %v2854_v41 = vld [vmem:[#allocation12 + $0x58] sm:$0xf0] }
  0x69   : > { %947 = vmatpush.bf16.msrb.mxu3 %v4127_v49  ;;  %v2828_v43 = vld [vmem:[#allocation12 + $0x20] sm:$0xf]  ;;  %v3304_v44 = vld [vmem:[#allocation12 + $0x2c] sm:$0xf0]  ;;  %v3302_v45 = vld [vmem:[#allocation12 + $0x24] sm:$0xf]  ;;  %v4185_v47 = vor.u32 %v3309_v37, %v2852_v36  ;;  %v4189_v51 = vor.u32 %v3307_v39, %v2854_v41 }
  0x6a   : > { %909 = vmatpush.bf16.msrb.mxu0 %v4129_v50  ;;  %v2830_v46 = vld [vmem:[#allocation12 + $0x30] sm:$0xf0]  ;;  %v4191_v52 = vor.u32 %v3304_v44, %v2828_v43  ;;  %v2836_v53 = vld [vmem:[#allocation12 + $0x28] sm:$0xf]  ;;  %v3305_v55 = vld [vmem:[#allocation12 + $0x34] sm:$0xf0] }
  0x6b   : > { %922 = vmatpush.bf16.msrb.mxu1 %v4132_v54  ;;  %v3303_v56 = vld [vmem:[#allocation12 + $0x2c] sm:$0xf]  ;;  %v4194_v57 = vor.u32 %v3302_v45, %v2830_v46  ;;  %v2838_v58 = vld [vmem:[#allocation12 + $0x38] sm:$0xf0]  ;;  %v2812_v59 = vld [vmem:[#allocation12] sm:$0xf]  ;;  %v4197_v3 = vor.u32 %v3305_v55, %v2836_v53 }
  0x6c   : > { %935 = vmatpush.bf16.msrb.mxu2 %v4135_v60  ;;  %v3300_v63 = vld [vmem:[#allocation12 + $0xc] sm:$0xf0]  ;;  %v3298_v0 = vld [vmem:[#allocation12 + $0x4] sm:$0xf]  ;;  %v2814_v1 = vld [vmem:[#allocation12 + $0x10] sm:$0xf0]  ;;  %v4201_v4 = vor.u32 %v3303_v56, %v2838_v58 }
  0x6d   : > { %948 = vmatpush.bf16.msrb.mxu3 %v4139_v61  ;;  %v4203_v5 = vor.u32 %v3300_v63, %v2812_v59  ;;  %v2820_v6 = vld [vmem:[#allocation12 + $0x8] sm:$0xf]  ;;  %v3301_v7 = vld [vmem:[#allocation12 + $0x14] sm:$0xf0]  ;;  %v4206_v11 = vor.u32 %v3298_v0, %v2814_v1  ;;  %v3299_v12 = vld [vmem:[#allocation12 + $0xc] sm:$0xf] }
  0x6e   : > { %910 = vmatpush.bf16.msrb.mxu0 %v4141_v62  ;;  %v2822_v13 = vld [vmem:[#allocation12 + $0x18] sm:$0xf0]  ;;  %v741_v15 = vld [vmem:[#allocation4] sm:$0xff]  ;;  %v4209_v16 = vor.u32 %v3301_v7, %v2820_v6 }
  0x6f   : > { %923 = vmatpush.bf16.msrb.mxu1 %v4144_v2  ;;  %v4213_v17 = vor.u32 %v3299_v12, %v2822_v13  ;;  %v747_v18 = vpack.c.bf16 %v741_v15, %v741_v15  ;;  %v435_v24 = vld [vmem:[#allocation14] sm:$0xf] }
  0x70   : > { %936 = vmatpush.bf16.msrb.mxu2 %v4147_v8  ;;  %v437_v25 = vperm.slane %v435_v24, 0  ;;  %v438_v28 = vperm.slane %v435_v24, 1  ;;  %v439_v37 = vperm.slane %v435_v24, 2  ;;  %v440_v39 = vperm.slane %v435_v24, 3 }
  0x71   : > { %949 = vmatpush.bf16.msrb.mxu3 %v4151_v9 }
  0x72   : > { %911 = vmatpush.bf16.msrb.mxu0 %v4153_v10 }
  0x73   : > { %924 = vmatpush.bf16.msrb.mxu1 %v4156_v14 }
  0x74   : > { %937 = vmatpush.bf16.msrb.mxu2 %v4159_v20 }
  0x75   : > { %950 = vmatpush.bf16.msrb.mxu3 %v4165_v22  ;;  %630 = vmatmul.bf16.gmra.mxu0 %v3265_v21 }
  0x76   : > { %912 = vmatpush.bf16.msrb.mxu0 %v4167_v23  ;;  %649 = vmatmul.bf16.gmra.mxu1 %v3265_v21 }
  0x77   : > { %925 = vmatpush.bf16.msrb.mxu1 %v4170_v27  ;;  %668 = vmatmul.bf16.gmra.mxu2 %v3265_v21 }
  0x78   : > { %687 = vmatmul.bf16.gmra.mxu3 %v3265_v21  ;;  %938 = vmatpush.bf16.msrb.mxu2 %v4173_v33 }
  0x79   : > { %951 = vmatpush.bf16.msrb.mxu3 %v4177_v34 }
  0x7a   : > { %913 = vmatpush.bf16.msrb.mxu0 %v4179_v35 }
  0x7b   : > { %926 = vmatpush.bf16.msrb.mxu1 %v4182_v40 }
  0x7c   : > { %939 = vmatpush.bf16.msrb.mxu2 %v4185_v47 }
  0x7d   : > { %952 = vmatpush.bf16.msrb.mxu3 %v4189_v51 }
  0x7e   : > { %914 = vmatpush.bf16.msrb.mxu0 %v4191_v52 }
  0x7f   : > { %927 = vmatpush.bf16.msrb.mxu1 %v4194_v57 }
  0x80   : > { %940 = vmatpush.bf16.msrb.mxu2 %v4197_v3 }
  0x81   : > { %953 = vmatpush.bf16.msrb.mxu3 %v4201_v4 }
  0x82   : > { %915 = vmatpush.bf16.msrb.mxu0 %v4203_v5 }
  0x83   : > { %928 = vmatpush.bf16.msrb.mxu1 %v4206_v11 }
  0x84   : > { %941 = vmatpush.bf16.msrb.mxu2 %v4209_v16 }
  0x85   : > { %954 = vmatpush.bf16.msrb.mxu3 %v4213_v17  ;;  %916 = vmatmul.bf16.vlgmr.msrb.gmra.mxu0 %v747_v18 }
  0x86   : > { %1039 = vmatpush.bf16.msra.mxu0 %v4120_v38  ;;  %929 = vmatmul.bf16.vlgmr.msrb.gmra.mxu1 %v747_v18 }
  0x87   : > { %1052 = vmatpush.bf16.msra.mxu1 %v4122_v42  ;;  %942 = vmatmul.bf16.vlgmr.msrb.gmra.mxu2 %v747_v18 }
  0x88   : > { %1065 = vmatpush.bf16.msra.mxu2 %v4124_v48  ;;  %955 = vmatmul.bf16.vlgmr.msrb.gmra.mxu3 %v747_v18 }
  0x89   : > { %1078 = vmatpush.bf16.msra.mxu3 %v4127_v49 }
  0x8a   : > { %1040 = vmatpush.bf16.msra.mxu0 %v4129_v50 }
  0x8b   : > { %1053 = vmatpush.bf16.msra.mxu1 %v4132_v54 }
  0x8c   : > { %1066 = vmatpush.bf16.msra.mxu2 %v4135_v60 }
  0x8d   : > { %1079 = vmatpush.bf16.msra.mxu3 %v4139_v61 }
  0x8e   : > { %1041 = vmatpush.bf16.msra.mxu0 %v4141_v62 }
  0x8f   : > { %1054 = vmatpush.bf16.msra.mxu1 %v4144_v2 }
  0x90   : > { %1067 = vmatpush.bf16.msra.mxu2 %v4147_v8 }
  0x91   : > { %1080 = vmatpush.bf16.msra.mxu3 %v4151_v9 }
  0x92   : > { %1042 = vmatpush.bf16.msra.mxu0 %v4153_v10 }
  0x93   : > { %1055 = vmatpush.bf16.msra.mxu1 %v4156_v14 }
  0x94   : > { %1068 = vmatpush.bf16.msra.mxu2 %v4159_v20 }
  0x95   : > { %1081 = vmatpush.bf16.msra.mxu3 %v4165_v22 }
  0x96   : > { %1043 = vmatpush.bf16.msra.mxu0 %v4167_v23 }
  0x97   : > { %1056 = vmatpush.bf16.msra.mxu1 %v4170_v27 }
  0x98   : > { %1069 = vmatpush.bf16.msra.mxu2 %v4173_v33 }
  0x99   : > { %1082 = vmatpush.bf16.msra.mxu3 %v4177_v34 }
  0x9a   : > { %1044 = vmatpush.bf16.msra.mxu0 %v4179_v35 }
  0x9b   : > { %1057 = vmatpush.bf16.msra.mxu1 %v4182_v40 }
  0x9c   : > { %1070 = vmatpush.bf16.msra.mxu2 %v4185_v47 }
  0x9d   : > { %1083 = vmatpush.bf16.msra.mxu3 %v4189_v51 }
  0x9e   : > { %1045 = vmatpush.bf16.msra.mxu0 %v4191_v52 }
  0x9f   : > { %1058 = vmatpush.bf16.msra.mxu1 %v4194_v57 }
  0xa0   : > { %1071 = vmatpush.bf16.msra.mxu2 %v4197_v3 }
  0xa1   : > { %1084 = vmatpush.bf16.msra.mxu3 %v4201_v4 }
  0xa2   : > { %1046 = vmatpush.bf16.msra.mxu0 %v4203_v5 }
  0xa3   : > { %1059 = vmatpush.bf16.msra.mxu1 %v4206_v11 }
  0xa4   : > { %1072 = vmatpush.bf16.msra.mxu2 %v4209_v16 }
  0xa5   : > { %1085 = vmatpush.bf16.msra.mxu3 %v4213_v17 }
  0xa6   : > { %1171 = vmatpush.bf16.msrb.mxu0 %v4120_v38 }
  0xa7   : > { %1184 = vmatpush.bf16.msrb.mxu1 %v4122_v42 }
  0xa8   : > { %1197 = vmatpush.bf16.msrb.mxu2 %v4124_v48 }
  0xa9   : > { %1210 = vmatpush.bf16.msrb.mxu3 %v4127_v49 }
  0xaa   : > { %1172 = vmatpush.bf16.msrb.mxu0 %v4129_v50 }
  0xab   : > { %1185 = vmatpush.bf16.msrb.mxu1 %v4132_v54 }
  0xac   : > { %1198 = vmatpush.bf16.msrb.mxu2 %v4135_v60 }
  0xad   : > { %1211 = vmatpush.bf16.msrb.mxu3 %v4139_v61 }
  0xae   : > { %1173 = vmatpush.bf16.msrb.mxu0 %v4141_v62 }
  0xaf   : > { %1186 = vmatpush.bf16.msrb.mxu1 %v4144_v2 }
  0xb0   : > { %1199 = vmatpush.bf16.msrb.mxu2 %v4147_v8 }
  0xb1   : > { %1212 = vmatpush.bf16.msrb.mxu3 %v4151_v9 }
  0xb2   : > { %1174 = vmatpush.bf16.msrb.mxu0 %v4153_v10 }
  0xb3   : > { %1187 = vmatpush.bf16.msrb.mxu1 %v4156_v14 }
  0xb4   : > { %1200 = vmatpush.bf16.msrb.mxu2 %v4159_v20 }
  0xb5   : > { %1213 = vmatpush.bf16.msrb.mxu3 %v4165_v22 }
  0xb6   : > { %1175 = vmatpush.bf16.msrb.mxu0 %v4167_v23 }
  0xb7   : > { %1188 = vmatpush.bf16.msrb.mxu1 %v4170_v27 }
  0xb8   : > { %1201 = vmatpush.bf16.msrb.mxu2 %v4173_v33 }
  0xb9   : > { %1214 = vmatpush.bf16.msrb.mxu3 %v4177_v34 }
  0xba   : > { %1176 = vmatpush.bf16.msrb.mxu0 %v4179_v35 }
  0xbb   : > { %1189 = vmatpush.bf16.msrb.mxu1 %v4182_v40 }
  0xbc   : > { %1202 = vmatpush.bf16.msrb.mxu2 %v4185_v47 }
  0xbd   : > { %1215 = vmatpush.bf16.msrb.mxu3 %v4189_v51 }
  0xbe   : > { %1177 = vmatpush.bf16.msrb.mxu0 %v4191_v52 }
  0xbf   : > { %1190 = vmatpush.bf16.msrb.mxu1 %v4194_v57 }
  0xc0   : > { %1203 = vmatpush.bf16.msrb.mxu2 %v4197_v3 }
  0xc1   : > { %1216 = vmatpush.bf16.msrb.mxu3 %v4201_v4 }
  0xc2   : > { %1178 = vmatpush.bf16.msrb.mxu0 %v4203_v5 }
  0xc3   : > { %1191 = vmatpush.bf16.msrb.mxu1 %v4206_v11 }
  0xc4   : > { %1204 = vmatpush.bf16.msrb.mxu2 %v4209_v16 }
  0xc5   : > { %1217 = vmatpush.bf16.msrb.mxu3 %v4213_v17 }
  0xe2   : > { %v626_v19 = vpop.f32.mrf.mxu0 }
  0xe3   : > { %v645_v21 = vpop.f32.mrf.mxu1  ;;  %v627_v13 = vadd.f32 %v626_v19, %v437_v25 }
  0xe4   : > { %v646_v18 = vadd.f32 %v645_v21, %v438_v28 }
  0xea   : > { %v664_v26 = vpop.f32.mrf.mxu2  ;;  %v628_v30 = vpop.f32.mrf.mxu0 }
  0xeb   : > { %v683_v29 = vpop.f32.mrf.mxu3  ;;  %v4282_v31 = vadd.f32 %v628_v30, %v437_v25  ;;  %v647_v32 = vpop.f32.mrf.mxu1 }
  0xec   : > { %v4284_v36 = vadd.f32 %v647_v32, %v438_v28 }
  0xf2   : > { %v666_v41 = vpop.f32.mrf.mxu2  ;;  %v631_v45 = vpop.f32.mrf.mxu0 }
  0xf3   : > { %v4286_v43 = vadd.f32 %v666_v41, %v439_v37  ;;  %v685_v44 = vpop.f32.mrf.mxu3  ;;  %v4290_v53 = vadd.f32 %v631_v45, %v437_v25  ;;  %v650_v55 = vpop.f32.mrf.mxu1 }
  0xf4   : > { %v4288_v46 = vadd.f32 %v685_v44, %v440_v39  ;;  %v4292_v56 = vadd.f32 %v650_v55, %v438_v28 }
  0xfa   : > { %v669_v58 = vpop.f32.mrf.mxu2  ;;  %v633_v0 = vpop.f32.mrf.mxu0 }
  0xfb   : > { %v4294_v59 = vadd.f32 %v669_v58, %v439_v37  ;;  %v688_v63 = vpop.f32.mrf.mxu3  ;;  %v4298_v6 = vadd.f32 %v633_v0, %v437_v25  ;;  %v652_v7 = vpop.f32.mrf.mxu1  ;;  %v684_v0 = vadd.f32 %v683_v29, %v440_v39 }
  0xfc   : > { %v4296_v1 = vadd.f32 %v688_v63, %v440_v39  ;;  %v4300_v12 = vadd.f32 %v652_v7, %v438_v28 }
  0xfd   : > { %4782 = vst [vmem:[#allocation23_spill] sm:$0xff] %v4294_v59 }
  0xfe   : > { %4783 = vst [vmem:[#allocation24_spill] sm:$0xff] %v4296_v1 }
  0xff   : > { %4784 = vst [vmem:[#allocation25_spill] sm:$0xff] %v4298_v6 }
 0x100   : > { %4785 = vst [vmem:[#allocation26_spill] sm:$0xff] %v4300_v12 }
 0x102   : > { %v671_v15 = vpop.f32.mrf.mxu2  ;;  %v917_v32 = vpop.f32.mrf.mxu0 }
 0x103   : > { %v4302_v24 = vadd.f32 %v671_v15, %v439_v37  ;;  %v690_v30 = vpop.f32.mrf.mxu3  ;;  %v960_v44 = vadd.f32 %v917_v32, %v627_v13  ;;  %v930_v45 = vpop.f32.mrf.mxu1 }
 0x104   : > { %v4304_v41 = vadd.f32 %v690_v30, %v440_v39  ;;  %v961_v55 = vadd.f32 %v930_v45, %v646_v18  ;;  %v665_v30 = vadd.f32 %v664_v26, %v439_v37 }
 0x105   : > { %4786 = vst [vmem:[#allocation27_spill] sm:$0xff] %v4302_v24  ;;  %v2938_v58 = vmul.f32 -1.442695, %v960_v44 }
 0x106   : > { %4787 = vst [vmem:[#allocation28_spill] sm:$0xff] %v4304_v41  ;;  %v2939_v63 = vmul.f32 -1.442695, %v961_v55 }
 0x107   : > { %3522 = vpow2.f32 %v2938_v58 }
 0x108   : > { %3524 = vpow2.f32 %v2939_v63 }
 0x10a   : > { %v943_v6 = vpop.f32.mrf.mxu2  ;;  %v919_v12 = vpop.f32.mrf.mxu0 }
 0x10b   : > { %v956_v7 = vpop.f32.mrf.mxu3  ;;  %v932_v25 = vpop.f32.mrf.mxu1  ;;  %v962_v45 = vadd.f32 %v943_v6, %v665_v30 }
 0x10c   : > { %v963_v19 = vadd.f32 %v956_v7, %v684_v0 }
 0x10d   : > { %v3523_v21 = vpop.eup %3522 }
 0x10e   : > { %v2940_v28 = vmul.f32 -1.442695, %v963_v19  ;;  %v3525_v15 = vpop.eup %3524  ;;  %v967_v24 = vadd.f32 1.0, %v3523_v21 }
 0x10f   : > { %v986_v59 = vadd.f32 1.0, %v3525_v15 }
 0x110   : > { %3526 = vpow2.f32 %v2940_v28  ;;  %v979_v0 = vand.u32 2147483648, %v967_v24  ;;  %v977_v25 = vand.u32 2147483647, %v967_v24  ;;  %vm973_vm2 = vweird.f32 %v967_v24 }
 0x111   : > { %3528 = vrcp.f32 %v967_v24  ;;  %v998_v7 = vand.u32 2147483648, %v986_v59  ;;  %v996_v28 = vand.u32 2147483647, %v986_v59  ;;  %vm992_vm3 = vweird.f32 %v986_v59 }
 0x112   : > { %3530 = vrcp.f32 %v986_v59  ;;  %v945_v13 = vpop.f32.mrf.mxu2  ;;  %v980_v6 = vor.u32 1.1754944e-38, %v979_v0  ;;  %vm978_vm6 = vcmp.eq.f32.partialorder %v977_v25, 8.507059e+37 }
 0x113   : > { %v958_v18 = vpop.f32.mrf.mxu3  ;;  %v999_v13 = vor.u32 1.1754944e-38, %v998_v7  ;;  %vm997_vm7 = vcmp.eq.f32.partialorder %v996_v28, 8.507059e+37 }
 0x114   : > { %v742_v18 = vld [vmem:[#allocation5 + $0x8] sm:$0xff] }
 0x116   : > { %v3527_v32 = vpop.eup %3526 }
 0x117   : > { %v3529_v44 = vpop.eup %3528  ;;  %v1006_v29 = vadd.f32 1.0, %v3527_v32 }
 0x118   : > { %v3531_v39 = vpop.eup %3530  ;;  %v969_v55 = vmul.f32 %v3529_v44, %v967_v24  ;;  %vm974_vm0 = vweird.f32 %v3529_v44 }
 0x119   : > { %v988_v12 = vmul.f32 %v3531_v39, %v986_v59  ;;  %3532 = vrcp.f32 %v1006_v29  ;;  %vm993_vm1 = vweird.f32 %v3531_v39  ;;  %vm975_vm4 = vmor %vm973_vm2, %vm974_vm0  ;;  %v1018_v0 = vand.u32 2147483648, %v1006_v29 }
 0x11a   : > { %v970_v58 = vsub.f32 1.0, %v969_v55  ;;  %3534 = vtanh.f32 %v962_v45  ;;  %vm994_vm5 = vmor %vm992_vm3, %vm993_vm1  ;;  %vm1012_vm9 = vweird.f32 %v1006_v29 }
 0x11b   : > { %v989_v63 = vsub.f32 1.0, %v988_v12  ;;  %v1019_v25 = vor.u32 1.1754944e-38, %v1018_v0 }
 0x11c   : > { %v971_v19 = vmul.f32 %v3529_v44, %v970_v58 }
 0x11d   : > { %v990_v21 = vmul.f32 %v3531_v39, %v989_v63 }
 0x11e   : > { %v972_v26 = vadd.f32 %v3529_v44, %v971_v19 }
 0x11f   : > { %v3533_v37 = vpop.eup %3532  ;;  %v991_v15 = vadd.f32 %v3531_v39, %v990_v21 }
 0x120   : > { %v976_v30 = vsel %vm975_vm4, %v3529_v44, %v972_v26  ;;  %v1008_v32 = vmul.f32 %v3533_v37, %v1006_v29  ;;  %v3535_v45 = vpop.eup %3534  ;;  %vm1013_vm8 = vweird.f32 %v3533_v37  ;;  %v1016_v44 = vand.u32 2147483647, %v1006_v29 }
 0x121   : > { %v981_v55 = vsel %vm978_vm6, %v980_v6, %v976_v30  ;;  %v995_v12 = vsel %vm994_vm5, %v3531_v39, %v991_v15  ;;  %vm1014_vm10 = vmor %vm1012_vm9, %vm1013_vm8 }
 0x122   : > { %v1000_v58 = vsel %vm997_vm7, %v999_v13, %v995_v12  ;;  %v1023_v63 = vmul.f32 %v3535_v45, %v981_v55  ;;  %v1009_v41 = vsub.f32 1.0, %v1008_v32  ;;  %vm1017_vm11 = vcmp.eq.f32.partialorder %v1016_v44, 8.507059e+37 }
 0x123   : > { %v1022_v19 = vmul.f32 %v1000_v58, %v742_v18 }
 0x124   : > { %v1010_v24 = vmul.f32 %v3533_v37, %v1009_v41 }
 0x125   : > { %v4306_v1 = vadd.f32 %v1023_v63, %v1022_v19 }
 0x126   : > { %v1011_v59 = vadd.f32 %v3533_v37, %v1010_v24 }
 0x127   : > { %3536 = vtanh.f32 %v4306_v1 }
 0x128   : > { %v1015_v7 = vsel %vm1014_vm10, %v3533_v37, %v1011_v59 }
 0x129   : > { %v1020_v21 = vsel %vm1017_vm11, %v1019_v25, %v1015_v7 }
 0x12d   : > { %v3537_v39 = vpop.eup %3536 }
 0x12e   : > { %v1026_v28 = vmul.f32 %v3537_v39, %v1020_v21  ;;  %v3362_v21 = vld [vmem:[#allocation11 + $0xec] sm:$0xf0] }
 0x130   : > { %v1029_v26 = vpack.c.bf16 %v1026_v28, %v1026_v28  ;;  %v3360_v28 = vld [vmem:[#allocation11 + $0xe4] sm:$0xf] }
 0x132   : > { %1030 = vst [vmem:[#allocation2] sm:$0xf] %v1029_v26  ;;  %1047 = vmatmul.bf16.vlgmr.msra.gmra.mxu0 %v1029_v26  ;;  %1060 = vmatmul.bf16.vlgmr.msra.gmra.mxu1 %v1029_v26 }
 0x133   : > { %1073 = vmatmul.bf16.vlgmr.msra.gmra.mxu2 %v1029_v26  ;;  %1086 = vmatmul.bf16.vlgmr.msra.gmra.mxu3 %v1029_v26 }
 0x134   : > { %1303 = vmatpush.bf16.msra.mxu0 %v4120_v38  ;;  %1316 = vmatpush.bf16.msra.mxu1 %v4122_v42 }
 0x135   : > { %1329 = vmatpush.bf16.msra.mxu2 %v4124_v48  ;;  %1342 = vmatpush.bf16.msra.mxu3 %v4127_v49 }
 0x138   : > { %1304 = vmatpush.bf16.msra.mxu0 %v4129_v50  ;;  %1317 = vmatpush.bf16.msra.mxu1 %v4132_v54 }
 0x139   : > { %1330 = vmatpush.bf16.msra.mxu2 %v4135_v60  ;;  %1343 = vmatpush.bf16.msra.mxu3 %v4139_v61 }
 0x13c   : > { %1305 = vmatpush.bf16.msra.mxu0 %v4141_v62  ;;  %1318 = vmatpush.bf16.msra.mxu1 %v4144_v2 }
 0x13d   : > { %1331 = vmatpush.bf16.msra.mxu2 %v4147_v8  ;;  %1344 = vmatpush.bf16.msra.mxu3 %v4151_v9 }
 0x140   : > { %1306 = vmatpush.bf16.msra.mxu0 %v4153_v10  ;;  %1319 = vmatpush.bf16.msra.mxu1 %v4156_v14 }
 0x141   : > { %1332 = vmatpush.bf16.msra.mxu2 %v4159_v20  ;;  %1345 = vmatpush.bf16.msra.mxu3 %v4165_v22 }
 0x144   : > { %1307 = vmatpush.bf16.msra.mxu0 %v4167_v23  ;;  %1320 = vmatpush.bf16.msra.mxu1 %v4170_v27 }
 0x145   : > { %1333 = vmatpush.bf16.msra.mxu2 %v4173_v33  ;;  %1346 = vmatpush.bf16.msra.mxu3 %v4177_v34 }
 0x148   : > { %1308 = vmatpush.bf16.msra.mxu0 %v4179_v35  ;;  %1321 = vmatpush.bf16.msra.mxu1 %v4182_v40 }
 0x149   : > { %1334 = vmatpush.bf16.msra.mxu2 %v4185_v47  ;;  %1347 = vmatpush.bf16.msra.mxu3 %v4189_v51 }
 0x14c   : > { %1309 = vmatpush.bf16.msra.mxu0 %v4191_v52  ;;  %1322 = vmatpush.bf16.msra.mxu1 %v4194_v57 }
 0x14d   : > { %1335 = vmatpush.bf16.msra.mxu2 %v4197_v3  ;;  %1348 = vmatpush.bf16.msra.mxu3 %v4201_v4 }
 0x150   : > { %1310 = vmatpush.bf16.msra.mxu0 %v4203_v5  ;;  %1323 = vmatpush.bf16.msra.mxu1 %v4206_v11 }
 0x151   : > { %1336 = vmatpush.bf16.msra.mxu2 %v4209_v16  ;;  %1349 = vmatpush.bf16.msra.mxu3 %v4213_v17 }
 0x1af   : > { %v1048_v38 = vpop.f32.mrf.mxu0  ;;  %v1061_v42 = vpop.f32.mrf.mxu1 }
 0x1b0   : > { %v1091_v48 = vadd.f32 %v1048_v38, %v4282_v31  ;;  %v1092_v49 = vadd.f32 %v1061_v42, %v4284_v36  ;;  %v3074_v38 = vld [vmem:[#allocation11 + $0xf0] sm:$0xf0]  ;;  %v3080_v42 = vld [vmem:[#allocation11 + $0xe8] sm:$0xf] }
 0x1b2   : > { %v2941_v50 = vmul.f32 -1.442695, %v1091_v48  ;;  %v2942_v54 = vmul.f32 -1.442695, %v1092_v49  ;;  %v3363_v48 = vld [vmem:[#allocation11 + $0xf4] sm:$0xf0] }
 0x1b4   : > { %3538 = vpow2.f32 %v2941_v50 }
 0x1b5   : > { %3540 = vpow2.f32 %v2942_v54  ;;  %v3077_v54 = vor.u32 %v3360_v28, %v3074_v38  ;;  %v3346_v38 = vld [vmem:[#allocation11 + $0x6c] sm:$0xf0] }
 0x1b6   : > { %v1074_v60 = vpop.f32.mrf.mxu2  ;;  %v1087_v61 = vpop.f32.mrf.mxu3 }
 0x1b7   : > { %v1094_v62 = vadd.f32 %v1087_v61, %v4288_v46  ;;  %v1050_v2 = vpop.f32.mrf.mxu0  ;;  %v1063_v8 = vpop.f32.mrf.mxu1  ;;  %v1093_v40 = vadd.f32 %v1074_v60, %v4286_v43  ;;  %v3081_v60 = vor.u32 %v3363_v48, %v3080_v42  ;;  %v3361_v61 = vld [vmem:[#allocation11 + $0xec] sm:$0xf] }
 0x1b9   : > { %v2943_v9 = vmul.f32 -1.442695, %v1094_v62  ;;  %v3082_v62 = vld [vmem:[#allocation11 + $0xf8] sm:$0xf0] }
 0x1ba   : > { %v3539_v10 = vpop.eup %3538 }
 0x1bb   : > { %v3541_v14 = vpop.eup %3540  ;;  %v1098_v20 = vadd.f32 1.0, %v3539_v10  ;;  %3542 = vpow2.f32 %v2943_v9  ;;  %v3085_v9 = vor.u32 %v3361_v61, %v3082_v62  ;;  %v3056_v10 = vld [vmem:[#allocation11 + $0xc0] sm:$0xf]  ;;  %v3016_v61 = vld [vmem:[#allocation11 + $0x68] sm:$0xf] }
 0x1bc   : > { %v1117_v22 = vadd.f32 1.0, %v3541_v14  ;;  %v3358_v14 = vld [vmem:[#allocation11 + $0xcc] sm:$0xf0]  ;;  %v3347_v62 = vld [vmem:[#allocation11 + $0x74] sm:$0xf0] }
 0x1bd   : > { %3544 = vrcp.f32 %v1098_v20  ;;  %v1110_v4 = vand.u32 2147483648, %v1098_v20  ;;  %v1108_v16 = vand.u32 2147483647, %v1098_v20  ;;  %vm1104_vm14 = vweird.f32 %v1098_v20 }
 0x1be   : > { %3546 = vrcp.f32 %v1117_v22  ;;  %v1076_v23 = vpop.f32.mrf.mxu2  ;;  %v1089_v27 = vpop.f32.mrf.mxu3  ;;  %v1129_v5 = vand.u32 2147483648, %v1117_v22  ;;  %v1127_v31 = vand.u32 2147483647, %v1117_v22  ;;  %vm1123_vm15 = vweird.f32 %v1117_v22 }
 0x1bf   : > { %v1111_v43 = vor.u32 1.1754944e-38, %v1110_v4  ;;  %vm1109_vm2 = vcmp.eq.f32.partialorder %v1108_v16, 8.507059e+37  ;;  %v3057_v27 = vor.u32 %v3358_v14, %v3056_v10  ;;  %v3042_v16 = vld [vmem:[#allocation11 + $0xb0] sm:$0xf0]  ;;  %v3017_v10 = vor.u32 %v3347_v62, %v3016_v61  ;;  %v3345_v14 = vld [vmem:[#allocation11 + $0x6c] sm:$0xf] }
 0x1c0   : > { %v1130_v37 = vor.u32 1.1754944e-38, %v1129_v5  ;;  %vm1128_vm3 = vcmp.eq.f32.partialorder %v1127_v31, 8.507059e+37  ;;  %v3355_v31 = vld [vmem:[#allocation11 + $0xb4] sm:$0xf0]  ;;  %v2970_v61 = vld [vmem:[#allocation11 + $0x18] sm:$0xf0] }
 0x1c1   : > { %v3543_v33 = vpop.eup %3542 }
 0x1c2   : > { %v1137_v34 = vadd.f32 1.0, %v3543_v33  ;;  %v3058_v33 = vld [vmem:[#allocation11 + $0xd0] sm:$0xf0] }
 0x1c3   : > { %v3545_v35 = vpop.eup %3544 }
 0x1c4   : > { %v3547_v47 = vpop.eup %3546  ;;  %v1100_v51 = vmul.f32 %v3545_v35, %v1098_v20  ;;  %3548 = vrcp.f32 %v1137_v34  ;;  %vm1105_vm12 = vweird.f32 %v3545_v35  ;;  %v1149_v19 = vand.u32 2147483648, %v1137_v34  ;;  %v3356_v20 = vld [vmem:[#allocation11 + $0xc4] sm:$0xf] }
 0x1c5   : > { %v1119_v52 = vmul.f32 %v3547_v47, %v1117_v22  ;;  %3550 = vtanh.f32 %v1093_v40  ;;  %vm1124_vm13 = vweird.f32 %v3547_v47  ;;  %vm1106_vm0 = vmor %vm1104_vm14, %vm1105_vm12  ;;  %vm1143_vm5 = vweird.f32 %v1137_v34  ;;  %v3359_v40 = vld [vmem:[#allocation11 + $0xd4] sm:$0xf0] }
 0x1c6   : > { %v1101_v57 = vsub.f32 1.0, %v1100_v51  ;;  %vm1125_vm1 = vmor %vm1123_vm15, %vm1124_vm13  ;;  %v1147_v24 = vand.u32 2147483647, %v1137_v34  ;;  %v1150_v0 = vor.u32 1.1754944e-38, %v1149_v19  ;;  %v3032_v19 = vld [vmem:[#allocation11 + $0x88] sm:$0xf] }
 0x1c7   : > { %v1120_v3 = vsub.f32 1.0, %v1119_v52  ;;  %v3040_v52 = vld [vmem:[#allocation11 + $0xa0] sm:$0xf] }
 0x1c8   : > { %v1102_v11 = vmul.f32 %v3545_v35, %v1101_v57  ;;  %vm1148_vm7 = vcmp.eq.f32.partialorder %v1147_v24, 8.507059e+37  ;;  %v3354_v57 = vld [vmem:[#allocation11 + $0xac] sm:$0xf0] }
 0x1c9   : > { %v1121_v17 = vmul.f32 %v3547_v47, %v1120_v3  ;;  %v3352_v3 = vld [vmem:[#allocation11 + $0xa4] sm:$0xf] }
 0x1ca   : > { %v3549_v36 = vpop.eup %3548  ;;  %v1103_v46 = vadd.f32 %v3545_v35, %v1102_v11  ;;  %v3041_v11 = vor.u32 %v3354_v57, %v3040_v52  ;;  %v3341_v57 = vld [vmem:[#allocation11 + $0x4c] sm:$0xf] }
 0x1cb   : > { %v1122_v41 = vadd.f32 %v3547_v47, %v1121_v17  ;;  %v1139_v29 = vmul.f32 %v3549_v36, %v1137_v34  ;;  %v3551_v15 = vpop.eup %3550  ;;  %vm1144_vm4 = vweird.f32 %v3549_v36  ;;  %v3061_v34 = vor.u32 %v3356_v20, %v3058_v33  ;;  %v3048_v17 = vld [vmem:[#allocation11 + $0xa8] sm:$0xf]  ;;  %v3018_v20 = vld [vmem:[#allocation11 + $0x78] sm:$0xf0]  ;;  %v3342_v33 = vld [vmem:[#allocation11 + $0x4c] sm:$0xf0] }
 0x1cc   : > { %v1107_v6 = vsel %vm1106_vm0, %v3545_v35, %v1103_v46  ;;  %vm1145_vm6 = vmor %vm1143_vm5, %vm1144_vm4  ;;  %v3064_v35 = vld [vmem:[#allocation11 + $0xc8] sm:$0xf] }
 0x1cd   : > { %v1112_v13 = vsel %vm1109_vm2, %v1111_v43, %v1107_v6  ;;  %v1126_v18 = vsel %vm1125_vm1, %v3547_v47, %v1122_v41  ;;  %v1140_v30 = vsub.f32 1.0, %v1139_v29  ;;  %v3357_v47 = vld [vmem:[#allocation11 + $0xcc] sm:$0xf]  ;;  %v3045_v29 = vor.u32 %v3352_v3, %v3042_v16  ;;  %v3002_v3 = vld [vmem:[#allocation11 + $0x58] sm:$0xf0] }
 0x1ce   : > { %v1131_v32 = vsel %vm1128_vm3, %v1130_v37, %v1126_v18  ;;  %v1154_v45 = vmul.f32 %v3551_v15, %v1112_v13  ;;  %v3049_v37 = vor.u32 %v3355_v31, %v3048_v17  ;;  %v3353_v6 = vld [vmem:[#allocation11 + $0xac] sm:$0xf]  ;;  %v3050_v15 = vld [vmem:[#allocation11 + $0xb8] sm:$0xf0]  ;;  %v3338_v17 = vld [vmem:[#allocation11 + $0x2c] sm:$0xf0] }
 0x1cf   : > { %v1153_v55 = vmul.f32 %v1131_v32, %v4306_v1  ;;  %v1141_v12 = vmul.f32 %v3549_v36, %v1140_v30  ;;  %v3072_v1 = vld [vmem:[#allocation11 + $0xe0] sm:$0xf]  ;;  %v3053_v13 = vor.u32 %v3353_v6, %v3050_v15  ;;  %v3350_v32 = vld [vmem:[#allocation11 + $0x8c] sm:$0xf0] }
 0x1d0   : > { %v3073_v26 = vor.u32 %v3362_v21, %v3072_v1  ;;  %v3024_v30 = vld [vmem:[#allocation11 + $0x80] sm:$0xf]  ;;  %v3034_v1 = vld [vmem:[#allocation11 + $0x98] sm:$0xf0] }
 0x1d1   : > { %v4346_v58 = vadd.f32 %v1154_v45, %v1153_v55  ;;  %v1142_v63 = vadd.f32 %v3549_v36, %v1141_v12  ;;  %v3025_v55 = vor.u32 %v3350_v32, %v3024_v30  ;;  %v3348_v12 = vld [vmem:[#allocation11 + $0x84] sm:$0xf]  ;;  %v3008_v21 = vld [vmem:[#allocation11 + $0x60] sm:$0xf] }
 0x1d2   : > { %v3009_v48 = vor.u32 %v3346_v38, %v3008_v21  ;;  %v3335_v38 = vld [vmem:[#allocation11 + $0x14] sm:$0xf0] }
 0x1d3   : > { %3552 = vtanh.f32 %v4346_v58  ;;  %v1146_v59 = vsel %vm1145_vm6, %v3549_v36, %v1142_v63  ;;  %v4788_v36 = vld [vmem:[#allocation24_spill] sm:$0xff]  ;;  %v3026_v63 = vld [vmem:[#allocation11 + $0x90] sm:$0xf0] }
 0x1d4   : > { %v1151_v7 = vsel %vm1148_vm7, %v1150_v0, %v1146_v59  ;;  %v3029_v0 = vor.u32 %v3348_v12, %v3026_v63  ;;  %v2986_v12 = vld [vmem:[#allocation11 + $0x38] sm:$0xf0] }
 0x1d9   : > { %v3553_v44 = vpop.eup %3552 }
 0x1da   : > { %v1157_v25 = vmul.f32 %v3553_v44, %v1151_v7  ;;  %v3351_v44 = vld [vmem:[#allocation11 + $0x94] sm:$0xf0] }
 0x1dc   : > { %v1160_v39 = vpack.c.bf16 %v1157_v25, %v1157_v25  ;;  %v3033_v25 = vor.u32 %v3351_v44, %v3032_v19  ;;  %v3334_v44 = vld [vmem:[#allocation11 + $0xc] sm:$0xf0] }
 0x1de   : > { %1162 = vst [vmem:[#allocation2 + $0x4] sm:$0xf] %v1160_v39  ;;  %1179 = vmatmul.bf16.vlgmr.msrb.gmra.mxu0 %v1160_v39  ;;  %1192 = vmatmul.bf16.vlgmr.msrb.gmra.mxu1 %v1160_v39 }
 0x1df   : > { %1205 = vmatmul.bf16.vlgmr.msrb.gmra.mxu2 %v1160_v39  ;;  %1218 = vmatmul.bf16.vlgmr.msrb.gmra.mxu3 %v1160_v39  ;;  %v3349_v39 = vld [vmem:[#allocation11 + $0x8c] sm:$0xf] }
 0x1e0   : > { %1646 = vmatpush.bf16.msrb.mxu0 %v3073_v26  ;;  %1665 = vmatpush.bf16.msrb.mxu1 %v3077_v54  ;;  %v3037_v42 = vor.u32 %v3349_v39, %v3034_v1 }
 0x1e1   : > { %1684 = vmatpush.bf16.msrb.mxu2 %v3081_v60  ;;  %1703 = vmatpush.bf16.msrb.mxu3 %v3085_v9 }
 0x1e4   : > { %1647 = vmatpush.bf16.msrb.mxu0 %v3057_v27  ;;  %1666 = vmatpush.bf16.msrb.mxu1 %v3061_v34  ;;  %v3021_v27 = vor.u32 %v3345_v14, %v3018_v20  ;;  %v3340_v34 = vld [vmem:[#allocation11 + $0x44] sm:$0xf] }
 0x1e8   : > { %1648 = vmatpush.bf16.msrb.mxu0 %v3041_v11  ;;  %1667 = vmatpush.bf16.msrb.mxu1 %v3045_v29  ;;  %v2978_v29 = vld [vmem:[#allocation11 + $0x30] sm:$0xf0] }
 0x1ec   : > { %1649 = vmatpush.bf16.msrb.mxu0 %v3025_v55  ;;  %1668 = vmatpush.bf16.msrb.mxu1 %v3029_v0  ;;  %v3337_v55 = vld [vmem:[#allocation11 + $0x2c] sm:$0xf]  ;;  %v2960_v0 = vld [vmem:[#allocation11] sm:$0xf] }
 0x1ed   : > { %v2961_v21 = vor.u32 %v3334_v44, %v2960_v0 }
 0x1f0   : > { %1650 = vmatpush.bf16.msrb.mxu0 %v3009_v48 }
 0x25b   : > { %v1180_v49 = vpop.f32.mrf.mxu0  ;;  %v1193_v50 = vpop.f32.mrf.mxu1 }
 0x25c   : > { %v1223_v2 = vadd.f32 %v1180_v49, %v4290_v53  ;;  %v1224_v8 = vadd.f32 %v1193_v50, %v4292_v56  ;;  %v3065_v53 = vor.u32 %v3359_v40, %v3064_v35  ;;  %v3066_v56 = vld [vmem:[#allocation11 + $0xd8] sm:$0xf0]  ;;  %v3344_v49 = vld [vmem:[#allocation11 + $0x64] sm:$0xf]  ;;  %v3010_v50 = vld [vmem:[#allocation11 + $0x70] sm:$0xf0] }
 0x25d   : > { %v3069_v51 = vor.u32 %v3357_v47, %v3066_v56  ;;  %v3013_v60 = vor.u32 %v3344_v49, %v3010_v50  ;;  %v2994_v47 = vld [vmem:[#allocation11 + $0x50] sm:$0xf0]  ;;  %v3343_v56 = vld [vmem:[#allocation11 + $0x54] sm:$0xf0] }
 0x25e   : > { %v2944_v22 = vmul.f32 -1.442695, %v1223_v2  ;;  %v2945_v23 = vmul.f32 -1.442695, %v1224_v8  ;;  %1685 = vmatpush.bf16.msrb.mxu2 %v3065_v53  ;;  %v4789_v8 = vld [vmem:[#allocation23_spill] sm:$0xff] }
 0x25f   : > { %1704 = vmatpush.bf16.msrb.mxu3 %v3069_v51  ;;  %1669 = vmatpush.bf16.msrb.mxu1 %v3013_v60  ;;  %v3000_v53 = vld [vmem:[#allocation11 + $0x48] sm:$0xf]  ;;  %v3333_v60 = vld [vmem:[#allocation11 + $0xc] sm:$0xf] }
 0x260   : > { %3554 = vpow2.f32 %v2944_v22  ;;  %v2992_v22 = vld [vmem:[#allocation11 + $0x40] sm:$0xf]  ;;  %v2973_v14 = vor.u32 %v3333_v60, %v2970_v61  ;;  %v3194_v60 = vld [vmem:[#allocation12 + $0x1d8] sm:$0xf0] }
 0x261   : > { %3556 = vpow2.f32 %v2945_v23  ;;  %v2993_v40 = vor.u32 %v3342_v33, %v2992_v22 }
 0x262   : > { %v1206_v4 = vpop.f32.mrf.mxu2  ;;  %v1219_v5 = vpop.f32.mrf.mxu3  ;;  %1686 = vmatpush.bf16.msrb.mxu2 %v3049_v37 }
 0x263   : > { %v1226_v46 = vadd.f32 %v1219_v5, %v4788_v36  ;;  %v1182_v43 = vpop.f32.mrf.mxu0  ;;  %v1195_v41 = vpop.f32.mrf.mxu1  ;;  %1705 = vmatpush.bf16.msrb.mxu3 %v3053_v13  ;;  %v1225_v9 = vadd.f32 %v1206_v4, %v4789_v8  ;;  %v2976_v4 = vld [vmem:[#allocation11 + $0x20] sm:$0xf]  ;;  %1651 = vmatpush.bf16.msrb.mxu0 %v2993_v40  ;;  %v2997_v36 = vor.u32 %v3340_v34, %v2994_v47 }
 0x264   : > { %v3005_v43 = vor.u32 %v3341_v57, %v3002_v3  ;;  %v3336_v41 = vld [vmem:[#allocation11 + $0x24] sm:$0xf]  ;;  %v2977_v13 = vor.u32 %v3338_v17, %v2976_v4  ;;  %v3330_v57 = vld [vmem:[#allocation2] sm:$0xff] }
 0x265   : > { %v2946_v18 = vmul.f32 -1.442695, %v1226_v46  ;;  %v3001_v46 = vor.u32 %v3343_v56, %v3000_v53  ;;  %1670 = vmatpush.bf16.msrb.mxu1 %v2997_v36  ;;  %v2981_v32 = vor.u32 %v3336_v41, %v2978_v29  ;;  %v4792_v4 = vld [vmem:[#allocation25_spill] sm:$0xff]  ;;  %v3394_v41 = vld [vmem:[#allocation12 + $0x1ec] sm:$0xf0] }
 0x266   : > { %v3555_v45 = vpop.eup %3554  ;;  %1687 = vmatpush.bf16.msrb.mxu2 %v3033_v25  ;;  %v3332_v25 = vld [vmem:[#allocation11 + $0x4] sm:$0xf] }
 0x267   : > { %v3557_v24 = vpop.eup %3556  ;;  %v4352_v59 = vadd.f32 1.0, %v3555_v45  ;;  %3558 = vpow2.f32 %v2946_v18  ;;  %1706 = vmatpush.bf16.msrb.mxu3 %v3037_v42  ;;  %v2984_v18 = vld [vmem:[#allocation11 + $0x28] sm:$0xf]  ;;  %v3339_v45 = vld [vmem:[#allocation11 + $0x34] sm:$0xf0]  ;;  %1652 = vmatpush.bf16.msrb.mxu0 %v2977_v13 }
 0x268   : > { %v4354_v7 = vadd.f32 1.0, %v3557_v24  ;;  %v2985_v19 = vor.u32 %v3339_v45, %v2984_v18  ;;  %v2989_v24 = vor.u32 %v3337_v55, %v2986_v12  ;;  %v3392_v29 = vld [vmem:[#allocation12 + $0x1e4] sm:$0xf]  ;;  %v3395_v45 = vld [vmem:[#allocation12 + $0x1f4] sm:$0xf0] }
 0x269   : > { %3560 = vrcp.f32 %v4352_v59  ;;  %v1240_v54 = vand.u32 2147483647, %v4352_v59  ;;  %v1242_v16 = vand.u32 2147483648, %v4352_v59  ;;  %vm1236_vm12 = vweird.f32 %v4352_v59  ;;  %1671 = vmatpush.bf16.msrb.mxu1 %v2981_v32  ;;  %v3208_v32 = vld [vmem:[#allocation12 + $0x1e8] sm:$0xf] }
 0x26a   : > { %3562 = vrcp.f32 %v4354_v7  ;;  %v1208_v28 = vpop.f32.mrf.mxu2  ;;  %v1221_v26 = vpop.f32.mrf.mxu3  ;;  %1688 = vmatpush.bf16.msrb.mxu2 %v3017_v10  ;;  %v1261_v11 = vand.u32 2147483648, %v4354_v7  ;;  %v1259_v15 = vand.u32 2147483647, %v4354_v7  ;;  %vm1255_vm11 = vweird.f32 %v4354_v7 }
 0x26b   : > { %1707 = vmatpush.bf16.msrb.mxu3 %v3021_v27  ;;  %vm4373_vm8 = vcmp.eq.f32.partialorder %v1240_v54, 8.507059e+37  ;;  %v2962_v28 = vld [vmem:[#allocation11 + $0x10] sm:$0xf0]  ;;  %v2968_v26 = vld [vmem:[#allocation11 + $0x8] sm:$0xf]  ;;  %v1243_v49 = vor.u32 1.1754944e-38, %v1242_v16  ;;  %1653 = vmatpush.bf16.msrb.mxu0 %v2961_v21  ;;  %v4411_v12 = vor.u32 %v3395_v45, %v3208_v32 }
 0x26c   : > { %v1262_v48 = vor.u32 1.1754944e-38, %v1261_v11  ;;  %vm1260_vm15 = vcmp.eq.f32.partialorder %v1259_v15, 8.507059e+37  ;;  %v2965_v62 = vor.u32 %v3332_v25, %v2962_v28  ;;  %v4793_v11 = vld [vmem:[#allocation26_spill] sm:$0xff]  ;;  %v3184_v25 = vld [vmem:[#allocation12 + $0x1c0] sm:$0xf] }
 0x26d   : > { %v3559_v2 = vpop.eup %3558  ;;  %v3136_v45 = vld [vmem:[#allocation12 + $0x160] sm:$0xf] }
 0x26e   : > { %v4360_v23 = vadd.f32 1.0, %v3559_v2  ;;  %1689 = vmatpush.bf16.msrb.mxu2 %v3001_v46  ;;  %v2969_v2 = vor.u32 %v3335_v38, %v2968_v26  ;;  %1672 = vmatpush.bf16.msrb.mxu1 %v2965_v62  ;;  %v3186_v38 = vld [vmem:[#allocation12 + $0x1d0] sm:$0xf0]  ;;  %v3168_v62 = vld [vmem:[#allocation12 + $0x1a0] sm:$0xf] }
 0x26f   : > { %v4362_v35 = vpop.eup %3560  ;;  %1708 = vmatpush.bf16.msrb.mxu3 %v3005_v43  ;;  %v3200_v43 = vld [vmem:[#allocation12 + $0x1e0] sm:$0xf] }
 0x270   : > { %v4364_v51 = vpop.eup %3562  ;;  %v1232_v52 = vmul.f32 %v4362_v35, %v4352_v59  ;;  %3564 = vrcp.f32 %v4360_v23  ;;  %vm1237_vm9 = vweird.f32 %v4362_v35  ;;  %vm1275_vm1 = vweird.f32 %v4360_v23 }
 0x271   : > { %v1251_v5 = vmul.f32 %v4364_v51, %v4354_v7  ;;  %3566 = vtanh.f32 %v1225_v9  ;;  %vm1256_vm10 = vweird.f32 %v4364_v51  ;;  %vm1238_vm13 = vmor %vm1236_vm12, %vm1237_vm9  ;;  %v1279_v40 = vand.u32 2147483647, %v4360_v23 }
 0x272   : > { %v1233_v31 = vsub.f32 1.0, %v1232_v52  ;;  %vm1257_vm14 = vmor %vm1255_vm11, %vm1256_vm10  ;;  %1690 = vmatpush.bf16.msrb.mxu2 %v2985_v19  ;;  %v4407_v18 = vor.u32 %v3394_v41, %v3200_v43  ;;  %v3210_v19 = vld [vmem:[#allocation12 + $0x1f8] sm:$0xf0]  ;;  %v3383_v43 = vld [vmem:[#allocation12 + $0x194] sm:$0xf0] }
 0x273   : > { %v1252_v37 = vsub.f32 1.0, %v1251_v5  ;;  %1709 = vmatpush.bf16.msrb.mxu3 %v2989_v24  ;;  %vm1280_vm3 = vcmp.eq.f32.partialorder %v1279_v40, 8.507059e+37  ;;  %v3381_v41 = vld [vmem:[#allocation12 + $0x18c] sm:$0xf] }
 0x274   : > { %v1234_v30 = vmul.f32 %v4362_v35, %v1233_v31 }
 0x275   : > { %v1253_v63 = vmul.f32 %v4364_v51, %v1252_v37  ;;  %v4794_v37 = vld [vmem:[#allocation28_spill] sm:$0xff] }
 0x276   : > { %v3565_v39 = vpop.eup %3564  ;;  %v1235_v1 = vadd.f32 %v4362_v35, %v1234_v30  ;;  %1691 = vmatpush.bf16.msrb.mxu2 %v2969_v2  ;;  %v3202_v30 = vld [vmem:[#allocation12 + $0x1f0] sm:$0xf0] }
 0x277   : > { %v3567_v42 = vpop.eup %3566  ;;  %v1254_v50 = vadd.f32 %v4364_v51, %v1253_v63  ;;  %v1271_v54 = vmul.f32 %v3565_v39, %v4360_v23  ;;  %1710 = vmatpush.bf16.msrb.mxu3 %v2973_v14  ;;  %vm1276_vm0 = vweird.f32 %v3565_v39  ;;  %v4409_v55 = vor.u32 %v3392_v29, %v3202_v30  ;;  %v3393_v63 = vld [vmem:[#allocation12 + $0x1ec] sm:$0xf]  ;;  %v3384_v14 = vld [vmem:[#allocation12 + $0x1a4] sm:$0xf]  ;;  %v3162_v29 = vld [vmem:[#allocation12 + $0x198] sm:$0xf0] }
 0x278   : > { %v1239_v59 = vsel %vm1238_vm13, %v4362_v35, %v1235_v1  ;;  %v1281_v35 = vand.u32 2147483648, %v4360_v23  ;;  %vm1277_vm2 = vmor %vm1275_vm1, %vm1276_vm0  ;;  %v4414_v0 = vor.u32 %v3393_v63, %v3210_v19  ;;  %v3388_v1 = vld [vmem:[#allocation12 + $0x1c4] sm:$0xf]  ;;  %v4473_v32 = vor.u32 %v3381_v41, %v3162_v29  ;;  %v3378_v63 = vld [vmem:[#allocation12 + $0x16c] sm:$0xf0] }
 0x279   : > { %v1244_v8 = vsel %vm4373_vm8, %v1243_v49, %v1239_v59  ;;  %v1258_v9 = vsel %vm1257_vm14, %v4364_v51, %v1254_v50  ;;  %v1272_v10 = vsub.f32 1.0, %v1271_v54  ;;  %v4425_v49 = vor.u32 %v3388_v1, %v3186_v38  ;;  %v3391_v50 = vld [vmem:[#allocation12 + $0x1d4] sm:$0xf0]  ;;  %v3389_v54 = vld [vmem:[#allocation12 + $0x1cc] sm:$0xf] }
 0x27a   : > { %v1263_v20 = vsel %vm1260_vm15, %v1262_v48, %v1258_v9  ;;  %v1286_v22 = vmul.f32 %v3567_v42, %v1244_v8  ;;  %v1282_v53 = vor.u32 1.1754944e-38, %v1281_v35  ;;  %v3192_v42 = vld [vmem:[#allocation12 + $0x1c8] sm:$0xf]  ;;  %v4434_v9 = vor.u32 %v3389_v54, %v3194_v60  ;;  %v3376_v1 = vld [vmem:[#allocation12 + $0x164] sm:$0xf] }
 0x27b   : > { %v1285_v7 = vmul.f32 %v1263_v20, %v4346_v58  ;;  %v1273_v27 = vmul.f32 %v3565_v39, %v1272_v10  ;;  %v4432_v8 = vor.u32 %v3391_v50, %v3192_v42  ;;  %v3386_v10 = vld [vmem:[#allocation12 + $0x1ac] sm:$0xf0]  ;;  %v3144_v38 = vld [vmem:[#allocation12 + $0x168] sm:$0xf]  ;;  %v3379_v42 = vld [vmem:[#allocation12 + $0x174] sm:$0xf0]  ;;  %v4492_v54 = vor.u32 %v3378_v63, %v3136_v45 }
 0x27c   : > { %v4440_v40 = vor.u32 %v3386_v10, %v3168_v62  ;;  %v3120_v62 = vld [vmem:[#allocation12 + $0x140] sm:$0xf]  ;;  %v3106_v63 = vld [vmem:[#allocation12 + $0x130] sm:$0xf0] }
 0x27d   : > { %v4398_v33 = vadd.f32 %v1286_v22, %v1285_v7  ;;  %v1274_v34 = vadd.f32 %v3565_v39, %v1273_v27  ;;  %v3170_v22 = vld [vmem:[#allocation12 + $0x1b0] sm:$0xf0]  ;;  %v3176_v7 = vld [vmem:[#allocation12 + $0x1a8] sm:$0xf] }
 0x27f   : > { %3568 = vtanh.f32 %v4398_v33  ;;  %v1278_v47 = vsel %vm1277_vm2, %v3565_v39, %v1274_v34  ;;  %v3390_v39 = vld [vmem:[#allocation12 + $0x1cc] sm:$0xf0] }
 0x280   : > { %v1283_v56 = vsel %vm1280_vm3, %v1282_v53, %v1278_v47  ;;  %v4421_v26 = vor.u32 %v3390_v39, %v3184_v25  ;;  %v4795_v34 = vld [vmem:[#allocation27_spill] sm:$0xff]  ;;  %v4442_v47 = vor.u32 %v3384_v14, %v3170_v22  ;;  %v3387_v53 = vld [vmem:[#allocation12 + $0x1b4] sm:$0xf0]  ;;  %v4499_v14 = vor.u32 %v3379_v42, %v3144_v38  ;;  %v3088_v38 = vld [vmem:[#allocation12 + $0x100] sm:$0xf] }
 0x281   : > { %v3374_v22 = vld [vmem:[#allocation12 + $0x14c] sm:$0xf0] }
 0x285   : > { %v3569_v58 = vpop.eup %3568 }
 0x286   : > { %v1289_v51 = vmul.f32 %v3569_v58, %v1283_v56  ;;  %v3385_v58 = vld [vmem:[#allocation12 + $0x1ac] sm:$0xf]  ;;  %v3178_v56 = vld [vmem:[#allocation12 + $0x1b8] sm:$0xf0] }
 0x288   : > { %v1292_v52 = vpack.c.bf16 %v1289_v51, %v1289_v51 }
 0x28a   : > { %1294 = vst [vmem:[#allocation2 + $0x8] sm:$0xf] %v1292_v52  ;;  %1311 = vmatmul.bf16.vlgmr.msra.gmra.mxu0 %v1292_v52  ;;  %1324 = vmatmul.bf16.vlgmr.msra.gmra.mxu1 %v1292_v52 }
 0x28b   : > { %1337 = vmatmul.bf16.vlgmr.msra.gmra.mxu2 %v1292_v52  ;;  %1350 = vmatmul.bf16.vlgmr.msra.gmra.mxu3 %v1292_v52 }
 0x28c   : > { %1940 = vmatpush.bf16.msra.mxu0 %v4407_v18  ;;  %1953 = vmatpush.bf16.msra.mxu1 %v4409_v55 }
 0x28d   : > { %1966 = vmatpush.bf16.msra.mxu2 %v4411_v12  ;;  %1979 = vmatpush.bf16.msra.mxu3 %v4414_v0 }
 0x290   : > { %1941 = vmatpush.bf16.msra.mxu0 %v4421_v26  ;;  %1954 = vmatpush.bf16.msra.mxu1 %v4425_v49 }
 0x291   : > { %1967 = vmatpush.bf16.msra.mxu2 %v4432_v8  ;;  %1980 = vmatpush.bf16.msra.mxu3 %v4434_v9 }
 0x294   : > { %1942 = vmatpush.bf16.msra.mxu0 %v4440_v40  ;;  %1955 = vmatpush.bf16.msra.mxu1 %v4442_v47 }
 0x29a   : > { %1654 = vmatmul.bf16.vlgmr.msrb.gmra.mxu0 %v3330_v57  ;;  %1673 = vmatmul.bf16.vlgmr.msrb.gmra.mxu1 %v3330_v57 }
 0x29b   : > { %1692 = vmatmul.bf16.vlgmr.msrb.gmra.mxu2 %v3330_v57  ;;  %1711 = vmatmul.bf16.vlgmr.msrb.gmra.mxu3 %v3330_v57  ;;  %v4447_v57 = vor.u32 %v3387_v53, %v3176_v7  ;;  %v3372_v7 = vld [vmem:[#allocation12 + $0x144] sm:$0xf] }
 0x29d   : > { %1968 = vmatpush.bf16.msra.mxu2 %v4447_v57 }
 0x307   : > { %v1312_v3 = vpop.f32.mrf.mxu0  ;;  %v1325_v23 = vpop.f32.mrf.mxu1 }
 0x308   : > { %v1355_v5 = vadd.f32 %v1312_v3, %v4792_v4  ;;  %v1356_v16 = vadd.f32 %v1325_v23, %v4793_v11  ;;  %v4449_v3 = vor.u32 %v3385_v58, %v3178_v56  ;;  %v3152_v23 = vld [vmem:[#allocation12 + $0x180] sm:$0xf]  ;;  %v3382_v4 = vld [vmem:[#allocation12 + $0x18c] sm:$0xf0]  ;;  %v4508_v58 = vor.u32 %v3374_v22, %v3120_v62  ;;  %v3128_v56 = vld [vmem:[#allocation12 + $0x148] sm:$0xf] }
 0x309   : > { %v4455_v11 = vor.u32 %v3382_v4, %v3152_v23  ;;  %v3373_v23 = vld [vmem:[#allocation12 + $0x14c] sm:$0xf]  ;;  %v3096_v62 = vld [vmem:[#allocation12 + $0x108] sm:$0xf]  ;;  %v3367_v22 = vld [vmem:[#allocation12 + $0x114] sm:$0xf0] }
 0x30a   : > { %v2947_v17 = vmul.f32 -1.442695, %v1355_v5  ;;  %v2948_v31 = vmul.f32 -1.442695, %v1356_v16  ;;  %v3380_v16 = vld [vmem:[#allocation12 + $0x184] sm:$0xf]  ;;  %1981 = vmatpush.bf16.msra.mxu3 %v4449_v3 }
 0x30b   : > { %1943 = vmatpush.bf16.msra.mxu0 %v4455_v11 }
 0x30c   : > { %3570 = vpow2.f32 %v2947_v17  ;;  %v3154_v17 = vld [vmem:[#allocation12 + $0x190] sm:$0xf0] }
 0x30d   : > { %3572 = vpow2.f32 %v2948_v31  ;;  %v3160_v31 = vld [vmem:[#allocation12 + $0x188] sm:$0xf] }
 0x30e   : > { %v1338_v36 = vpop.f32.mrf.mxu2  ;;  %v1351_v46 = vpop.f32.mrf.mxu3  ;;  %v4471_v30 = vor.u32 %v3383_v43, %v3160_v31  ;;  %1982 = vmatpush.bf16.msra.mxu3 %v4473_v32  ;;  %v3130_v31 = vld [vmem:[#allocation12 + $0x158] sm:$0xf0] }
 0x30f   : > { %v1358_v6 = vadd.f32 %v1351_v46, %v4794_v37  ;;  %v1314_v15 = vpop.f32.mrf.mxu0  ;;  %v1327_v13 = vpop.f32.mrf.mxu1  ;;  %v1357_v35 = vadd.f32 %v1338_v36, %v4795_v34  ;;  %1944 = vmatpush.bf16.msra.mxu0 %v4492_v54 }
 0x310   : > { %v4469_v13 = vor.u32 %v3380_v16, %v3154_v17  ;;  %1969 = vmatpush.bf16.msra.mxu2 %v4471_v30 }
 0x311   : > { %v2949_v24 = vmul.f32 -1.442695, %v1358_v6 }
 0x312   : > { %v3571_v44 = vpop.eup %3570  ;;  %1956 = vmatpush.bf16.msra.mxu1 %v4469_v13 }
 0x313   : > { %v3573_v21 = vpop.eup %3572  ;;  %v4418_v28 = vadd.f32 1.0, %v3571_v44  ;;  %3574 = vpow2.f32 %v2949_v24  ;;  %v3371_v44 = vld [vmem:[#allocation12 + $0x134] sm:$0xf0]  ;;  %1945 = vmatpush.bf16.msra.mxu0 %v4508_v58 }
 0x314   : > { %v4423_v48 = vadd.f32 1.0, %v3573_v21  ;;  %1970 = vmatpush.bf16.msra.mxu2 %v4499_v14 }
 0x315   : > { %3576 = vrcp.f32 %v4418_v28  ;;  %v1372_v2 = vand.u32 2147483647, %v4418_v28  ;;  %v1374_v20 = vand.u32 2147483648, %v4418_v28  ;;  %vm1368_vm5 = vweird.f32 %v4418_v28 }
 0x316   : > { %3578 = vrcp.f32 %v4423_v48  ;;  %v1340_v61 = vpop.f32.mrf.mxu2  ;;  %v1353_v59 = vpop.f32.mrf.mxu3  ;;  %v1393_v51 = vand.u32 2147483648, %v4423_v48  ;;  %v1391_v6 = vand.u32 2147483647, %v4423_v48  ;;  %vm1387_vm9 = vweird.f32 %v4423_v48 }
 0x317   : > { %vm4481_vm7 = vcmp.eq.f32.partialorder %v1372_v2, 8.507059e+37  ;;  %v1375_v39 = vor.u32 1.1754944e-38, %v1374_v20  ;;  %v3377_v61 = vld [vmem:[#allocation12 + $0x16c] sm:$0xf]  ;;  %v3146_v59 = vld [vmem:[#allocation12 + $0x178] sm:$0xf0] }
 0x318   : > { %v1394_v24 = vor.u32 1.1754944e-38, %v1393_v51  ;;  %v4501_v20 = vor.u32 %v3377_v61, %v3146_v59  ;;  %v3375_v51 = vld [vmem:[#allocation12 + $0x154] sm:$0xf0]  ;;  %vm1392_vm11 = vcmp.eq.f32.partialorder %v1391_v6, 8.507059e+37  ;;  %v3368_v6 = vld [vmem:[#allocation12 + $0x124] sm:$0xf] }
 0x319   : > { %v3575_v27 = vpop.eup %3574  ;;  %v4522_v17 = vor.u32 %v3375_v51, %v3128_v56  ;;  %v3364_v61 = vld [vmem:[#allocation12 + $0x104] sm:$0xf]  ;;  %v3090_v59 = vld [vmem:[#allocation12 + $0x110] sm:$0xf0]  ;;  %v4560_v51 = vor.u32 %v3367_v22, %v3096_v62 }
 0x31a   : > { %v4445_v52 = vadd.f32 1.0, %v3575_v27  ;;  %v3122_v27 = vld [vmem:[#allocation12 + $0x150] sm:$0xf0]  ;;  %1983 = vmatpush.bf16.msra.mxu3 %v4501_v20  ;;  %v4556_v56 = vor.u32 %v3364_v61, %v3090_v59 }
 0x31b   : > { %v4451_v5 = vpop.eup %3576  ;;  %v4520_v16 = vor.u32 %v3372_v7, %v3122_v27  ;;  %1971 = vmatpush.bf16.msra.mxu2 %v4522_v17  ;;  %v3365_v7 = vld [vmem:[#allocation12 + $0x10c] sm:$0xf]  ;;  %v3098_v27 = vld [vmem:[#allocation12 + $0x118] sm:$0xf0] }
 0x31c   : > { %v4457_v36 = vpop.eup %3578  ;;  %v1364_v46 = vmul.f32 %v4451_v5, %v4418_v28  ;;  %vm1369_vm4 = vweird.f32 %v4451_v5  ;;  %3580 = vrcp.f32 %v4445_v52  ;;  %v3138_v28 = vld [vmem:[#allocation12 + $0x170] sm:$0xf0]  ;;  %vm1407_vm13 = vweird.f32 %v4445_v52 }
 0x31d   : > { %v1383_v37 = vmul.f32 %v4457_v36, %v4423_v48  ;;  %3582 = vtanh.f32 %v1357_v35  ;;  %vm4477_vm6 = vmor %vm1368_vm5, %vm1369_vm4  ;;  %vm1388_vm8 = vweird.f32 %v4457_v36  ;;  %v4494_v60 = vor.u32 %v3376_v1, %v3138_v28  ;;  %v3369_v1 = vld [vmem:[#allocation12 + $0x12c] sm:$0xf] }
 0x31e   : > { %v1365_v15 = vsub.f32 1.0, %v1364_v46  ;;  %vm4512_vm10 = vmor %vm1387_vm9, %vm1388_vm8  ;;  %v3104_v46 = vld [vmem:[#allocation12 + $0x120] sm:$0xf]  ;;  %v4539_v28 = vor.u32 %v3368_v6, %v3106_v63  ;;  %v1674_v6 = vpop.f32.mrf.mxu1 }
 0x31f   : > { %v1384_v19 = vsub.f32 1.0, %v1383_v37  ;;  %1957 = vmatpush.bf16.msra.mxu1 %v4494_v60  ;;  %v3370_v37 = vld [vmem:[#allocation12 + $0x12c] sm:$0xf0] }
 0x320   : > { %v1366_v21 = vmul.f32 %v4451_v5, %v1365_v15 }
 0x321   : > { %v1385_v50 = vmul.f32 %v4457_v36, %v1384_v19  ;;  %v3112_v19 = vld [vmem:[#allocation12 + $0x128] sm:$0xf] }
 0x322   : > { %v4496_v2 = vpop.eup %3580  ;;  %v1367_v10 = vadd.f32 %v4451_v5, %v1366_v21  ;;  %v3114_v21 = vld [vmem:[#allocation12 + $0x138] sm:$0xf0] }
 0x323   : > { %v3583_v34 = vpop.eup %3582  ;;  %v1386_v35 = vadd.f32 %v4457_v36, %v1385_v50  ;;  %v1403_v53 = vmul.f32 %v4496_v2, %v4445_v52  ;;  %1958 = vmatpush.bf16.msra.mxu1 %v4520_v16  ;;  %v4545_v50 = vor.u32 %v3369_v1, %v3114_v21  ;;  %vm1408_vm12 = vweird.f32 %v4496_v2 }
 0x324   : > { %v1371_v48 = vsel %vm4477_vm6, %v4451_v5, %v1367_v10  ;;  %v4531_v5 = vor.u32 %v3373_v23, %v3130_v31  ;;  %vm1409_vm14 = vmor %vm1407_vm13, %vm1408_vm12  ;;  %v4562_v23 = vor.u32 %v3365_v7, %v3098_v27 }
 0x325   : > { %v1376_v43 = vsel %vm4481_vm7, %v1375_v39, %v1371_v48  ;;  %v1390_v41 = vsel %vm4512_vm10, %v4457_v36, %v1386_v35  ;;  %v1404_v29 = vsub.f32 1.0, %v1403_v53  ;;  %v4536_v36 = vor.u32 %v3370_v37, %v3104_v46  ;;  %v1655_v37 = vpop.f32.mrf.mxu0 }
 0x326   : > { %v1395_v15 = vsel %vm1392_vm11, %v1394_v24, %v1390_v41  ;;  %v1418_v45 = vmul.f32 %v3583_v34, %v1376_v43  ;;  %v3366_v24 = vld [vmem:[#allocation12 + $0x10c] sm:$0xf0]  ;;  %1984 = vmatpush.bf16.msra.mxu3 %v4531_v5  ;;  %v1413_v34 = vand.u32 2147483648, %v4445_v52  ;;  %v1411_v53 = vand.u32 2147483647, %v4445_v52  ;;  %v1772_v41 = vld [vmem:[#allocation4 + $0x8] sm:$0xff] }
 0x327   : > { %v1417_v25 = vmul.f32 %v1395_v15, %v4398_v33  ;;  %v1405_v39 = vmul.f32 %v4496_v2, %v1404_v29  ;;  %v4543_v33 = vor.u32 %v3371_v44, %v3112_v19  ;;  %1946 = vmatpush.bf16.msra.mxu0 %v4536_v36  ;;  %v4551_v35 = vor.u32 %v3366_v24, %v3088_v38  ;;  %v1693_v15 = vpop.f32.mrf.mxu2  ;;  %v4635_v19 = vpop.f32.mrf.mxu1  ;;  %v1464_v24 = vld [vmem:[#allocation14 + $0x4] sm:$0xf] }
 0x328   : > { %1959 = vmatpush.bf16.msra.mxu1 %v4539_v28  ;;  %v1414_v48 = vor.u32 1.1754944e-38, %v1413_v34  ;;  %vm1412_vm15 = vcmp.eq.f32.partialorder %v1411_v53, 8.507059e+37  ;;  %v1779_v29 = vpack.c.bf16 %v1772_v41, %v1772_v41  ;;  %v4653_v59 = vperm.slane %v1464_v24, 0 }
 0x329   : > { %v1419_v42 = vadd.f32 %v1418_v45, %v1417_v25  ;;  %v1406_v10 = vadd.f32 %v4496_v2, %v1405_v39  ;;  %1972 = vmatpush.bf16.msra.mxu2 %v4543_v33  ;;  %v1712_v45 = vpop.f32.mrf.mxu3  ;;  %v4655_v62 = vperm.slane %v1464_v24, 1 }
 0x32a   : > { %1985 = vmatpush.bf16.msra.mxu3 %v4545_v50 }
 0x32b   : > { %3584 = vtanh.f32 %v1419_v42  ;;  %1422 = vst [vmem:[#allocation5 + $0x8] sm:$0xff] %v1419_v42  ;;  %v1410_v4 = vsel %vm1409_vm14, %v4496_v2, %v1406_v10  ;;  %1947 = vmatpush.bf16.msra.mxu0 %v4551_v35  ;;  %v1656_v10 = vadd.f32 %v1655_v37, %v4653_v59  ;;  %v1675_v22 = vadd.f32 %v1674_v6, %v4655_v62 }
 0x32c   : > { %1960 = vmatpush.bf16.msra.mxu1 %v4556_v56  ;;  %v1415_v31 = vsel %vm1412_vm15, %v1414_v48, %v1410_v4 }
 0x32d   : > { %1973 = vmatpush.bf16.msra.mxu2 %v4560_v51  ;;  %v4633_v63 = vpop.f32.mrf.mxu0 }
 0x32e   : > { %1986 = vmatpush.bf16.msra.mxu3 %v4562_v23 }
 0x32f   : > { %2068 = vmatpush.bf16.msrb.mxu0 %v4407_v18  ;;  %v4637_v44 = vpop.f32.mrf.mxu2 }
 0x330   : > { %2081 = vmatpush.bf16.msrb.mxu1 %v4409_v55  ;;  %4802 = vst [vmem:[#allocation24_spill] sm:$0xff] %v4637_v44 }
 0x331   : > { %v3585_v52 = vpop.eup %3584  ;;  %2094 = vmatpush.bf16.msrb.mxu2 %v4411_v12  ;;  %v4639_v25 = vpop.f32.mrf.mxu3 }
 0x332   : > { %v1421_v46 = vmul.f32 %v3585_v52, %v1415_v31  ;;  %2107 = vmatpush.bf16.msrb.mxu3 %v4414_v0  ;;  %v4663_v52 = vperm.slane %v1464_v24, 3 }
 0x333   : > { %2069 = vmatpush.bf16.msrb.mxu0 %v4421_v26 }
 0x334   : > { %1423 = vst [vmem:[#allocation4] sm:$0xff] %v1421_v46  ;;  %v1424_v2 = vpack.c.bf16 %v1421_v46, %v1421_v46  ;;  %2082 = vmatpush.bf16.msrb.mxu1 %v4425_v49 }
 0x335   : > { %2095 = vmatpush.bf16.msrb.mxu2 %v4432_v8 }
 0x336   : > { %1426 = vst [vmem:[#allocation2 + $0xc] sm:$0xf] %v1424_v2  ;;  %2108 = vmatpush.bf16.msrb.mxu3 %v4434_v9  ;;  %v1713_v2 = vadd.f32 %v1712_v45, %v4663_v52 }
 0x337   : > { %2070 = vmatpush.bf16.msrb.mxu0 %v4440_v40 }
 0x338   : > { %2083 = vmatpush.bf16.msrb.mxu1 %v4442_v47 }
 0x339   : > { %2096 = vmatpush.bf16.msrb.mxu2 %v4447_v57 }
 0x33a   : > { %2109 = vmatpush.bf16.msrb.mxu3 %v4449_v3 }
 0x33b   : > { %2071 = vmatpush.bf16.msrb.mxu0 %v4455_v11 }
 0x33c   : > { %2084 = vmatpush.bf16.msrb.mxu1 %v4469_v13 }
 0x33d   : > { %v3331_v43 = vld [vmem:[#allocation2 + $0x8] sm:$0xff]  ;;  %2097 = vmatpush.bf16.msrb.mxu2 %v4471_v30 }
 0x33e   : > { %1659 = vmatmul.bf16.gmra.mxu0 %v3331_v43  ;;  %1678 = vmatmul.bf16.gmra.mxu1 %v3331_v43 }
 0x33f   : > { %1697 = vmatmul.bf16.gmra.mxu2 %v3331_v43  ;;  %1716 = vmatmul.bf16.gmra.mxu3 %v3331_v43 }
 0x340   : > { %2110 = vmatpush.bf16.msrb.mxu3 %v4473_v32  ;;  %2072 = vmatpush.bf16.msrb.mxu0 %v4492_v54 }
 0x341   : > { %2085 = vmatpush.bf16.msrb.mxu1 %v4494_v60  ;;  %2098 = vmatpush.bf16.msrb.mxu2 %v4499_v14 }
 0x344   : > { %2111 = vmatpush.bf16.msrb.mxu3 %v4501_v20  ;;  %2073 = vmatpush.bf16.msrb.mxu0 %v4508_v58 }
 0x345   : > { %2086 = vmatpush.bf16.msrb.mxu1 %v4520_v16  ;;  %2099 = vmatpush.bf16.msrb.mxu2 %v4522_v17 }
 0x348   : > { %2112 = vmatpush.bf16.msrb.mxu3 %v4531_v5  ;;  %2074 = vmatpush.bf16.msrb.mxu0 %v4536_v36 }
 0x349   : > { %2087 = vmatpush.bf16.msrb.mxu1 %v4539_v28  ;;  %2100 = vmatpush.bf16.msrb.mxu2 %v4543_v33 }
 0x34c   : > { %2113 = vmatpush.bf16.msrb.mxu3 %v4545_v50  ;;  %2075 = vmatpush.bf16.msrb.mxu0 %v4551_v35 }
 0x34d   : > { %2088 = vmatpush.bf16.msrb.mxu1 %v4556_v56  ;;  %2101 = vmatpush.bf16.msrb.mxu2 %v4560_v51 }
 0x34e   : > { %1948 = vmatmul.bf16.vlgmr.msra.gmra.mxu0 %v1779_v29  ;;  %1961 = vmatmul.bf16.vlgmr.msra.gmra.mxu1 %v1779_v29 }
 0x34f   : > { %1974 = vmatmul.bf16.vlgmr.msra.gmra.mxu2 %v1779_v29  ;;  %1987 = vmatmul.bf16.vlgmr.msra.gmra.mxu3 %v1779_v29 }
 0x350   : > { %2114 = vmatpush.bf16.msrb.mxu3 %v4562_v23  ;;  %2196 = vmatpush.bf16.msra.mxu0 %v4407_v18 }
 0x351   : > { %2209 = vmatpush.bf16.msra.mxu1 %v4409_v55  ;;  %2222 = vmatpush.bf16.msra.mxu2 %v4411_v12 }
 0x354   : > { %2235 = vmatpush.bf16.msra.mxu3 %v4414_v0  ;;  %2197 = vmatpush.bf16.msra.mxu0 %v4421_v26 }
 0x355   : > { %2210 = vmatpush.bf16.msra.mxu1 %v4425_v49  ;;  %2223 = vmatpush.bf16.msra.mxu2 %v4432_v8 }
 0x358   : > { %2236 = vmatpush.bf16.msra.mxu3 %v4434_v9  ;;  %2198 = vmatpush.bf16.msra.mxu0 %v4440_v40 }
 0x359   : > { %2211 = vmatpush.bf16.msra.mxu1 %v4442_v47  ;;  %2224 = vmatpush.bf16.msra.mxu2 %v4447_v57 }
 0x35c   : > { %2237 = vmatpush.bf16.msra.mxu3 %v4449_v3  ;;  %2199 = vmatpush.bf16.msra.mxu0 %v4455_v11 }
 0x35d   : > { %2212 = vmatpush.bf16.msra.mxu1 %v4469_v13  ;;  %2225 = vmatpush.bf16.msra.mxu2 %v4471_v30 }
 0x360   : > { %2238 = vmatpush.bf16.msra.mxu3 %v4473_v32  ;;  %2200 = vmatpush.bf16.msra.mxu0 %v4492_v54 }
 0x361   : > { %2213 = vmatpush.bf16.msra.mxu1 %v4494_v60  ;;  %2226 = vmatpush.bf16.msra.mxu2 %v4499_v14 }
 0x364   : > { %2239 = vmatpush.bf16.msra.mxu3 %v4501_v20  ;;  %2201 = vmatpush.bf16.msra.mxu0 %v4508_v58 }
 0x365   : > { %2214 = vmatpush.bf16.msra.mxu1 %v4520_v16  ;;  %2227 = vmatpush.bf16.msra.mxu2 %v4522_v17 }
 0x368   : > { %2240 = vmatpush.bf16.msra.mxu3 %v4531_v5  ;;  %2202 = vmatpush.bf16.msra.mxu0 %v4536_v36 }
 0x369   : > { %2215 = vmatpush.bf16.msra.mxu1 %v4539_v28  ;;  %2228 = vmatpush.bf16.msra.mxu2 %v4543_v33 }
 0x36c   : > { %2241 = vmatpush.bf16.msra.mxu3 %v4545_v50  ;;  %2203 = vmatpush.bf16.msra.mxu0 %v4551_v35 }
 0x36d   : > { %2216 = vmatpush.bf16.msra.mxu1 %v4556_v56  ;;  %2229 = vmatpush.bf16.msra.mxu2 %v4560_v51 }
 0x370   : > { %2242 = vmatpush.bf16.msra.mxu3 %v4562_v23 }
 0x3bb   : > { %v4641_v39 = vpop.f32.mrf.mxu0  ;;  %v4643_v1 = vpop.f32.mrf.mxu1 }
 0x3bc   : > { %4803 = vst [vmem:[#allocation23_spill] sm:$0xff] %v4641_v39 }
 0x3bd   : > { %4804 = vst [vmem:[#allocation25_spill] sm:$0xff] %v4643_v1 }
 0x3c2   : > { %v4645_v21 = vpop.f32.mrf.mxu2  ;;  %v4647_v38 = vpop.f32.mrf.mxu3 }
 0x3c3   : > { %4805 = vst [vmem:[#allocation26_spill] sm:$0xff] %v4645_v21  ;;  %v4649_v42 = vpop.f32.mrf.mxu0  ;;  %v4651_v61 = vpop.f32.mrf.mxu1 }
 0x3c4   : > { %4806 = vst [vmem:[#allocation28_spill] sm:$0xff] %v4647_v38 }
 0x3c5   : > { %4807 = vst [vmem:[#allocation27_spill] sm:$0xff] %v4649_v42 }
 0x3c6   : > { %4808 = vst [vmem:[#allocation29_spill] sm:$0xff] %v4651_v61 }
 0x3ca   : > { %v4659_v7 = vpop.f32.mrf.mxu2  ;;  %v4661_v27 = vpop.f32.mrf.mxu3 }
 0x3cb   : > { %4809 = vst [vmem:[#allocation30_spill] sm:$0xff] %v4659_v7  ;;  %v1949_v34 = vpop.f32.mrf.mxu0  ;;  %v1962_v53 = vpop.f32.mrf.mxu1 }
 0x3cc   : > { %4810 = vst [vmem:[#allocation31_spill] sm:$0xff] %v4661_v27  ;;  %v1992_v4 = vadd.f32 %v1949_v34, %v1656_v10  ;;  %v1993_v48 = vadd.f32 %v1962_v53, %v1675_v22  ;;  %v4666_v22 = vperm.slane %v1464_v24, 2 }
 0x3ce   : > { %v3214_v31 = vmul.f32 -1.442695, %v1992_v4  ;;  %v3215_v46 = vmul.f32 -1.442695, %v1993_v48  ;;  %4811 = vst [vmem:[#allocation32_spill] sm:$0xff] %v4666_v22  ;;  %v1694_v45 = vadd.f32 %v1693_v15, %v4666_v22 }
 0x3d0   : > { %3586 = vpow2.f32 %v3214_v31 }
 0x3d1   : > { %3588 = vpow2.f32 %v3215_v46 }
 0x3d2   : > { %v1975_v43 = vpop.f32.mrf.mxu2  ;;  %v1988_v41 = vpop.f32.mrf.mxu3 }
 0x3d3   : > { %v1995_v29 = vadd.f32 %v1988_v41, %v1713_v2  ;;  %v1951_v37 = vpop.f32.mrf.mxu0  ;;  %v1964_v6 = vpop.f32.mrf.mxu1  ;;  %v1994_v46 = vadd.f32 %v1975_v43, %v1694_v45 }
 0x3d5   : > { %v3216_v7 = vmul.f32 -1.442695, %v1995_v29 }
 0x3d6   : > { %v3587_v61 = vpop.eup %3586 }
 0x3d7   : > { %v3589_v27 = vpop.eup %3588  ;;  %v1999_v42 = vadd.f32 1.0, %v3587_v61  ;;  %3590 = vpow2.f32 %v3216_v7 }
 0x3d8   : > { %v2018_v10 = vadd.f32 1.0, %v3589_v27 }
 0x3d9   : > { %3592 = vrcp.f32 %v1999_v42  ;;  %v2011_v7 = vand.u32 2147483648, %v1999_v42  ;;  %v2009_v6 = vand.u32 2147483647, %v1999_v42  ;;  %vm2005_vm2 = vweird.f32 %v1999_v42 }
 0x3da   : > { %3594 = vrcp.f32 %v2018_v10  ;;  %v1990_v34 = vpop.f32.mrf.mxu3  ;;  %v1977_v53 = vpop.f32.mrf.mxu2  ;;  %v2030_v24 = vand.u32 2147483648, %v2018_v10  ;;  %vm2024_vm3 = vweird.f32 %v2018_v10 }
 0x3db   : > { %v2028_v53 = vand.u32 2147483647, %v2018_v10  ;;  %v2012_v43 = vor.u32 1.1754944e-38, %v2011_v7  ;;  %vm2010_vm6 = vcmp.eq.f32.partialorder %v2009_v6, 8.507059e+37 }
 0x3dd   : > { %v3591_v4 = vpop.eup %3590  ;;  %vm2029_vm7 = vcmp.eq.f32.partialorder %v2028_v53, 8.507059e+37 }
 0x3de   : > { %v2038_v48 = vadd.f32 1.0, %v3591_v4 }
 0x3df   : > { %v3593_v31 = vpop.eup %3592 }
 0x3e0   : > { %v3595_v2 = vpop.eup %3594  ;;  %v2001_v41 = vmul.f32 %v3593_v31, %v1999_v42  ;;  %3596 = vrcp.f32 %v2038_v48  ;;  %vm2006_vm0 = vweird.f32 %v3593_v31  ;;  %v2050_v7 = vand.u32 2147483648, %v2038_v48 }
 0x3e1   : > { %v2020_v29 = vmul.f32 %v3595_v2, %v2018_v10  ;;  %3598 = vtanh.f32 %v1994_v46  ;;  %vm2025_vm1 = vweird.f32 %v3595_v2  ;;  %vm2007_vm4 = vmor %vm2005_vm2, %vm2006_vm0  ;;  %vm2044_vm9 = vweird.f32 %v2038_v48 }
 0x3e2   : > { %v2002_v37 = vsub.f32 1.0, %v2001_v41  ;;  %vm2026_vm5 = vmor %vm2024_vm3, %vm2025_vm1  ;;  %v2031_v41 = vor.u32 1.1754944e-38, %v2030_v24  ;;  %v2048_v24 = vand.u32 2147483647, %v2038_v48  ;;  %v2051_v6 = vor.u32 1.1754944e-38, %v2050_v7 }
 0x3e3   : > { %v2021_v61 = vsub.f32 1.0, %v2020_v29  ;;  %v1774_v29 = vld [vmem:[#allocation5] sm:$0xff] }
 0x3e4   : > { %v2003_v27 = vmul.f32 %v3593_v31, %v2002_v37  ;;  %vm2049_vm11 = vcmp.eq.f32.partialorder %v2048_v24, 8.507059e+37 }
 0x3e5   : > { %v2022_v34 = vmul.f32 %v3595_v2, %v2021_v61 }
 0x3e6   : > { %v3597_v21 = vpop.eup %3596  ;;  %v2004_v15 = vadd.f32 %v3593_v31, %v2003_v27 }
 0x3e7   : > { %v2023_v4 = vadd.f32 %v3595_v2, %v2022_v34  ;;  %v2040_v45 = vmul.f32 %v3597_v21, %v2038_v48  ;;  %v3599_v46 = vpop.eup %3598  ;;  %vm2045_vm8 = vweird.f32 %v3597_v21 }
 0x3e8   : > { %v2008_v38 = vsel %vm2007_vm4, %v3593_v31, %v2004_v15  ;;  %vm2046_vm10 = vmor %vm2044_vm9, %vm2045_vm8 }
 0x3e9   : > { %v2013_v37 = vsel %vm2010_vm6, %v2012_v43, %v2008_v38  ;;  %v2027_v1 = vsel %vm2026_vm5, %v3595_v2, %v2023_v4  ;;  %v2041_v61 = vsub.f32 1.0, %v2040_v45 }
 0x3ea   : > { %v2032_v39 = vsel %vm2029_vm7, %v2031_v41, %v2027_v1  ;;  %v2055_v44 = vmul.f32 %v3599_v46, %v2013_v37 }
 0x3eb   : > { %v2054_v22 = vmul.f32 %v2032_v39, %v1774_v29  ;;  %v2042_v27 = vmul.f32 %v3597_v21, %v2041_v61 }
 0x3ed   : > { %v4669_v42 = vadd.f32 %v2055_v44, %v2054_v22  ;;  %v2043_v10 = vadd.f32 %v3597_v21, %v2042_v27 }
 0x3ef   : > { %3600 = vtanh.f32 %v4669_v42  ;;  %v2047_v31 = vsel %vm2046_vm10, %v3597_v21, %v2043_v10 }
 0x3f0   : > { %v2052_v2 = vsel %vm2049_vm11, %v2051_v6, %v2047_v31 }
 0x3f5   : > { %v3601_v38 = vpop.eup %3600 }
 0x3f6   : > { %v2058_v34 = vmul.f32 %v3601_v38, %v2052_v2 }
 0x3f8   : > { %v2067_v1 = vpack.c.bf16 %v2058_v34, %v2058_v34 }
 0x3fa   : > { %2076 = vmatmul.bf16.vlgmr.msrb.gmra.mxu0 %v2067_v1  ;;  %2089 = vmatmul.bf16.vlgmr.msrb.gmra.mxu1 %v2067_v1 }
 0x3fb   : > { %2102 = vmatmul.bf16.vlgmr.msrb.gmra.mxu2 %v2067_v1  ;;  %2115 = vmatmul.bf16.vlgmr.msrb.gmra.mxu3 %v2067_v1 }
 0x3fc   : > { %2324 = vmatpush.bf16.msrb.mxu0 %v4407_v18  ;;  %2337 = vmatpush.bf16.msrb.mxu1 %v4409_v55  ;;  %v1658_v18 = vadd.f32 %v4633_v63, %v4653_v59  ;;  %v1677_v55 = vadd.f32 %v4635_v19, %v4655_v62 }
 0x3fd   : > { %2350 = vmatpush.bf16.msrb.mxu2 %v4411_v12  ;;  %2363 = vmatpush.bf16.msrb.mxu3 %v4414_v0 }
 0x400   : > { %2325 = vmatpush.bf16.msrb.mxu0 %v4421_v26  ;;  %2338 = vmatpush.bf16.msrb.mxu1 %v4425_v49 }
 0x401   : > { %2351 = vmatpush.bf16.msrb.mxu2 %v4432_v8  ;;  %2364 = vmatpush.bf16.msrb.mxu3 %v4434_v9 }
 0x404   : > { %2326 = vmatpush.bf16.msrb.mxu0 %v4440_v40  ;;  %2339 = vmatpush.bf16.msrb.mxu1 %v4442_v47  ;;  %v1715_v40 = vadd.f32 %v4639_v25, %v4663_v52 }
 0x405   : > { %2352 = vmatpush.bf16.msrb.mxu2 %v4447_v57  ;;  %2365 = vmatpush.bf16.msrb.mxu3 %v4449_v3 }
 0x408   : > { %2327 = vmatpush.bf16.msrb.mxu0 %v4455_v11  ;;  %2340 = vmatpush.bf16.msrb.mxu1 %v4469_v13 }
 0x409   : > { %2353 = vmatpush.bf16.msrb.mxu2 %v4471_v30  ;;  %2366 = vmatpush.bf16.msrb.mxu3 %v4473_v32 }
 0x40c   : > { %2328 = vmatpush.bf16.msrb.mxu0 %v4492_v54  ;;  %2341 = vmatpush.bf16.msrb.mxu1 %v4494_v60 }
 0x40d   : > { %2354 = vmatpush.bf16.msrb.mxu2 %v4499_v14  ;;  %2367 = vmatpush.bf16.msrb.mxu3 %v4501_v20 }
 0x410   : > { %2329 = vmatpush.bf16.msrb.mxu0 %v4508_v58  ;;  %2342 = vmatpush.bf16.msrb.mxu1 %v4520_v16 }
 0x411   : > { %2355 = vmatpush.bf16.msrb.mxu2 %v4522_v17  ;;  %2368 = vmatpush.bf16.msrb.mxu3 %v4531_v5  ;;  %v4812_v17 = vld [vmem:[#allocation32_spill] sm:$0xff] }
 0x412   : > { %v4813_v5 = vld [vmem:[#allocation24_spill] sm:$0xff] }
 0x414   : > { %2330 = vmatpush.bf16.msrb.mxu0 %v4536_v36  ;;  %2343 = vmatpush.bf16.msrb.mxu1 %v4539_v28  ;;  %v1696_v36 = vadd.f32 %v4813_v5, %v4812_v17 }
 0x415   : > { %2356 = vmatpush.bf16.msrb.mxu2 %v4543_v33  ;;  %2369 = vmatpush.bf16.msrb.mxu3 %v4545_v50 }
 0x418   : > { %2331 = vmatpush.bf16.msrb.mxu0 %v4551_v35  ;;  %2344 = vmatpush.bf16.msrb.mxu1 %v4556_v56 }
 0x419   : > { %2357 = vmatpush.bf16.msrb.mxu2 %v4560_v51  ;;  %2370 = vmatpush.bf16.msrb.mxu3 %v4562_v23 }
 0x477   : > { %v2077_v12 = vpop.f32.mrf.mxu0  ;;  %v2090_v0 = vpop.f32.mrf.mxu1 }
 0x478   : > { %v2120_v26 = vadd.f32 %v2077_v12, %v1658_v18  ;;  %v2121_v49 = vadd.f32 %v2090_v0, %v1677_v55 }
 0x47a   : > { %v3217_v8 = vmul.f32 -1.442695, %v2120_v26  ;;  %v3218_v9 = vmul.f32 -1.442695, %v2121_v49  ;;  %v4815_v49 = vld [vmem:[#allocation25_spill] sm:$0xff] }
 0x47c   : > { %3602 = vpow2.f32 %v3217_v8  ;;  %v1680_v8 = vadd.f32 %v4815_v49, %v4655_v62 }
 0x47d   : > { %3604 = vpow2.f32 %v3218_v9 }
 0x47e   : > { %v2103_v47 = vpop.f32.mrf.mxu2  ;;  %v2116_v57 = vpop.f32.mrf.mxu3 }
 0x47f   : > { %v2123_v3 = vadd.f32 %v2116_v57, %v1715_v40  ;;  %v2079_v11 = vpop.f32.mrf.mxu0  ;;  %v2092_v13 = vpop.f32.mrf.mxu1  ;;  %v2122_v50 = vadd.f32 %v2103_v47, %v1696_v36 }
 0x480   : > { %v4816_v13 = vld [vmem:[#allocation28_spill] sm:$0xff] }
 0x481   : > { %v3219_v30 = vmul.f32 -1.442695, %v2123_v3 }
 0x482   : > { %v3603_v32 = vpop.eup %3602 }
 0x483   : > { %v3605_v54 = vpop.eup %3604  ;;  %v2127_v60 = vadd.f32 1.0, %v3603_v32  ;;  %3606 = vpow2.f32 %v3219_v30  ;;  %v1718_v30 = vadd.f32 %v4816_v13, %v4663_v52 }
 0x484   : > { %v2146_v14 = vadd.f32 1.0, %v3605_v54 }
 0x485   : > { %3608 = vrcp.f32 %v2127_v60  ;;  %v2139_v19 = vand.u32 2147483648, %v2127_v60  ;;  %v2137_v39 = vand.u32 2147483647, %v2127_v60  ;;  %vm2133_vm14 = vweird.f32 %v2127_v60 }
 0x486   : > { %3610 = vrcp.f32 %v2146_v14  ;;  %v2105_v20 = vpop.f32.mrf.mxu2  ;;  %v2118_v58 = vpop.f32.mrf.mxu3  ;;  %v2158_v44 = vand.u32 2147483648, %v2146_v14  ;;  %v2156_v22 = vand.u32 2147483647, %v2146_v14  ;;  %vm2152_vm15 = vweird.f32 %v2146_v14 }
 0x487   : > { %v2140_v15 = vor.u32 1.1754944e-38, %v2139_v19  ;;  %vm2138_vm2 = vcmp.eq.f32.partialorder %v2137_v39, 8.507059e+37 }
 0x488   : > { %v2159_v45 = vor.u32 1.1754944e-38, %v2158_v44  ;;  %vm2157_vm3 = vcmp.eq.f32.partialorder %v2156_v22, 8.507059e+37 }
 0x489   : > { %v3607_v16 = vpop.eup %3606 }
 0x48a   : > { %v2166_v28 = vadd.f32 1.0, %v3607_v16 }
 0x48b   : > { %v3609_v33 = vpop.eup %3608 }
 0x48c   : > { %v3611_v35 = vpop.eup %3610  ;;  %v2129_v56 = vmul.f32 %v3609_v33, %v2127_v60  ;;  %3612 = vrcp.f32 %v2166_v28  ;;  %vm2134_vm12 = vweird.f32 %v3609_v33  ;;  %v2178_v38 = vand.u32 2147483648, %v2166_v28 }
 0x48d   : > { %v2148_v51 = vmul.f32 %v3611_v35, %v2146_v14  ;;  %3614 = vtanh.f32 %v2122_v50  ;;  %vm2153_vm13 = vweird.f32 %v3611_v35  ;;  %vm2135_vm0 = vmor %vm2133_vm14, %vm2134_vm12  ;;  %vm2172_vm5 = vweird.f32 %v2166_v28 }
 0x48e   : > { %v2130_v23 = vsub.f32 1.0, %v2129_v56  ;;  %vm2154_vm1 = vmor %vm2152_vm15, %vm2153_vm13  ;;  %v2176_v2 = vand.u32 2147483647, %v2166_v28  ;;  %v2179_v1 = vor.u32 1.1754944e-38, %v2178_v38  ;;  %v4817_v56 = vld [vmem:[#allocation26_spill] sm:$0xff] }
 0x48f   : > { %v2149_v63 = vsub.f32 1.0, %v2148_v51  ;;  %v1699_v51 = vadd.f32 %v4817_v56, %v4812_v17 }
 0x490   : > { %v2131_v25 = vmul.f32 %v3609_v33, %v2130_v23  ;;  %vm2177_vm7 = vcmp.eq.f32.partialorder %v2176_v2, 8.507059e+37 }
 0x491   : > { %v2150_v21 = vmul.f32 %v3611_v35, %v2149_v63 }
 0x492   : > { %v3613_v48 = vpop.eup %3612  ;;  %v2132_v53 = vadd.f32 %v3609_v33, %v2131_v25 }
 0x493   : > { %v2151_v43 = vadd.f32 %v3611_v35, %v2150_v21  ;;  %v2168_v4 = vmul.f32 %v3613_v48, %v2166_v28  ;;  %v3615_v29 = vpop.eup %3614  ;;  %vm2173_vm4 = vweird.f32 %v3613_v48 }
 0x494   : > { %v2136_v41 = vsel %vm2135_vm0, %v3609_v33, %v2132_v53  ;;  %vm2174_vm6 = vmor %vm2172_vm5, %vm2173_vm4 }
 0x495   : > { %v2141_v46 = vsel %vm2138_vm2, %v2140_v15, %v2136_v41  ;;  %v2155_v37 = vsel %vm2154_vm1, %v3611_v35, %v2151_v43  ;;  %v2169_v61 = vsub.f32 1.0, %v2168_v4 }
 0x496   : > { %v2160_v27 = vsel %vm2157_vm3, %v2159_v45, %v2155_v37  ;;  %v2183_v10 = vmul.f32 %v3615_v29, %v2141_v46 }
 0x497   : > { %v2182_v7 = vmul.f32 %v2160_v27, %v4669_v42  ;;  %v2170_v24 = vmul.f32 %v3613_v48, %v2169_v61  ;;  %v4814_v42 = vld [vmem:[#allocation23_spill] sm:$0xff] }
 0x498   : > { %v1661_v26 = vadd.f32 %v4814_v42, %v4653_v59 }
 0x499   : > { %v4713_v31 = vadd.f32 %v2183_v10, %v2182_v7  ;;  %v2171_v6 = vadd.f32 %v3613_v48, %v2170_v24 }
 0x49b   : > { %3616 = vtanh.f32 %v4713_v31  ;;  %v2175_v34 = vsel %vm2174_vm6, %v3613_v48, %v2171_v6 }
 0x49c   : > { %v2180_v55 = vsel %vm2177_vm7, %v2179_v1, %v2175_v34 }
 0x4a1   : > { %v3617_v18 = vpop.eup %3616 }
 0x4a2   : > { %v2186_v12 = vmul.f32 %v3617_v18, %v2180_v55 }
 0x4a4   : > { %v2195_v0 = vpack.c.bf16 %v2186_v12, %v2186_v12 }
 0x4a6   : > { %2204 = vmatmul.bf16.vlgmr.msra.gmra.mxu0 %v2195_v0  ;;  %2217 = vmatmul.bf16.vlgmr.msra.gmra.mxu1 %v2195_v0 }
 0x4a7   : > { %2230 = vmatmul.bf16.vlgmr.msra.gmra.mxu2 %v2195_v0  ;;  %2243 = vmatmul.bf16.vlgmr.msra.gmra.mxu3 %v2195_v0 }
 0x523   : > { %v2205_v9 = vpop.f32.mrf.mxu0  ;;  %v2218_v40 = vpop.f32.mrf.mxu1 }
 0x524   : > { %v2248_v47 = vadd.f32 %v2205_v9, %v1661_v26  ;;  %v2249_v57 = vadd.f32 %v2218_v40, %v1680_v8 }
 0x526   : > { %v3220_v3 = vmul.f32 -1.442695, %v2248_v47  ;;  %v3221_v11 = vmul.f32 -1.442695, %v2249_v57 }
 0x528   : > { %3618 = vpow2.f32 %v3220_v3  ;;  %v4819_v3 = vld [vmem:[#allocation29_spill] sm:$0xff] }
 0x529   : > { %3620 = vpow2.f32 %v3221_v11  ;;  %v1682_v11 = vadd.f32 %v4819_v3, %v4655_v62 }
 0x52a   : > { %v2231_v32 = vpop.f32.mrf.mxu2  ;;  %v2244_v54 = vpop.f32.mrf.mxu3 }
 0x52b   : > { %v2251_v60 = vadd.f32 %v2244_v54, %v1718_v30  ;;  %v2207_v14 = vpop.f32.mrf.mxu0  ;;  %v2220_v20 = vpop.f32.mrf.mxu1  ;;  %v2250_v19 = vadd.f32 %v2231_v32, %v1699_v51 }
 0x52c   : > { %v4820_v20 = vld [vmem:[#allocation31_spill] sm:$0xff] }
 0x52d   : > { %v3222_v58 = vmul.f32 -1.442695, %v2251_v60 }
 0x52e   : > { %v3619_v16 = vpop.eup %3618 }
 0x52f   : > { %v3621_v5 = vpop.eup %3620  ;;  %v2255_v36 = vadd.f32 1.0, %v3619_v16  ;;  %3622 = vpow2.f32 %v3222_v58  ;;  %v1720_v58 = vadd.f32 %v4820_v20, %v4663_v52 }
 0x530   : > { %v2274_v28 = vadd.f32 1.0, %v3621_v5 }
 0x531   : > { %3624 = vrcp.f32 %v2255_v36  ;;  %v2267_v48 = vand.u32 2147483648, %v2255_v36  ;;  %v2265_v43 = vand.u32 2147483647, %v2255_v36  ;;  %vm2261_vm10 = vweird.f32 %v2255_v36 }
 0x532   : > { %3626 = vrcp.f32 %v2274_v28  ;;  %v2233_v33 = vpop.f32.mrf.mxu2  ;;  %v2246_v50 = vpop.f32.mrf.mxu3  ;;  %v2286_v53 = vand.u32 2147483648, %v2274_v28  ;;  %v2284_v45 = vand.u32 2147483647, %v2274_v28  ;;  %vm2280_vm11 = vweird.f32 %v2274_v28 }
 0x533   : > { %v2268_v46 = vor.u32 1.1754944e-38, %v2267_v48  ;;  %vm2266_vm14 = vcmp.eq.f32.partialorder %v2265_v43, 8.507059e+37 }
 0x534   : > { %v2287_v27 = vor.u32 1.1754944e-38, %v2286_v53  ;;  %vm2285_vm15 = vcmp.eq.f32.partialorder %v2284_v45, 8.507059e+37 }
 0x535   : > { %v3623_v35 = vpop.eup %3622 }
 0x536   : > { %v2294_v23 = vadd.f32 1.0, %v3623_v35 }
 0x537   : > { %v3625_v63 = vpop.eup %3624 }
 0x538   : > { %v3627_v44 = vpop.eup %3626  ;;  %v2257_v25 = vmul.f32 %v3625_v63, %v2255_v36  ;;  %3628 = vrcp.f32 %v2294_v23  ;;  %vm2262_vm8 = vweird.f32 %v3625_v63  ;;  %v2306_v0 = vand.u32 2147483648, %v2294_v23 }
 0x539   : > { %v2276_v39 = vmul.f32 %v3627_v44, %v2274_v28  ;;  %3630 = vtanh.f32 %v2250_v19  ;;  %vm2281_vm9 = vweird.f32 %v3627_v44  ;;  %vm2263_vm12 = vmor %vm2261_vm10, %vm2262_vm8  ;;  %vm2300_vm1 = vweird.f32 %v2294_v23  ;;  %v4821_v19 = vld [vmem:[#allocation30_spill] sm:$0xff] }
 0x53a   : > { %v2258_v21 = vsub.f32 1.0, %v2257_v25  ;;  %vm2282_vm13 = vmor %vm2280_vm11, %vm2281_vm9  ;;  %v2304_v42 = vand.u32 2147483647, %v2294_v23  ;;  %v2307_v49 = vor.u32 1.1754944e-38, %v2306_v0  ;;  %v1701_v52 = vadd.f32 %v4821_v19, %v4812_v17 }
 0x53b   : > { %v2277_v22 = vsub.f32 1.0, %v2276_v39 }
 0x53c   : > { %v2259_v15 = vmul.f32 %v3625_v63, %v2258_v21  ;;  %vm2305_vm3 = vcmp.eq.f32.partialorder %v2304_v42, 8.507059e+37 }
 0x53d   : > { %v2278_v4 = vmul.f32 %v3627_v44, %v2277_v22 }
 0x53e   : > { %v3629_v41 = vpop.eup %3628  ;;  %v2260_v29 = vadd.f32 %v3625_v63, %v2259_v15 }
 0x53f   : > { %v2279_v37 = vadd.f32 %v3627_v44, %v2278_v4  ;;  %v2296_v61 = vmul.f32 %v3629_v41, %v2294_v23  ;;  %v3631_v7 = vpop.eup %3630  ;;  %vm2301_vm0 = vweird.f32 %v3629_v41 }
 0x540   : > { %v2264_v10 = vsel %vm2263_vm12, %v3625_v63, %v2260_v29  ;;  %vm2302_vm2 = vmor %vm2300_vm1, %vm2301_vm0 }
 0x541   : > { %v2269_v24 = vsel %vm2266_vm14, %v2268_v46, %v2264_v10  ;;  %v2283_v6 = vsel %vm2282_vm13, %v3627_v44, %v2279_v37  ;;  %v2297_v38 = vsub.f32 1.0, %v2296_v61 }
 0x542   : > { %v2288_v2 = vsel %vm2285_vm15, %v2287_v27, %v2283_v6  ;;  %v2311_v34 = vmul.f32 %v3631_v7, %v2269_v24 }
 0x543   : > { %v2310_v1 = vmul.f32 %v2288_v2, %v4713_v31  ;;  %v2298_v18 = vmul.f32 %v3629_v41, %v2297_v38  ;;  %v4818_v31 = vld [vmem:[#allocation27_spill] sm:$0xff] }
 0x544   : > { %v1663_v57 = vadd.f32 %v4818_v31, %v4653_v59 }
 0x545   : > { %v4725_v55 = vadd.f32 %v2311_v34, %v2310_v1  ;;  %v2299_v12 = vadd.f32 %v3629_v41, %v2298_v18 }
 0x547   : > { %3632 = vtanh.f32 %v4725_v55  ;;  %v2303_v26 = vsel %vm2302_vm2, %v3629_v41, %v2299_v12 }
 0x548   : > { %v2308_v9 = vsel %vm2305_vm3, %v2307_v49, %v2303_v26 }
 0x54d   : > { %v3633_v8 = vpop.eup %3632 }
 0x54e   : > { %v2314_v40 = vmul.f32 %v3633_v8, %v2308_v9 }
 0x550   : > { %v2323_v47 = vpack.c.bf16 %v2314_v40, %v2314_v40 }
 0x552   : > { %2332 = vmatmul.bf16.vlgmr.msrb.gmra.mxu0 %v2323_v47  ;;  %2345 = vmatmul.bf16.vlgmr.msrb.gmra.mxu1 %v2323_v47 }
 0x553   : > { %2358 = vmatmul.bf16.vlgmr.msrb.gmra.mxu2 %v2323_v47  ;;  %2371 = vmatmul.bf16.vlgmr.msrb.gmra.mxu3 %v2323_v47 }
 0x5cf   : > { %v2333_v13 = vpop.f32.mrf.mxu0  ;;  %v2346_v30 = vpop.f32.mrf.mxu1 }
 0x5d0   : > { %v2376_v32 = vadd.f32 %v2333_v13, %v1663_v57  ;;  %v2377_v54 = vadd.f32 %v2346_v30, %v1682_v11 }
 0x5d2   : > { %v3223_v60 = vmul.f32 -1.442695, %v2376_v32  ;;  %v3224_v14 = vmul.f32 -1.442695, %v2377_v54 }
 0x5d4   : > { %3634 = vpow2.f32 %v3223_v60 }
 0x5d5   : > { %3636 = vpow2.f32 %v3224_v14 }
 0x5d6   : > { %v2359_v16 = vpop.f32.mrf.mxu2  ;;  %v2372_v5 = vpop.f32.mrf.mxu3 }
 0x5d7   : > { %v2379_v36 = vadd.f32 %v2372_v5, %v1720_v58  ;;  %v2335_v28 = vpop.f32.mrf.mxu0  ;;  %v2348_v33 = vpop.f32.mrf.mxu1  ;;  %v2378_v39 = vadd.f32 %v2359_v16, %v1701_v52 }
 0x5d9   : > { %v3225_v59 = vmul.f32 -1.442695, %v2379_v36 }
 0x5da   : > { %v3635_v50 = vpop.eup %3634 }
 0x5db   : > { %v3637_v35 = vpop.eup %3636  ;;  %v2383_v62 = vadd.f32 1.0, %v3635_v50  ;;  %3638 = vpow2.f32 %v3225_v59 }
 0x5dc   : > { %v2402_v56 = vadd.f32 1.0, %v3637_v35 }
 0x5dd   : > { %3640 = vrcp.f32 %v2383_v62  ;;  %v2395_v43 = vand.u32 2147483648, %v2383_v62  ;;  %v2393_v41 = vand.u32 2147483647, %v2383_v62  ;;  %vm2389_vm6 = vweird.f32 %v2383_v62 }
 0x5de   : > { %3642 = vrcp.f32 %v2402_v56  ;;  %v2361_v51 = vpop.f32.mrf.mxu2  ;;  %v2374_v23 = vpop.f32.mrf.mxu3  ;;  %v2414_v4 = vand.u32 2147483648, %v2402_v56  ;;  %v2412_v46 = vand.u32 2147483647, %v2402_v56  ;;  %vm2408_vm7 = vweird.f32 %v2402_v56 }
 0x5df   : > { %v2396_v61 = vor.u32 1.1754944e-38, %v2395_v43  ;;  %vm2394_vm10 = vcmp.eq.f32.partialorder %v2393_v41, 8.507059e+37 }
 0x5e0   : > { %v2415_v7 = vor.u32 1.1754944e-38, %v2414_v4  ;;  %vm2413_vm11 = vcmp.eq.f32.partialorder %v2412_v46, 8.507059e+37 }
 0x5e1   : > { %v3639_v63 = vpop.eup %3638 }
 0x5e2   : > { %v2422_v44 = vadd.f32 1.0, %v3639_v63 }
 0x5e3   : > { %v3641_v25 = vpop.eup %3640 }
 0x5e4   : > { %v3643_v21 = vpop.eup %3642  ;;  %v2385_v22 = vmul.f32 %v3641_v25, %v2383_v62  ;;  %3644 = vrcp.f32 %v2422_v44  ;;  %vm2390_vm4 = vweird.f32 %v3641_v25  ;;  %v2434_v49 = vand.u32 2147483648, %v2422_v44 }
 0x5e5   : > { %v2404_v48 = vmul.f32 %v3643_v21, %v2402_v56  ;;  %3646 = vtanh.f32 %v2378_v39  ;;  %vm2409_vm5 = vweird.f32 %v3643_v21  ;;  %vm2391_vm8 = vmor %vm2389_vm6, %vm2390_vm4  ;;  %vm2428_vm13 = vweird.f32 %v2422_v44 }
 0x5e6   : > { %v2386_v53 = vsub.f32 1.0, %v2385_v22  ;;  %vm2410_vm9 = vmor %vm2408_vm7, %vm2409_vm5  ;;  %v2432_v8 = vand.u32 2147483647, %v2422_v44  ;;  %v2435_v40 = vor.u32 1.1754944e-38, %v2434_v49 }
 0x5e7   : > { %v2405_v15 = vsub.f32 1.0, %v2404_v48 }
 0x5e8   : > { %v2387_v45 = vmul.f32 %v3641_v25, %v2386_v53  ;;  %vm2433_vm15 = vcmp.eq.f32.partialorder %v2432_v8, 8.507059e+37 }
 0x5e9   : > { %v2406_v29 = vmul.f32 %v3643_v21, %v2405_v15 }
 0x5ea   : > { %v3645_v37 = vpop.eup %3644  ;;  %v2388_v17 = vadd.f32 %v3641_v25, %v2387_v45 }
 0x5eb   : > { %v2407_v27 = vadd.f32 %v3643_v21, %v2406_v29  ;;  %v2424_v10 = vmul.f32 %v3645_v37, %v2422_v44  ;;  %v3647_v6 = vpop.eup %3646  ;;  %vm2429_vm12 = vweird.f32 %v3645_v37 }
 0x5ec   : > { %v2392_v24 = vsel %vm2391_vm8, %v3641_v25, %v2388_v17  ;;  %vm2430_vm14 = vmor %vm2428_vm13, %vm2429_vm12 }
 0x5ed   : > { %v2397_v38 = vsel %vm2394_vm10, %v2396_v61, %v2392_v24  ;;  %v2411_v2 = vsel %vm2410_vm9, %v3643_v21, %v2407_v27  ;;  %v2425_v34 = vsub.f32 1.0, %v2424_v10 }
 0x5ee   : > { %v2416_v1 = vsel %vm2413_vm11, %v2415_v7, %v2411_v2  ;;  %v2439_v18 = vmul.f32 %v3647_v6, %v2397_v38 }
 0x5ef   : > { %v2438_v12 = vmul.f32 %v2416_v1, %v4725_v55  ;;  %v2426_v0 = vmul.f32 %v3645_v37, %v2425_v34 }
 0x5f1   : > { %v2440_v42 = vadd.f32 %v2439_v18, %v2438_v12  ;;  %v2427_v26 = vadd.f32 %v3645_v37, %v2426_v0 }
 0x5f3   : > { %3648 = vtanh.f32 %v2440_v42  ;;  %2443 = vst [vmem:[#allocation5] sm:$0xff] %v2440_v42  ;;  %v2431_v9 = vsel %vm2430_vm14, %v3645_v37, %v2427_v26 }
 0x5f4   : > { %v2436_v31 = vsel %vm2433_vm15, %v2435_v40, %v2431_v9 }
 0x5f8   : > { %2448 = sbr.rel (%p3226_p1) target bundleno = 1699 (0x6a3), region = 80 }
 0x5f9   : > { %v3649_v47 = vpop.eup %3648 }
 0x5fa   : > { %v2442_v57 = vmul.f32 %v3649_v47, %v2436_v31 }
 0x5fc   : > { %2444 = vst [vmem:[#allocation4 + $0x8] sm:$0xff] %v2442_v57 }
 0x5fd   : > { %v3403_v55 = vld [vmem:[#allocation15 + $0x38] sm:$0xff]  ;;  %v3402_v3 = vld [vmem:[#allocation15 + $0x30] sm:$0xff]  ;;  %v3401_v11 = vld [vmem:[#allocation15 + $0x28] sm:$0xff] }
 0x5fe   : > { %2519 = vmatpush.bf16.msra.mxu0 %v3403_v55  ;;  %v3400_v13 = vld [vmem:[#allocation15 + $0x20] sm:$0xff]  ;;  %v3399_v30 = vld [vmem:[#allocation15 + $0x18] sm:$0xff]  ;;  %v3398_v32 = vld [vmem:[#allocation15 + $0x10] sm:$0xff] }
 0x5ff   : > { %v3397_v54 = vld [vmem:[#allocation15 + $0x8] sm:$0xff]  ;;  %v3396_v60 = vld [vmem:[#allocation15] sm:$0xff] }
 0x600   : > { %v3650_v58 = vld [vmem:[%s4770_s6] ss:$0 sm:$0xff] }
 0x602   : > { %2520 = vmatpush.bf16.msra.mxu0 %v3402_v3 }
 0x603   : > { %v2449_v14 = vld [vmem:[#allocation4 + $0x8] sm:$0xff] }
 0x604   : > { %v2450_v20 = vpack.c.bf16 %v2449_v14, %v2449_v14 }
 0x606   : > { %2521 = vmatpush.bf16.msra.mxu0 %v3401_v11 }
 0x60a   : > { %2522 = vmatpush.bf16.msra.mxu0 %v3400_v13 }
 0x60e   : > { %2523 = vmatpush.bf16.msra.mxu0 %v3399_v30 }
 0x612   : > { %2524 = vmatpush.bf16.msra.mxu0 %v3398_v32 }
 0x616   : > { %2525 = vmatpush.bf16.msra.mxu0 %v3397_v54 }
 0x61a   : > { %2526 = vmatpush.bf16.msra.mxu0 %v3396_v60 }
 0x61d   : > { %2527 = vmatmul.bf16.vlgmr.msra.gmra.mxu0 %v2450_v20 }
 0x69a   : > { %v2528_v16 = vpop.f32.mrf.mxu0 }
 0x69b   : > { %v2529_v5 = vadd.f32 %v3650_v58, %v2528_v16 }
 0x69d   : > { %2532 = vst [vmem:[#allocation17] sm:$0xff] %v2529_v5 }
 0x6a2   : > { %v2530_v36 = vpop.f32.mrf.mxu0 }
 0x6a3 PF: > { %s4822_s12 = sadd.s32 4294967295, %s3925_s29   ;;  %s2543_s13 = sshll.u32 %s4771_s7, 4  ;;  %s2544_s13 = int_to_ptr.hbm [resolvable:$true] %s2543_s13 }
 0x6a4   : > { %p3461_p3 = scmp.eq.s32.totalorder %s4822_s12, 1  ;;  %s3937_s15 = smov [#allocation17]  }
 0x6a5   : > { %s2541_s16 = sshll.u32 %s3937_s15, 4  ;;  %s2542_s16 = int_to_ptr.vmem [resolvable:$true] %s2541_s16 }
 0x6a6   : > { %3427 = dma.vmem_to_hbm [thread:$0]  (%p3461_p3), %s2542_s16, 128, %s2544_s13, [#allocation8]  }
 0x6a7   : > { %3900 = dma.done.wait (%p3461_p3), [#allocation8], 128  }
 0x6a8   : > { %3902 = vsyncadd (%p3461_p3), [#allocation8], 4294967168 }
 0x6a9 PF: > { %s24_s29 = sadd.s32 1, %s3925_s29   ;;  %s4823_s24 = smov %s3909_s25 }
 0x6aa   : > { %p21_p4 = scmp.ge.s32.totalorder %s24_s29, 4   ;;  %s4824_s25 = smov %s3913_s26 }
 0x6ab   : > { %s4825_s26 = smov %s4084_s11  ;;  %s4826_s27 = smov %s3921_s28 }
 0x6ac   : > { %s4827_s28 = smov %s4829_s20  ;;  %23 = sbr.rel (!%p21_p4) target bundleno = 10 (0xa), region = 124 }
 0x6b1   :  { %2557 = vsyncpa [#allocation7], 1 }
 0x6b2   :  { %2559 = vsyncpa [#allocation7 + $0x1], 1 }
 0x6b3   :  { %2560 = vsyncpa [#allocation10], 1 }
 0x6b4   :  { %2561 = vsyncpa [#allocation13], 1 }
 0x6b5   :  { %2562 = vsyncpa [#allocation16], 1 }
 0x6b6   :  { %2563 = vsyncpa [#allocation8], 1 }
 0x6b7   :  { %2565 = vsyncpa [#allocation8 + $0x1], 1 }

</bundles_post_ra>
